<compile_context>
chip_gen: v7x
topology: tpu7x:2x2x1
jax: 0.10.0
libtpu: 0.0.40
codegen_flags: <defaults>
</compile_context>

<pallas_src>
from functools import partial

import jax
import jax.numpy as jnp
from jax import lax
from jax.experimental import pallas as pl
from jax.experimental.pallas import tpu as pltpu

BN_EPS = 1e-5
COMPUTE_DTYPE = jnp.bfloat16          # MXU-native operand / intermediate dtype


# ------------------------------ small helpers -------------------------------

def _round_up(x, m):
    return (x + m - 1) // m * m


def _vmem_budget():
    """Generation-aware scoped-VMEM budget: physical capacity minus headroom."""
    try:
        cap = int(pltpu.get_tpu_info().vmem_capacity_bytes)
    except Exception:                  # interpret mode / older runtimes
        cap = 64 << 20                 # v7x-safe lower bound
    return max(32 << 20, cap - (16 << 20))


def _pick_row_tile(H, W, cin, cout, out_bytes, budget):
    """Largest divisor of H whose per-step VMEM footprint fits the budget."""
    in_b = jnp.dtype(COMPUTE_DTYPE).itemsize
    base = (2 * in_b * (H + 2) * (W + 2) * cin       # resident padded image (x2 bufs)
            + 2 * in_b * 9 * cin * cout              # folded weights (x2 bufs)
            + 4 * 4 * cout)                          # BN scale/shift
    best = 1
    for th in range(1, H + 1):
        if H % th:
            continue
        live = (2 * out_bytes * th * W * cout        # output block (x2 bufs)
                + 4 * th * W * cout                  # f32 accumulator
                + in_b * (th + 2) * W * 3 * cin)     # folded-tap operand
        if base + live <= budget and 4 * th * W * cout <= (8 << 20):
            best = th
    return best


# ----------------------------- Pallas kernels ------------------------------

def _deconv_matmul_kernel(x_ref, w_ref, b_ref, o_ref):
    # ConvTranspose2d(k=2, s=2) as a tiled matmul over flattened N*H*W rows:
    #   x_ref: (TM, Cin)        bf16
    #   w_ref: (Cin, 4*Cout)    bf16, column = (a*2 + b)*Cout + oc  (tap-major)
    #   b_ref: (1, 4*Cout)      f32 bias tiled over the 4 taps
    #   o_ref: (TM, 4*Cout)
    o_ref[...] = (
        jnp.dot(x_ref[...], w_ref[...], preferred_element_type=jnp.float32)
        + b_ref[...]
    ).astype(o_ref.dtype)


def _conv3x3_bn_elu_kernel(x_ref, w_ref, scale_ref, shift_ref, o_ref, *,
                           th, nchw_out):
    # Fused 3x3 conv (input pre-padded) + eval-mode BatchNorm + ELU.
    # Grid = (N, H // th); the padded image block is revisited across the row
    # axis (no re-DMA), only the output row block moves.
    #   x_ref : (1, H+2, W+2, Cin)  bf16, whole padded image of one batch elem
    #   w_ref : (3, 3*Cin, Cout)    bf16, horizontal taps folded into K
    #   scale_ref, shift_ref : (1, Cout) f32 folded BN scale / shift
    #   o_ref : (1, th, W, Cout)          [nchw_out=False]
    #           (1, Cout, th*W)  lane-dense NCHW slab  [nchw_out=True]
    W = x_ref.shape[2] - 2
    Cin = x_ref.shape[3]
    Cout = w_ref.shape[2]

    r = pl.program_id(1)
    row0 = pl.multiple_of(r * th, th)

    # One slab load per row block (th + 2 halo rows).
    slab = x_ref[0, pl.ds(row0, th + 2), :, :]            # (th+2, W+2, Cin)

    # Fold the 3 horizontal taps into the contraction dim once (single
    # lane-axis concat) -> per vertical tap only a cheap leading-dim slice.
    folded = jnp.concatenate(
        [slab[:, 0:W, :], slab[:, 1:1 + W, :], slab[:, 2:2 + W, :]],
        axis=-1)                                          # (th+2, W, 3*Cin)

    acc = None
    for di in range(3):                                   # static vertical taps
        patch = folded[di:di + th].reshape(th * W, 3 * Cin)
        contrib = jnp.dot(patch, w_ref[di],
                          preferred_element_type=jnp.float32)
        acc = contrib if acc is None else acc + contrib   # K = 3*Cin per matmul

    y = acc * scale_ref[0] + shift_ref[0]                 # BatchNorm (eval), f32
    # ELU(alpha=1); exp-1 kept (vs expm1) for lowering robustness, error ~1e-7.
    y = jnp.where(y > 0, y, jnp.exp(jnp.minimum(y, 0.0)) - 1.0)

    if nchw_out:
        # Lane-dense store: (Cout, th*W) -> last dim is a multiple of 128.
        o_ref[0] = y.T.astype(o_ref.dtype)
    else:
        o_ref[0] = y.reshape(th, W, Cout).astype(o_ref.dtype)


# ------------------------------ JAX wrappers --------------------------------

def conv_transpose2x2_pallas(x_nhwc, w, b, *, out_dtype=None):
    """ConvTranspose2d(Cin, Cout, kernel_size=2, stride=2) in NHWC."""
    out_dtype = COMPUTE_DTYPE if out_dtype is None else out_dtype
    N, H, W, Cin = x_nhwc.shape
    Cout = w.shape[1]
    M = N * H * W
    budget = _vmem_budget()

    # bf16 operands; casts fuse with the NCHW->NHWC transpose / flatten.
    x_flat = x_nhwc.reshape(M, Cin).astype(COMPUTE_DTYPE)
    # column = (a*2 + b)*Cout + oc  (tap-major): w is PyTorch (Cin, Cout, 2, 2)
    w_flat = jnp.transpose(w, (0, 2, 3, 1)).reshape(Cin, 4 * Cout)
    w_flat = w_flat.astype(COMPUTE_DTYPE)
    b_rep = jnp.tile(b, 4).reshape(1, 4 * Cout).astype(jnp.float32)

    in_b = jnp.dtype(COMPUTE_DTYPE).itemsize
    out_b = jnp.dtype(out_dtype).itemsize

    # Large M tile (HBM-bound op); shrink only if a pathological channel count
    # would blow the budget.  Keep tm a multiple of 8 and pad M so tm | M.
    tm = min(2048, _round_up(M, 8))

    def _step_bytes(t):
        return (2 * in_b * t * Cin + 2 * in_b * Cin * 4 * Cout
                + 2 * 4 * 4 * Cout
                + 2 * out_b * t * 4 * Cout + 4 * t * 4 * Cout)

    while tm > 8 and _step_bytes(tm) > budget:
        tm = max(8, (tm // 2) // 8 * 8)

    M_pad = _round_up(M, tm)
    if M_pad != M:
        x_flat = jnp.pad(x_flat, ((0, M_pad - M), (0, 0)))

    cost = pl.CostEstimate(
        flops=2 * M * Cin * 4 * Cout,
        transcendentals=0,
        bytes_accessed=in_b * (M * Cin + Cin * 4 * Cout)
                       + out_b * M * 4 * Cout)

    y = pl.pallas_call(
        _deconv_matmul_kernel,
        out_shape=jax.ShapeDtypeStruct((M_pad, 4 * Cout), out_dtype),
        grid=(M_pad // tm,),
        in_specs=[
            pl.BlockSpec((tm, Cin), lambda i: (i, 0)),
            pl.BlockSpec((Cin, 4 * Cout), lambda i: (0, 0)),
            pl.BlockSpec((1, 4 * Cout), lambda i: (0, 0)),
        ],
        out_specs=pl.BlockSpec((tm, 4 * Cout), lambda i: (i, 0)),
        compiler_params=pltpu.CompilerParams(
            dimension_semantics=("parallel",),
            vmem_limit_bytes=budget),
        cost_estimate=cost,
    )(x_flat, w_flat, b_rep)

    if M_pad != M:
        y = y[:M]

    # tap-major columns -> interleaved upsampled NHWC.  XLA fuses this
    # reshape/transpose with the downstream concat + pad into one producer
    # fusion (single HBM pass).
    y = y.reshape(N, H, W, 2, 2, Cout).transpose(0, 1, 3, 2, 4, 5)
    return y.reshape(N, 2 * H, 2 * W, Cout)


def conv3x3_bn_elu_pallas(x_nhwc, w_hwio, scale, shift, *, out_dtype,
                          nchw_out=False):
    """Conv2d(k=3, pad=1, bias=False) + BatchNorm(eval) + ELU (NHWC compute).

    Returns NHWC unless nchw_out=True, in which case the kernel stores a
    lane-dense (Cout, th*W) slab and the result comes back directly in NCHW.
    """
    N, H, W, Cin = x_nhwc.shape
    Cout = w_hwio.shape[-1]
    budget = _vmem_budget()
    out_bytes = jnp.dtype(out_dtype).itemsize
    th = _pick_row_tile(H, W, Cin, Cout, out_bytes, budget)

    # Lane-dense NCHW block is only legal if its last dim is 128-aligned or
    # spans the whole flattened H*W axis.
    lane_dense = nchw_out and ((th * W) % 128 == 0 or th == H)

    # bf16 input; the cast + spatial zero-pad fuse with the producer
    # (concat of x2/up, or the previous bf16 conv output).
    x_pad = jnp.pad(x_nhwc.astype(COMPUTE_DTYPE),
                    ((0, 0), (1, 1), (1, 1), (0, 0)))
    w3 = w_hwio.reshape(3, 3 * Cin, Cout).astype(COMPUTE_DTYPE)
    scale2 = scale.reshape(1, Cout).astype(jnp.float32)
    shift2 = shift.reshape(1, Cout).astype(jnp.float32)

    in_b = jnp.dtype(COMPUTE_DTYPE).itemsize
    cost = pl.CostEstimate(
        flops=2 * N * H * W * 9 * Cin * Cout,
        transcendentals=N * H * W * Cout,
        bytes_accessed=in_b * (N * (H + 2) * (W + 2) * Cin + 9 * Cin * Cout)
                       + out_bytes * N * H * W * Cout)

    if lane_dense:
        out_shape = jax.ShapeDtypeStruct((N, Cout, H * W), out_dtype)
        out_spec = pl.BlockSpec((1, Cout, th * W), lambda n, r: (n, 0, r))
    else:
        out_shape = jax.ShapeDtypeStruct((N, H, W, Cout), out_dtype)
        out_spec = pl.BlockSpec((1, th, W, Cout), lambda n, r: (n, r, 0, 0))

    y = pl.pallas_call(
        partial(_conv3x3_bn_elu_kernel, th=th, nchw_out=lane_dense),
        out_shape=out_shape,
        grid=(N, H // th),
        in_specs=[
            pl.BlockSpec((1, H + 2, W + 2, Cin), lambda n, r: (n, 0, 0, 0)),
            pl.BlockSpec((3, 3 * Cin, Cout), lambda n, r: (0, 0, 0)),
            pl.BlockSpec((1, Cout), lambda n, r: (0, 0)),
            pl.BlockSpec((1, Cout), lambda n, r: (0, 0)),
        ],
        out_specs=out_spec,
        compiler_params=pltpu.CompilerParams(
            dimension_semantics=("parallel", "parallel"),
            vmem_limit_bytes=budget),
        cost_estimate=cost,
    )(x_pad, w3, scale2, shift2)

    if lane_dense:
        return y.reshape(N, Cout, H, W)            # already NCHW
    if nchw_out:
        return jnp.transpose(y, (0, 3, 1, 2))      # fallback layout conversion
    return y                                       # NHWC


def fold_bn(bn):
    scale = bn["gamma"] / jnp.sqrt(bn["var"] + BN_EPS)
    shift = bn["beta"] - bn["mean"] * scale
    return scale, shift


def upsampling_layer_forward(params, x1_nchw, x2_nchw):
    """UpSamplingLayer.forward(x1, x2) — NCHW in, NCHW out."""
    x1 = jnp.transpose(x1_nchw, (0, 2, 3, 1))                  # -> NHWC
    x2 = jnp.transpose(x2_nchw, (0, 2, 3, 1)).astype(COMPUTE_DTYPE)

    up = conv_transpose2x2_pallas(x1, params["up_w"], params["up_b"])
    x = jnp.concatenate([x2, up], axis=-1)         # torch.cat dim=1 (channels)

    s1, t1 = fold_bn(params["bn1"])
    h = conv3x3_bn_elu_pallas(x, params["conv1_w"], s1, t1,
                              out_dtype=COMPUTE_DTYPE)
    s2, t2 = fold_bn(params["bn2"])
    # Final stage stores lane-dense and returns NCHW directly (no extra
    # wrapper transpose / HBM pass).
    return conv3x3_bn_elu_pallas(h, params["conv2_w"], s2, t2,
                                 out_dtype=jnp.float32, nchw_out=True)


# --------------------------- params & reference -----------------------------

def init_params(key, in_channels, out_channels):
    c_half = in_channels // 2
    ks = jax.random.split(key, 12)
    nrm = lambda k, s, sc=0.1: sc * jax.random.normal(k, s, jnp.float32)
    bn = lambda k0, k1, k2, k3, c: {
        "gamma": 1.0 + nrm(k0, (c,)),
        "beta": nrm(k1, (c,)),
        "mean": nrm(k2, (c,)),
        "var": 1.0 + 0.1 * jnp.abs(jax.random.normal(k3, (c,), jnp.float32)),
    }
    return {
        "up_w": nrm(ks[0], (in_channels, c_half, 2, 2), 0.2),   # (Cin,Cout,kH,kW)
        "up_b": nrm(ks[1], (c_half,), 0.1),
        "conv1_w": nrm(ks[2], (3, 3, in_channels, out_channels), 0.2),   # HWIO
        "bn1": bn(ks[3], ks[4], ks[5], ks[6], out_channels),
        "conv2_w": nrm(ks[7], (3, 3, out_channels, out_channels), 0.2),  # HWIO
        "bn2": bn(ks[8], ks[9], ks[10], ks[11], out_channels),
    }


def reference_forward(params, x1_nchw, x2_nchw, compute_dtype=None):
    """Pure-JAX reference with the same bf16 cast points as the kernels."""
    cd = COMPUTE_DTYPE if compute_dtype is None else compute_dtype
    x1 = jnp.transpose(x1_nchw, (0, 2, 3, 1)).astype(cd)
    x2 = jnp.transpose(x2_nchw, (0, 2, 3, 1)).astype(cd)

    w = params["up_w"].astype(cd)                              # (Cin, Cout, 2, 2)
    up = jnp.einsum("nijc,coab->niajbo", x1, w,
                    preferred_element_type=jnp.float32)
    N, H, _, W, _, Co = up.shape
    up = (up.reshape(N, 2 * H, 2 * W, Co) + params["up_b"]).astype(cd)
    x = jnp.concatenate([x2, up], axis=-1)

    def conv_bn_elu(x, w_hwio, bn, out_dtype):
        y = lax.conv_general_dilated(
            x, w_hwio.astype(cd), (1, 1), ((1, 1), (1, 1)),
            dimension_numbers=("NHWC", "HWIO", "NHWC"),
            preferred_element_type=jnp.float32)
        s = bn["gamma"] / jnp.sqrt(bn["var"] + BN_EPS)
        y = y * s + (bn["beta"] - bn["mean"] * s)
        y = jnp.where(y > 0, y, jnp.exp(jnp.minimum(y, 0.0)) - 1.0)
        return y.astype(out_dtype)

    h = conv_bn_elu(x, params["conv1_w"], params["bn1"], cd)
    h = conv_bn_elu(h, params["conv2_w"], params["bn2"], jnp.float32)
    return jnp.transpose(h, (0, 3, 1, 2))


# ---------------------------------- main ------------------------------------

if __name__ == "__main__":
    key = jax.random.PRNGKey(0)
    in_channels, out_channels = 8, 8
    N, H, W = 2, 8, 8

    kp, k1, k2 = jax.random.split(key, 3)
    params = init_params(kp, in_channels, out_channels)
    x1 = jax.random.normal(k1, (N, in_channels, H, W), jnp.float32)
    x2 = jax.random.normal(k2, (N, in_channels // 2, 2 * H, 2 * W), jnp.float32)

    fwd = jax.jit(partial(upsampling_layer_forward, params))
    out = jax.block_until_ready(fwd(x1, x2))

    assert out.shape == (N, out_channels, 2 * H, 2 * W), out.shape
    ref = reference_forward(params, x1, x2)
    max_err = float(jnp.max(jnp.abs(out - ref)))
    # Kernel and reference share all bf16 cast points, so the residual is
    # accumulation-order noise plus rare one-ulp bf16 rounding flips on the
    # intermediate activation — comfortably below 2e-2 absolute.
    assert max_err < 2e-2, f"mismatch vs reference: {max_err}"

    print("KERNEL_OK")
</pallas_src>

<mosaic_0001>
module attributes {stable_mosaic.version = 11 : i64} {
  func.func @_deconv_matmul_kernel(%arg0: i32, %arg1: memref<128x8xbf16, #tpu.memory_space<vmem>>, %arg2: memref<8x16xbf16, #tpu.memory_space<vmem>>, %arg3: memref<1x16xf32, #tpu.memory_space<vmem>>, %arg4: memref<128x16xbf16, #tpu.memory_space<vmem>>) attributes {dimension_semantics = [#tpu.dimension_semantics<parallel>], iteration_bounds = array<i64: 1>, scalar_prefetch = 0 : i64, scratch_operands = 0 : i64, tpu.core_type = #tpu.core_type<tc>, window_params = [{transform_indices = @transform_0, window_bounds = array<i64: 128, 8>}, {pipeline_mode = #tpu.pipeline_mode<synchronous>, transform_indices = @transform_1, window_bounds = array<i64: 8, 16>}, {pipeline_mode = #tpu.pipeline_mode<synchronous>, transform_indices = @transform_2, window_bounds = array<i64: 1, 16>}, {transform_indices = @transform_3, window_bounds = array<i64: 128, 16>}]} {
    %c0 = arith.constant 0 : index
    %c0_0 = arith.constant 0 : index
    %0 = vector.load %arg1[%c0, %c0_0] : memref<128x8xbf16, #tpu.memory_space<vmem>>, vector<128x8xbf16>
    %c0_1 = arith.constant 0 : index
    %c0_2 = arith.constant 0 : index
    %1 = vector.load %arg2[%c0_1, %c0_2] : memref<8x16xbf16, #tpu.memory_space<vmem>>, vector<8x16xbf16>
    %cst = arith.constant dense<0.000000e+00> : vector<128x16xf32>
    %2 = tpu.matmul %0, %1, %cst {dimension_numbers = #tpu.dot_dimension_numbers<[1], [0], [0], [1], [0, 0, 1, 1], [], []>} : vector<128x8xbf16>, vector<8x16xbf16>, vector<128x16xf32> -> vector<128x16xf32>
    %c0_3 = arith.constant 0 : index
    %c0_4 = arith.constant 0 : index
    %3 = vector.load %arg3[%c0_3, %c0_4] : memref<1x16xf32, #tpu.memory_space<vmem>>, vector<1x16xf32>
    %4 = vector.broadcast %3 : vector<1x16xf32> to vector<128x16xf32>
    %5 = arith.addf %2, %4 : vector<128x16xf32>
    %6 = arith.truncf %5 : vector<128x16xf32> to vector<128x16xbf16>
    %c0_5 = arith.constant 0 : index
    %c0_6 = arith.constant 0 : index
    %7 = vector.load %arg4[%c0_5, %c0_6] : memref<128x16xbf16, #tpu.memory_space<vmem>>, vector<128x16xbf16>
    tpu.vector_store %arg4[%c0_5, %c0_6], %6 {strides = array<i32>} : memref<128x16xbf16, #tpu.memory_space<vmem>>, vector<128x16xbf16>,
    return
  }
  func.func @transform_0(%arg0: i32) -> (i32, i32) {
    %c0_i32 = arith.constant 0 : i32
    %c0_i32_0 = arith.constant 0 : i32
    return %arg0, %c0_i32 : i32, i32
  }
  func.func @transform_1(%arg0: i32) -> (i32, i32) {
    %c0_i32 = arith.constant 0 : i32
    %c0_i32_0 = arith.constant 0 : i32
    %c0_i32_1 = arith.constant 0 : i32
    return %c0_i32, %c0_i32_0 : i32, i32
  }
  func.func @transform_2(%arg0: i32) -> (i32, i32) {
    %c0_i32 = arith.constant 0 : i32
    %c0_i32_0 = arith.constant 0 : i32
    %c0_i32_1 = arith.constant 0 : i32
    return %c0_i32, %c0_i32_0 : i32, i32
  }
  func.func @transform_3(%arg0: i32) -> (i32, i32) {
    %c0_i32 = arith.constant 0 : i32
    %c0_i32_0 = arith.constant 0 : i32
    return %arg0, %c0_i32 : i32, i32
  }
}

module attributes {stable_mosaic.version = 11 : i64} {
  func.func @_conv3x3_bn_elu_kernel(%arg0: i32, %arg1: i32, %arg2: memref<1x18x18x8xbf16, #tpu.memory_space<vmem>>, %arg3: memref<3x24x8xbf16, #tpu.memory_space<vmem>>, %arg4: memref<1x8xf32, #tpu.memory_space<vmem>>, %arg5: memref<1x8xf32, #tpu.memory_space<vmem>>, %arg6: memref<1x16x16x8xbf16, #tpu.memory_space<vmem>>) attributes {dimension_semantics = [#tpu.dimension_semantics<parallel>, #tpu.dimension_semantics<parallel>], iteration_bounds = array<i64: 2, 1>, scalar_prefetch = 0 : i64, scratch_operands = 0 : i64, tpu.core_type = #tpu.core_type<tc>, window_params = [{transform_indices = @transform_0, window_bounds = array<i64: 1, 18, 18, 8>}, {pipeline_mode = #tpu.pipeline_mode<synchronous>, transform_indices = @transform_1, window_bounds = array<i64: 3, 24, 8>}, {pipeline_mode = #tpu.pipeline_mode<synchronous>, transform_indices = @transform_2, window_bounds = array<i64: 1, 8>}, {pipeline_mode = #tpu.pipeline_mode<synchronous>, transform_indices = @transform_3, window_bounds = array<i64: 1, 8>}, {transform_indices = @transform_4, window_bounds = array<i64: 1, 16, 16, 8>}]} {
    %c16_i32 = arith.constant 16 : i32
    %0 = arith.muli %arg1, %c16_i32 : i32
    %1 = tpu.assume_multiple %0, 16 : i32
    %c0 = arith.constant 0 : index
    %2 = arith.index_cast %1 : i32 to index
    %c0_0 = arith.constant 0 : index
    %c0_1 = arith.constant 0 : index
    %3 = vector.load %arg2[%c0, %2, %c0_0, %c0_1] : memref<1x18x18x8xbf16, #tpu.memory_space<vmem>>, vector<1x18x18x8xbf16>
    %4 = vector.shape_cast %3 : vector<1x18x18x8xbf16> to vector<18x18x8xbf16>
    %5 = vector.extract_strided_slice %4 {offsets = [0, 0, 0], sizes = [18, 16, 8], strides = [1, 1, 1]} : vector<18x18x8xbf16> to vector<18x16x8xbf16>
    %6 = vector.extract_strided_slice %4 {offsets = [0, 1, 0], sizes = [18, 16, 8], strides = [1, 1, 1]} : vector<18x18x8xbf16> to vector<18x16x8xbf16>
    %7 = vector.extract_strided_slice %4 {offsets = [0, 2, 0], sizes = [18, 16, 8], strides = [1, 1, 1]} : vector<18x18x8xbf16> to vector<18x16x8xbf16>
    %8 = tpu.concatenate %5, %6, %7 in 2 : vector<18x16x8xbf16>, vector<18x16x8xbf16>, vector<18x16x8xbf16> -> vector<18x16x24xbf16>
    %9 = vector.extract_strided_slice %8 {offsets = [0, 0, 0], sizes = [16, 16, 24], strides = [1, 1, 1]} : vector<18x16x24xbf16> to vector<16x16x24xbf16>
    %10 = vector.shape_cast %9 : vector<16x16x24xbf16> to vector<256x24xbf16>
    %c0_2 = arith.constant 0 : index
    %c0_3 = arith.constant 0 : index
    %c0_4 = arith.constant 0 : index
    %11 = vector.load %arg3[%c0_2, %c0_3, %c0_4] : memref<3x24x8xbf16, #tpu.memory_space<vmem>>, vector<1x24x8xbf16>
    %12 = vector.shape_cast %11 : vector<1x24x8xbf16> to vector<24x8xbf16>
    %cst = arith.constant dense<0.000000e+00> : vector<256x8xf32>
    %13 = tpu.matmul %10, %12, %cst {dimension_numbers = #tpu.dot_dimension_numbers<[1], [0], [0], [1], [0, 0, 1, 1], [], []>} : vector<256x24xbf16>, vector<24x8xbf16>, vector<256x8xf32> -> vector<256x8xf32>
    %14 = vector.extract_strided_slice %8 {offsets = [1, 0, 0], sizes = [16, 16, 24], strides = [1, 1, 1]} : vector<18x16x24xbf16> to vector<16x16x24xbf16>
    %15 = vector.shape_cast %14 : vector<16x16x24xbf16> to vector<256x24xbf16>
    %c1 = arith.constant 1 : index
    %c0_5 = arith.constant 0 : index
    %c0_6 = arith.constant 0 : index
    %16 = vector.load %arg3[%c1, %c0_5, %c0_6] : memref<3x24x8xbf16, #tpu.memory_space<vmem>>, vector<1x24x8xbf16>
    %17 = vector.shape_cast %16 : vector<1x24x8xbf16> to vector<24x8xbf16>
    %cst_7 = arith.constant dense<0.000000e+00> : vector<256x8xf32>
    %18 = tpu.matmul %15, %17, %cst_7 {dimension_numbers = #tpu.dot_dimension_numbers<[1], [0], [0], [1], [0, 0, 1, 1], [], []>} : vector<256x24xbf16>, vector<24x8xbf16>, vector<256x8xf32> -> vector<256x8xf32>
    %19 = arith.addf %13, %18 : vector<256x8xf32>
    %20 = vector.extract_strided_slice %8 {offsets = [2, 0, 0], sizes = [16, 16, 24], strides = [1, 1, 1]} : vector<18x16x24xbf16> to vector<16x16x24xbf16>
    %21 = vector.shape_cast %20 : vector<16x16x24xbf16> to vector<256x24xbf16>
    %c2 = arith.constant 2 : index
    %c0_8 = arith.constant 0 : index
    %c0_9 = arith.constant 0 : index
    %22 = vector.load %arg3[%c2, %c0_8, %c0_9] : memref<3x24x8xbf16, #tpu.memory_space<vmem>>, vector<1x24x8xbf16>
    %23 = vector.shape_cast %22 : vector<1x24x8xbf16> to vector<24x8xbf16>
    %cst_10 = arith.constant dense<0.000000e+00> : vector<256x8xf32>
    %24 = tpu.matmul %21, %23, %cst_10 {dimension_numbers = #tpu.dot_dimension_numbers<[1], [0], [0], [1], [0, 0, 1, 1], [], []>} : vector<256x24xbf16>, vector<24x8xbf16>, vector<256x8xf32> -> vector<256x8xf32>
    %25 = arith.addf %19, %24 : vector<256x8xf32>
    %c0_11 = arith.constant 0 : index
    %c0_12 = arith.constant 0 : index
    %26 = vector.load %arg4[%c0_11, %c0_12] : memref<1x8xf32, #tpu.memory_space<vmem>>, vector<1x8xf32>
    %27 = vector.shape_cast %26 : vector<1x8xf32> to vector<8xf32>
    %28 = vector.shape_cast %27 : vector<8xf32> to vector<1x8xf32>
    %29 = vector.broadcast %28 : vector<1x8xf32> to vector<256x8xf32>
    %30 = arith.mulf %25, %29 : vector<256x8xf32>
    %c0_13 = arith.constant 0 : index
    %c0_14 = arith.constant 0 : index
    %31 = vector.load %arg5[%c0_13, %c0_14] : memref<1x8xf32, #tpu.memory_space<vmem>>, vector<1x8xf32>
    %32 = vector.shape_cast %31 : vector<1x8xf32> to vector<8xf32>
    %33 = vector.shape_cast %32 : vector<8xf32> to vector<1x8xf32>
    %34 = vector.broadcast %33 : vector<1x8xf32> to vector<256x8xf32>
    %35 = arith.addf %30, %34 : vector<256x8xf32>
    %cst_15 = arith.constant 0.000000e+00 : f32
    %36 = vector.broadcast %cst_15 : f32 to vector<256x8xf32>
    %37 = arith.cmpf ogt, %35, %36 : vector<256x8xf32>
    %cst_16 = arith.constant 0.000000e+00 : f32
    %38 = vector.broadcast %cst_16 : f32 to vector<256x8xf32>
    %39 = arith.minimumf %35, %38 : vector<256x8xf32>
    %40 = math.exp %39 : vector<256x8xf32>
    %cst_17 = arith.constant 1.000000e+00 : f32
    %41 = vector.broadcast %cst_17 : f32 to vector<256x8xf32>
    %42 = arith.subf %40, %41 : vector<256x8xf32>
    %43 = arith.select %37, %35, %42 : vector<256x8xi1>, vector<256x8xf32>
    %44 = vector.shape_cast %43 : vector<256x8xf32> to vector<16x16x8xf32>
    %45 = arith.truncf %44 : vector<16x16x8xf32> to vector<16x16x8xbf16>
    %c0_18 = arith.constant 0 : index
    %c0_19 = arith.constant 0 : index
    %c0_20 = arith.constant 0 : index
    %c0_21 = arith.constant 0 : index
    %46 = vector.load %arg6[%c0_18, %c0_19, %c0_20, %c0_21] : memref<1x16x16x8xbf16, #tpu.memory_space<vmem>>, vector<1x16x16x8xbf16>
    %47 = vector.shape_cast %46 : vector<1x16x16x8xbf16> to vector<16x16x8xbf16>
    %48 = vector.shape_cast %45 : vector<16x16x8xbf16> to vector<1x16x16x8xbf16>
    tpu.vector_store %arg6[%c0_18, %c0_19, %c0_20, %c0_21], %48 {strides = array<i32>} : memref<1x16x16x8xbf16, #tpu.memory_space<vmem>>, vector<1x16x16x8xbf16>,
    return
  }
  func.func @transform_0(%arg0: i32, %arg1: i32) -> (i32, i32, i32, i32) {
    %c0_i32 = arith.constant 0 : i32
    %c0_i32_0 = arith.constant 0 : i32
    %c0_i32_1 = arith.constant 0 : i32
    %c0_i32_2 = arith.constant 0 : i32
    return %arg0, %c0_i32, %c0_i32_0, %c0_i32_1 : i32, i32, i32, i32
  }
  func.func @transform_1(%arg0: i32, %arg1: i32) -> (i32, i32, i32) {
    %c0_i32 = arith.constant 0 : i32
    %c0_i32_0 = arith.constant 0 : i32
    %c0_i32_1 = arith.constant 0 : i32
    %c0_i32_2 = arith.constant 0 : i32
    return %c0_i32, %c0_i32_0, %c0_i32_1 : i32, i32, i32
  }
  func.func @transform_2(%arg0: i32, %arg1: i32) -> (i32, i32) {
    %c0_i32 = arith.constant 0 : i32
    %c0_i32_0 = arith.constant 0 : i32
    %c0_i32_1 = arith.constant 0 : i32
    return %c0_i32, %c0_i32_0 : i32, i32
  }
  func.func @transform_3(%arg0: i32, %arg1: i32) -> (i32, i32) {
    %c0_i32 = arith.constant 0 : i32
    %c0_i32_0 = arith.constant 0 : i32
    %c0_i32_1 = arith.constant 0 : i32
    return %c0_i32, %c0_i32_0 : i32, i32
  }
  func.func @transform_4(%arg0: i32, %arg1: i32) -> (i32, i32, i32, i32) {
    %c0_i32 = arith.constant 0 : i32
    %c0_i32_0 = arith.constant 0 : i32
    %c0_i32_1 = arith.constant 0 : i32
    return %arg0, %arg1, %c0_i32, %c0_i32_0 : i32, i32, i32, i32
  }
}

module attributes {stable_mosaic.version = 11 : i64} {
  func.func @_conv3x3_bn_elu_kernel(%arg0: i32, %arg1: i32, %arg2: memref<1x18x18x8xbf16, #tpu.memory_space<vmem>>, %arg3: memref<3x24x8xbf16, #tpu.memory_space<vmem>>, %arg4: memref<1x8xf32, #tpu.memory_space<vmem>>, %arg5: memref<1x8xf32, #tpu.memory_space<vmem>>, %arg6: memref<1x8x256xf32, #tpu.memory_space<vmem>>) attributes {dimension_semantics = [#tpu.dimension_semantics<parallel>, #tpu.dimension_semantics<parallel>], iteration_bounds = array<i64: 2, 1>, scalar_prefetch = 0 : i64, scratch_operands = 0 : i64, tpu.core_type = #tpu.core_type<tc>, window_params = [{transform_indices = @transform_0, window_bounds = array<i64: 1, 18, 18, 8>}, {pipeline_mode = #tpu.pipeline_mode<synchronous>, transform_indices = @transform_1, window_bounds = array<i64: 3, 24, 8>}, {pipeline_mode = #tpu.pipeline_mode<synchronous>, transform_indices = @transform_2, window_bounds = array<i64: 1, 8>}, {pipeline_mode = #tpu.pipeline_mode<synchronous>, transform_indices = @transform_3, window_bounds = array<i64: 1, 8>}, {transform_indices = @transform_4, window_bounds = array<i64: 1, 8, 256>}]} {
    %c16_i32 = arith.constant 16 : i32
    %0 = arith.muli %arg1, %c16_i32 : i32
    %1 = tpu.assume_multiple %0, 16 : i32
    %c0 = arith.constant 0 : index
    %2 = arith.index_cast %1 : i32 to index
    %c0_0 = arith.constant 0 : index
    %c0_1 = arith.constant 0 : index
    %3 = vector.load %arg2[%c0, %2, %c0_0, %c0_1] : memref<1x18x18x8xbf16, #tpu.memory_space<vmem>>, vector<1x18x18x8xbf16>
    %4 = vector.shape_cast %3 : vector<1x18x18x8xbf16> to vector<18x18x8xbf16>
    %5 = vector.extract_strided_slice %4 {offsets = [0, 0, 0], sizes = [18, 16, 8], strides = [1, 1, 1]} : vector<18x18x8xbf16> to vector<18x16x8xbf16>
    %6 = vector.extract_strided_slice %4 {offsets = [0, 1, 0], sizes = [18, 16, 8], strides = [1, 1, 1]} : vector<18x18x8xbf16> to vector<18x16x8xbf16>
    %7 = vector.extract_strided_slice %4 {offsets = [0, 2, 0], sizes = [18, 16, 8], strides = [1, 1, 1]} : vector<18x18x8xbf16> to vector<18x16x8xbf16>
    %8 = tpu.concatenate %5, %6, %7 in 2 : vector<18x16x8xbf16>, vector<18x16x8xbf16>, vector<18x16x8xbf16> -> vector<18x16x24xbf16>
    %9 = vector.extract_strided_slice %8 {offsets = [0, 0, 0], sizes = [16, 16, 24], strides = [1, 1, 1]} : vector<18x16x24xbf16> to vector<16x16x24xbf16>
    %10 = vector.shape_cast %9 : vector<16x16x24xbf16> to vector<256x24xbf16>
    %c0_2 = arith.constant 0 : index
    %c0_3 = arith.constant 0 : index
    %c0_4 = arith.constant 0 : index
    %11 = vector.load %arg3[%c0_2, %c0_3, %c0_4] : memref<3x24x8xbf16, #tpu.memory_space<vmem>>, vector<1x24x8xbf16>
    %12 = vector.shape_cast %11 : vector<1x24x8xbf16> to vector<24x8xbf16>
    %cst = arith.constant dense<0.000000e+00> : vector<256x8xf32>
    %13 = tpu.matmul %10, %12, %cst {dimension_numbers = #tpu.dot_dimension_numbers<[1], [0], [0], [1], [0, 0, 1, 1], [], []>} : vector<256x24xbf16>, vector<24x8xbf16>, vector<256x8xf32> -> vector<256x8xf32>
    %14 = vector.extract_strided_slice %8 {offsets = [1, 0, 0], sizes = [16, 16, 24], strides = [1, 1, 1]} : vector<18x16x24xbf16> to vector<16x16x24xbf16>
    %15 = vector.shape_cast %14 : vector<16x16x24xbf16> to vector<256x24xbf16>
    %c1 = arith.constant 1 : index
    %c0_5 = arith.constant 0 : index
    %c0_6 = arith.constant 0 : index
    %16 = vector.load %arg3[%c1, %c0_5, %c0_6] : memref<3x24x8xbf16, #tpu.memory_space<vmem>>, vector<1x24x8xbf16>
    %17 = vector.shape_cast %16 : vector<1x24x8xbf16> to vector<24x8xbf16>
    %cst_7 = arith.constant dense<0.000000e+00> : vector<256x8xf32>
    %18 = tpu.matmul %15, %17, %cst_7 {dimension_numbers = #tpu.dot_dimension_numbers<[1], [0], [0], [1], [0, 0, 1, 1], [], []>} : vector<256x24xbf16>, vector<24x8xbf16>, vector<256x8xf32> -> vector<256x8xf32>
    %19 = arith.addf %13, %18 : vector<256x8xf32>
    %20 = vector.extract_strided_slice %8 {offsets = [2, 0, 0], sizes = [16, 16, 24], strides = [1, 1, 1]} : vector<18x16x24xbf16> to vector<16x16x24xbf16>
    %21 = vector.shape_cast %20 : vector<16x16x24xbf16> to vector<256x24xbf16>
    %c2 = arith.constant 2 : index
    %c0_8 = arith.constant 0 : index
    %c0_9 = arith.constant 0 : index
    %22 = vector.load %arg3[%c2, %c0_8, %c0_9] : memref<3x24x8xbf16, #tpu.memory_space<vmem>>, vector<1x24x8xbf16>
    %23 = vector.shape_cast %22 : vector<1x24x8xbf16> to vector<24x8xbf16>
    %cst_10 = arith.constant dense<0.000000e+00> : vector<256x8xf32>
    %24 = tpu.matmul %21, %23, %cst_10 {dimension_numbers = #tpu.dot_dimension_numbers<[1], [0], [0], [1], [0, 0, 1, 1], [], []>} : vector<256x24xbf16>, vector<24x8xbf16>, vector<256x8xf32> -> vector<256x8xf32>
    %25 = arith.addf %19, %24 : vector<256x8xf32>
    %c0_11 = arith.constant 0 : index
    %c0_12 = arith.constant 0 : index
    %26 = vector.load %arg4[%c0_11, %c0_12] : memref<1x8xf32, #tpu.memory_space<vmem>>, vector<1x8xf32>
    %27 = vector.shape_cast %26 : vector<1x8xf32> to vector<8xf32>
    %28 = vector.shape_cast %27 : vector<8xf32> to vector<1x8xf32>
    %29 = vector.broadcast %28 : vector<1x8xf32> to vector<256x8xf32>
    %30 = arith.mulf %25, %29 : vector<256x8xf32>
    %c0_13 = arith.constant 0 : index
    %c0_14 = arith.constant 0 : index
    %31 = vector.load %arg5[%c0_13, %c0_14] : memref<1x8xf32, #tpu.memory_space<vmem>>, vector<1x8xf32>
    %32 = vector.shape_cast %31 : vector<1x8xf32> to vector<8xf32>
    %33 = vector.shape_cast %32 : vector<8xf32> to vector<1x8xf32>
    %34 = vector.broadcast %33 : vector<1x8xf32> to vector<256x8xf32>
    %35 = arith.addf %30, %34 : vector<256x8xf32>
    %cst_15 = arith.constant 0.000000e+00 : f32
    %36 = vector.broadcast %cst_15 : f32 to vector<256x8xf32>
    %37 = arith.cmpf ogt, %35, %36 : vector<256x8xf32>
    %cst_16 = arith.constant 0.000000e+00 : f32
    %38 = vector.broadcast %cst_16 : f32 to vector<256x8xf32>
    %39 = arith.minimumf %35, %38 : vector<256x8xf32>
    %40 = math.exp %39 : vector<256x8xf32>
    %cst_17 = arith.constant 1.000000e+00 : f32
    %41 = vector.broadcast %cst_17 : f32 to vector<256x8xf32>
    %42 = arith.subf %40, %41 : vector<256x8xf32>
    %43 = arith.select %37, %35, %42 : vector<256x8xi1>, vector<256x8xf32>
    %44 = tpu.transpose %43, [1, 0] : vector<256x8xf32> -> vector<8x256xf32>
    %c0_18 = arith.constant 0 : index
    %c0_19 = arith.constant 0 : index
    %c0_20 = arith.constant 0 : index
    %45 = vector.load %arg6[%c0_18, %c0_19, %c0_20] : memref<1x8x256xf32, #tpu.memory_space<vmem>>, vector<1x8x256xf32>
    %46 = vector.shape_cast %45 : vector<1x8x256xf32> to vector<8x256xf32>
    %47 = vector.shape_cast %44 : vector<8x256xf32> to vector<1x8x256xf32>
    tpu.vector_store %arg6[%c0_18, %c0_19, %c0_20], %47 {strides = array<i32>} : memref<1x8x256xf32, #tpu.memory_space<vmem>>, vector<1x8x256xf32>,
    return
  }
  func.func @transform_0(%arg0: i32, %arg1: i32) -> (i32, i32, i32, i32) {
    %c0_i32 = arith.constant 0 : i32
    %c0_i32_0 = arith.constant 0 : i32
    %c0_i32_1 = arith.constant 0 : i32
    %c0_i32_2 = arith.constant 0 : i32
    return %arg0, %c0_i32, %c0_i32_0, %c0_i32_1 : i32, i32, i32, i32
  }
  func.func @transform_1(%arg0: i32, %arg1: i32) -> (i32, i32, i32) {
    %c0_i32 = arith.constant 0 : i32
    %c0_i32_0 = arith.constant 0 : i32
    %c0_i32_1 = arith.constant 0 : i32
    %c0_i32_2 = arith.constant 0 : i32
    return %c0_i32, %c0_i32_0, %c0_i32_1 : i32, i32, i32
  }
  func.func @transform_2(%arg0: i32, %arg1: i32) -> (i32, i32) {
    %c0_i32 = arith.constant 0 : i32
    %c0_i32_0 = arith.constant 0 : i32
    %c0_i32_1 = arith.constant 0 : i32
    return %c0_i32, %c0_i32_0 : i32, i32
  }
  func.func @transform_3(%arg0: i32, %arg1: i32) -> (i32, i32) {
    %c0_i32 = arith.constant 0 : i32
    %c0_i32_0 = arith.constant 0 : i32
    %c0_i32_1 = arith.constant 0 : i32
    return %c0_i32, %c0_i32_0 : i32, i32
  }
  func.func @transform_4(%arg0: i32, %arg1: i32) -> (i32, i32, i32) {
    %c0_i32 = arith.constant 0 : i32
    %c0_i32_0 = arith.constant 0 : i32
    return %arg0, %c0_i32, %arg1 : i32, i32, i32
  }
}

</mosaic_0001>

<bundles_post_ra>
// kernel: tile.6
= control target key start
LH: loop header
LB: loop body
LE: loop exit
PB: predicated region body
PF: predicated region fallthrough
CT: control target
= control target key end

     0   :  { %s22_s0 = inlined_call_operand.vmem [shape: f32[4], index: 0, kind: input, shape index: {}]   ;;  %s23_s1 = inlined_call_operand.vmem [shape: f32[4,4], index: 1, kind: output, shape index: {}]  }
   0x1   :  { %v4_v0 = vld [vmem:[%s22_s0] ss:$0 sm:$0xff] }
   0x2   :  { %5 = vst [vmem:[%s23_s1] sm:$0xf] %v4_v0 }

// kernel: tile.7
= control target key start
LH: loop header
LB: loop body
LE: loop exit
PB: predicated region body
PF: predicated region fallthrough
CT: control target
= control target key end

     0   :  { %vm7_vm0 = vcmask 31744   ;;  %s37_s8 = smov 4   ;;  %s38_s9 = smov 8   ;;  %vm13_vm1 = vcmask 130144   ;;  %vm19_vm2 = vcmask 97344   ;;  %vm25_vm3 = vcmask 64544   ;;  %s55_s0 = inlined_call_operand.vmem [shape: f32[4,4], index: 0, kind: input, shape index: {}]   ;;  %s56_s1 = inlined_call_operand.vmem [shape: f32[1,16], index: 1, kind: output, shape index: {}]  }
   0x1   :  { %v4_v0 = vld [vmem:[%s55_s0] sm:$0xf]  ;;  %s36_s0 = smov 12  }
   0x2   :  { %5 = vst [vmem:[#allocation1] sm:$0xf] %v4_v0 }
   0x9   :  { %v10_v1 = vld [vmem:[#allocation1 + $0x3] sm:$0x1]   ;;  %v22_v2 = vld [vmem:[#allocation1 + $0x1] sm:$0x1]   ;;  %v6_v3 = vld [vmem:[#allocation1] sm:$0x1]  }
   0xa   :  { %11 = vrot.lane.b32.xlu0 %v10_v1, %s36_s0  ;;  %23 = vrot.lane.b32.xlu1 %v22_v2, %s37_s8  ;;  %v16_v4 = vld [vmem:[#allocation1 + $0x2] sm:$0x1]   ;;  %8 = vst.msk [vmem:[#allocation0] sm:$0x1] %vm7_vm0, %v6_v3  }
   0xe   :  { %17 = vrot.lane.b32.xlu0 %v16_v4, %s38_s9 }
  0x7c   :  { %v12_v5 = vpop.permute.xlu0 %11   ;;  %v24_v6 = vpop.permute.xlu1 %23  }
  0x7d   :  { %14 = vst.msk [vmem:[#allocation0] sm:$0x1] %vm13_vm1, %v12_v5  }
  0x80   :  { %v18_v7 = vpop.permute.xlu0 %17  }
  0x81   :  { %20 = vst.msk [vmem:[#allocation0] sm:$0x1] %vm19_vm2, %v18_v7  }
  0x82   :  { %26 = vst.msk [vmem:[#allocation0] sm:$0x1] %vm25_vm3, %v24_v6  }
  0x89   :  { %v30_v8 = vld [vmem:[#allocation0] sm:$0x1] }
  0x8a   :  { %32 = vst [vmem:[%s56_s1] sm:$0x1] %v30_v8 }

// kernel: upsampling_layer_forward.3
= control target key start
LH: loop header
LB: loop body
LE: loop exit
PB: predicated region body
PF: predicated region fallthrough
CT: control target
= control target key end

     0   :  { %vm104_vm0 = vcmask 1043456   ;;  %vm79_vm1 = vcmask 64512   ;;  %vm269_vm2 = vcmask 125952   ;;  %s500_s1 = inlined_call_operand.vmem [shape: bf16[8,16], index: 1, kind: input, shape index: {}]   ;;  %s501_s0 = inlined_call_operand.vmem [shape: bf16[128,8], index: 0, kind: input, shape index: {}]   ;;  %s502_s2 = inlined_call_operand.vmem [shape: f32[1,16], index: 2, kind: input, shape index: {}]   ;;  %s503_s3 = inlined_call_operand.vmem [shape: bf16[128,16], index: 3, kind: output, shape index: {}]  }
   0x1   :  { %v31_v0 = vld [vmem:[%s500_s1] sm:$0xf]  ;;  %v372_v4 = vld [vmem:[%s501_s0 + $0x8] sm:$0xff]   ;;  %v374_v6 = vld [vmem:[%s501_s0 + $0x10] sm:$0xff]  }
   0x2   :  { %368 = vmatprep.subr.msk.bf16.mxu0 %vm104_vm0, %v31_v0  ;;  %369 = vmatprep.subr.msk.bf16.mxu1 %vm104_vm0, %v31_v0  ;;  %v106_v1 = vsel %vm104_vm0, %v31_v0, 0  ;;  %v370_v2 = vld [vmem:[%s501_s0] sm:$0xff]   ;;  %v373_v5 = vld [vmem:[%s501_s0 + $0x28] sm:$0xff]   ;;  %v375_v7 = vld [vmem:[%s501_s0 + $0x30] sm:$0xff]  }
   0x3   :  { %349 = vmatpush3.bf16.msra.mxu0 %v106_v1  ;;  %367 = vmatpush3.bf16.msra.mxu1 %v106_v1  ;;  %v371_v3 = vld [vmem:[%s501_s0 + $0x20] sm:$0xff]   ;;  %v376_v8 = vld [vmem:[%s501_s0 + $0x18] sm:$0xff]  }
   0x4   :  { %350 = vmatprep.mubr.msk.bf16.mxu0 %vm79_vm1, %v370_v2  ;;  %358 = vmatprep.mubr.msk.bf16.mxu1 %vm79_vm1, %v371_v3  ;;  %v377_v9 = vld [vmem:[%s501_s0 + $0x38] sm:$0xff]   ;;  %v290_v10 = vld [vmem:[%s502_s2] ss:$0 sm:$0xff] }
   0x6   :  { %351 = vmatmul.mubr.msk.bf16.vlgmr.msra.gmra.mrb[0].mxu0 %vm79_vm1, %v372_v4  ;;  %359 = vmatmul.mubr.msk.bf16.vlgmr.msra.gmra.mrb[0].mxu1 %vm79_vm1, %v373_v5 }
   0x7   :  { %354 = vmatprep.mubr.msk.bf16.mxu0 %vm79_vm1, %v374_v6  ;;  %362 = vmatprep.mubr.msk.bf16.mxu1 %vm79_vm1, %v375_v7 }
   0xe   :  { %355 = vmatmul.mubr.msk.bf16.gmra.mrb[4].mxu0 %vm79_vm1, %v376_v8  ;;  %363 = vmatmul.mubr.msk.bf16.gmra.mrb[4].mxu1 %vm79_vm1, %v377_v9 }
  0xd9   :  { %v352_v11 = vpop.f32.mrb[0].mxu0  ;;  %v360_v13 = vpop.f32.mrb[0].mxu1 }
  0xda   :  { %v151_v12 = vadd.f32 %v352_v11, %v290_v10  ;;  %v142_v14 = vpop.f32.mrb[1].mxu0  ;;  %v183_v15 = vadd.f32 %v360_v13, %v290_v10  ;;  %v174_v17 = vpop.f32.mrb[1].mxu1 }
  0xdb   :  { %v143_v16 = vadd.f32 %v290_v10, %v142_v14  ;;  %v353_v18 = vpop.f32.mrb[2].mxu0  ;;  %v175_v20 = vadd.f32 %v290_v10, %v174_v17  ;;  %v361_v22 = vpop.f32.mrb[2].mxu1 }
  0xdc   :  { %v325_v19 = vpack.c.bf16 %v151_v12, %v151_v12  ;;  %v154_v21 = vadd.f32 %v353_v18, %v290_v10  ;;  %v145_v23 = vpop.f32.mrb[3].mxu0  ;;  %v333_v24 = vpack.c.bf16 %v183_v15, %v183_v15  ;;  %v186_v26 = vadd.f32 %v361_v22, %v290_v10  ;;  %v177_v28 = vpop.f32.mrb[3].mxu1 }
  0xdd   :  { %v323_v25 = vpack.c.bf16 %v143_v16, %v143_v16  ;;  %v146_v27 = vadd.f32 %v290_v10, %v145_v23  ;;  %v331_v29 = vpack.c.bf16 %v175_v20, %v175_v20  ;;  %v178_v31 = vadd.f32 %v290_v10, %v177_v28 }
  0xde   :  { %272 = vst.msk [vmem:[%s503_s3 + $0x8] sm:$0xf] %vm269_vm2, %v325_v19  ;;  %v326_v30 = vpack.c.bf16 %v154_v21, %v154_v21  ;;  %280 = vst.msk [vmem:[%s503_s3 + $0x28] sm:$0xf] %vm269_vm2, %v333_v24  ;;  %v334_v32 = vpack.c.bf16 %v186_v26, %v186_v26 }
  0xdf   :  { %270 = vst.msk [vmem:[%s503_s3] sm:$0xf] %vm269_vm2, %v323_v25  ;;  %v324_v33 = vpack.c.bf16 %v146_v27, %v146_v27  ;;  %278 = vst.msk [vmem:[%s503_s3 + $0x20] sm:$0xf] %vm269_vm2, %v331_v29  ;;  %v332_v34 = vpack.c.bf16 %v178_v31, %v178_v31 }
  0xe0   :  { %273 = vst.msk [vmem:[%s503_s3 + $0xc] sm:$0xf] %vm269_vm2, %v326_v30  ;;  %281 = vst.msk [vmem:[%s503_s3 + $0x2c] sm:$0xf] %vm269_vm2, %v334_v32 }
  0xe1   :  { %271 = vst.msk [vmem:[%s503_s3 + $0x4] sm:$0xf] %vm269_vm2, %v324_v33  ;;  %v356_v35 = vpop.f32.mrb[4].mxu0  ;;  %279 = vst.msk [vmem:[%s503_s3 + $0x24] sm:$0xf] %vm269_vm2, %v332_v34  ;;  %v364_v37 = vpop.f32.mrb[4].mxu1 }
  0xe2   :  { %v167_v36 = vadd.f32 %v356_v35, %v290_v10  ;;  %v158_v38 = vpop.f32.mrb[5].mxu0  ;;  %v199_v39 = vadd.f32 %v364_v37, %v290_v10  ;;  %v190_v41 = vpop.f32.mrb[5].mxu1 }
  0xe3   :  { %v159_v40 = vadd.f32 %v290_v10, %v158_v38  ;;  %v357_v42 = vpop.f32.mrb[6].mxu0  ;;  %v191_v44 = vadd.f32 %v290_v10, %v190_v41  ;;  %v365_v46 = vpop.f32.mrb[6].mxu1 }
  0xe4   :  { %v329_v43 = vpack.c.bf16 %v167_v36, %v167_v36  ;;  %v170_v45 = vadd.f32 %v357_v42, %v290_v10  ;;  %v161_v47 = vpop.f32.mrb[7].mxu0  ;;  %v337_v48 = vpack.c.bf16 %v199_v39, %v199_v39  ;;  %v202_v50 = vadd.f32 %v365_v46, %v290_v10  ;;  %v193_v52 = vpop.f32.mrb[7].mxu1 }
  0xe5   :  { %v327_v49 = vpack.c.bf16 %v159_v40, %v159_v40  ;;  %v162_v51 = vadd.f32 %v290_v10, %v161_v47  ;;  %v335_v53 = vpack.c.bf16 %v191_v44, %v191_v44  ;;  %v194_v55 = vadd.f32 %v290_v10, %v193_v52 }
  0xe6   :  { %276 = vst.msk [vmem:[%s503_s3 + $0x18] sm:$0xf] %vm269_vm2, %v329_v43  ;;  %v330_v54 = vpack.c.bf16 %v170_v45, %v170_v45  ;;  %284 = vst.msk [vmem:[%s503_s3 + $0x38] sm:$0xf] %vm269_vm2, %v337_v48  ;;  %v338_v56 = vpack.c.bf16 %v202_v50, %v202_v50 }
  0xe7   :  { %274 = vst.msk [vmem:[%s503_s3 + $0x10] sm:$0xf] %vm269_vm2, %v327_v49  ;;  %v328_v57 = vpack.c.bf16 %v162_v51, %v162_v51  ;;  %282 = vst.msk [vmem:[%s503_s3 + $0x30] sm:$0xf] %vm269_vm2, %v335_v53  ;;  %v336_v58 = vpack.c.bf16 %v194_v55, %v194_v55 }
  0xe8   :  { %277 = vst.msk [vmem:[%s503_s3 + $0x1c] sm:$0xf] %vm269_vm2, %v330_v54  ;;  %285 = vst.msk [vmem:[%s503_s3 + $0x3c] sm:$0xf] %vm269_vm2, %v338_v56 }
  0xe9   :  { %275 = vst.msk [vmem:[%s503_s3 + $0x14] sm:$0xf] %vm269_vm2, %v328_v57  ;;  %283 = vst.msk [vmem:[%s503_s3 + $0x34] sm:$0xf] %vm269_vm2, %v336_v58 }

// kernel: upsampling_layer_forward.4
= control target key start
LH: loop header
LB: loop body
LE: loop exit
PB: predicated region body
PF: predicated region fallthrough
CT: control target
= control target key end

     0   :  { %s2587_s15 = smov 0   ;;  %s2589_s16 = smov 0   ;;  %s3336_s0 = inlined_call_operand.vmem [shape: bf16[2,18,18,8], index: 0, kind: input, shape index: {}]   ;;  %s3337_s1 = inlined_call_operand.vmem [shape: bf16[3,24,8], index: 1, kind: input, shape index: {}]   ;;  %s3338_s2 = inlined_call_operand.vmem [shape: f32[1,8], index: 2, kind: input, shape index: {}]   ;;  %s3339_s3 = inlined_call_operand.vmem [shape: f32[1,8], index: 3, kind: input, shape index: {}]   ;;  %s3340_s4 = inlined_call_operand.vmem [shape: bf16[2,16,16,8], index: 4, kind: output, shape index: {}]  }
   0x1   :  { %s2591_s17 = smov 0  }
   0x2 LB: > { %s26_s18 = sadd.s32 1, %s2554_s16  ;;  %p1968_p0 = scmp.ge.s32.totalorder %s2558_s17, 1  ;;  %s2558_s17 = sphi %s2591_s17, %s14_s17   ;;  %s2554_s16 = sphi %s2589_s16, %s3342_s16   ;;  %s2550_s15 = sphi %s2587_s15, %s3341_s15  }
   0x3   : > { %p28_p1 = scmp.ge.s32.totalorder %s26_s18, 2  ;;  %p176_p2 = scmp.lt.s32.totalorder %s2558_s17, 3 }
   0x5   : > { %s3344_s18 = smov (%p28_p1, %s26_s18), 0  ;;  %p177_p3 = pnand %p1968_p0, %p176_p2 }
   0x6   : > { %p207_p4 = scmp.lt.s32.totalorder (!%p177_p3), %s2550_s15, 1  ;;  %v2610_v0 = vld [vmem:[%s3337_s1] sm:$0xff] (!%p177_p3)   ;;  %v2466_v1 = vld [vmem:[%s3337_s1 + $0xc] sm:$0xff] (!%p177_p3)   ;;  %vm679_vm0 = vcmask (!%p177_p3), 1046528   ;;  %vm426_vm1 = vsmask.f32 (!%p177_p3), 7424 }
   0x7   : > { %180 = sbr.rel (%p177_p3) target bundleno = 494 (0x1ee), region = 36  ;;  %2259 = vmatprep.subr.bf16.mxu0 (!%p177_p3), %v2610_v0  ;;  %2223 = vmatprep.subr.bf16.mxu1 (!%p177_p3), %v2466_v1  ;;  %s2560_s27 = smov (!%p177_p3), 16   ;;  %vm893_vm2 = vcmask (!%p177_p3), 1043456   ;;  %vm770_vm3 = vcmask (!%p177_p3), 64512   ;;  %vm807_vm4 = vcmask (!%p177_p3), 130048   ;;  %vm860_vm5 = vcmask (!%p177_p3), 195584  }
   0x8   : > { %2260 = vmatpush3.bf16.msra.mxu0 (!%p177_p3), %v2610_v0  ;;  %2224 = vmatpush3.bf16.msra.mxu1 (!%p177_p3), %v2466_v1  ;;  %s2561_s28 = smov (!%p177_p3), 8   ;;  %vm1842_vm6 = vcmask (!%p177_p3), 60416  }
   0xe   : > { %s3346_s15 = smov (!%p207_p4, %s2550_s15), 1 }
   0xf   : > { %s2403_s21 = smul.u32 216, %s3346_s15  ;;  %s2136_s19 = sshll.u32 %s3346_s15, 7 }
  0x11   : > { %s2620_s26 = scalar_lea.vmem %s3336_s0, %s2403_s21  ;;  %s3062_s21 = scalar_lea.vmem %s3340_s4, %s2136_s19 }
  0x12   : > { %v2624_v2 = vld [vmem:[%s2620_s26] sm:$0xff]   ;;  %v2431_v3 = vld [vmem:[%s2620_s26 + $0x8] ss:$0 sps:$4 sm:$0x11]   ;;  %v2628_v4 = vld [vmem:[%s2620_s26 + $0x18] sm:$0xff]  }
  0x13   : > { %v680_v5 = vrot.slane %v2624_v2, 1  ;;  %v681_v6 = vrot.slane %v2431_v3, 1  ;;  %v428_v7 = vshrl.u32 %v2624_v2, 16  ;;  %v430_v8 = vshll.u32 %v2624_v2, 16  ;;  %v2638_v15 = vld [vmem:[%s2620_s26 + $0xc] sm:$0xff]   ;;  %v2651_v33 = vld [vmem:[%s2620_s26 + $0x24] sm:$0xff]  }
  0x14   : > { %v435_v9 = vshll.u32 %v2431_v3, 16  ;;  %v2433_v10 = vld [vmem:[%s2620_s26 + $0x20] ss:$0 sps:$4 sm:$0x11]   ;;  %v452_v11 = vshrl.u32 %v2628_v4, 16  ;;  %v454_v12 = vshll.u32 %v2628_v4, 16 }
  0x15   : > { %v682_v13 = vsel %vm679_vm0, %v680_v5, %v681_v6  ;;  %v432_v14 = vrot.slane %v430_v8, 1  ;;  %v459_v18 = vshll.u32 %v2433_v10, 16  ;;  %v2435_v19 = vld [vmem:[%s2620_s26 + $0x14] ss:$0 sps:$4 sm:$0x11]   ;;  %v440_v21 = vshrl.u32 %v2638_v15, 16 }
  0x16   : > { %734 = vrot.lane.b32.xlu1 %v682_v13, %s2560_s27  ;;  %v437_v16 = vrot.slane %v435_v9, 1  ;;  %v456_v17 = vrot.slane %v454_v12, 1  ;;  %v442_v22 = vshll.u32 %v2638_v15, 16  ;;  %v686_v23 = vrot.slane %v2628_v4, 1  ;;  %v2646_v24 = vld [vmem:[%s2620_s26 + $0x30] sm:$0xff]   ;;  %v2657_v37 = vld [vmem:[%s2620_s26 + $0x48] sm:$0xff]  }
  0x17   : > { %v433_v20 = vor.u32 %v432_v14, %v428_v7  ;;  %v461_v26 = vrot.slane %v459_v18, 1  ;;  %v447_v27 = vshll.u32 %v2435_v19, 16  ;;  %v687_v28 = vrot.slane %v2433_v10, 1  ;;  %v2437_v36 = vld [vmem:[%s2620_s26 + $0x38] ss:$0 sps:$4 sm:$0x11]  }
  0x18   : > { %v457_v25 = vor.u32 %v456_v17, %v452_v11  ;;  %v444_v30 = vrot.slane %v442_v22, 1  ;;  %v683_v31 = vrot.slane %v2638_v15, 1  ;;  %v684_v32 = vrot.slane %v2435_v19, 1  ;;  %v2439_v44 = vld [vmem:[%s2620_s26 + $0x2c] ss:$0 sps:$4 sm:$0x11]  }
  0x19   : > { %v438_v29 = vsel %vm426_vm1, %v433_v20, %v437_v16  ;;  %v449_v35 = vrot.slane %v447_v27, 1  ;;  %v476_v39 = vshrl.u32 %v2646_v24, 16  ;;  %v478_v40 = vshll.u32 %v2646_v24, 16  ;;  %v2669_v49 = vld [vmem:[%s2620_s26 + $0x3c] sm:$0xff]   ;;  %v2690_v16 = vld [vmem:[%s2620_s26 + $0x54] sm:$0xff]  }
  0x1a   : > { %643 = vrot.lane.b32.xlu0 %v438_v29, %s2561_s28  ;;  %v462_v34 = vsel %vm426_vm1, %v457_v25, %v461_v26  ;;  %v445_v38 = vor.u32 %v444_v30, %v440_v21  ;;  %v688_v41 = vsel %vm679_vm0, %v686_v23, %v687_v28  ;;  %v685_v42 = vsel %vm679_vm0, %v683_v31, %v684_v32  ;;  %v2441_v59 = vld [vmem:[%s2620_s26 + $0x50] ss:$0 sps:$4 sm:$0x11]   ;;  %v2443_v5 = vld [vmem:[%s2620_s26 + $0x44] ss:$0 sps:$4 sm:$0x11]  }
  0x1b   : > { %647 = vrot.lane.b32.xlu1 %v462_v34, %s2561_s28  ;;  %v483_v43 = vshll.u32 %v2437_v36, 16  ;;  %v480_v46 = vrot.slane %v478_v40, 1  ;;  %v464_v47 = vshrl.u32 %v2651_v33, 16  ;;  %v466_v48 = vshll.u32 %v2651_v33, 16  ;;  %v2687_v10 = vld [vmem:[%s2620_s26 + $0x60] sm:$0xff]   ;;  %v2699_v25 = vld [vmem:[%s2620_s26 + $0x78] sm:$0xff]  }
  0x1c   : > { %v450_v45 = vsel %vm426_vm1, %v445_v38, %v449_v35  ;;  %v471_v51 = vshll.u32 %v2439_v44, 16  ;;  %v692_v52 = vrot.slane %v2646_v24, 1  ;;  %v693_v53 = vrot.slane %v2437_v36, 1  ;;  %v2445_v17 = vld [vmem:[%s2620_s26 + $0x68] ss:$0 sps:$4 sm:$0x11]  }
  0x1d   : > { %v485_v50 = vrot.slane %v483_v43, 1  ;;  %v481_v54 = vor.u32 %v480_v46, %v476_v39  ;;  %v468_v55 = vrot.slane %v466_v48, 1  ;;  %v689_v56 = vrot.slane %v2651_v33, 1  ;;  %v2447_v29 = vld [vmem:[%s2620_s26 + $0x5c] ss:$0 sps:$4 sm:$0x11]  }
  0x1e   : > { %645 = vrot.lane.b32.xlu0 %v450_v45, %s2561_s28  ;;  %v690_v57 = vrot.slane %v2439_v44, 1  ;;  %v473_v58 = vrot.slane %v471_v51, 1  ;;  %v500_v60 = vshrl.u32 %v2657_v37, 16  ;;  %v502_v61 = vshll.u32 %v2657_v37, 16  ;;  %v2709_v38 = vld [vmem:[%s2620_s26 + $0x6c] sm:$0xff]  }
  0x1f   : > { %738 = vrot.lane.b32.xlu1 %v688_v41, %s2560_s27  ;;  %v486_v62 = vsel %vm426_vm1, %v481_v54, %v485_v50  ;;  %v469_v63 = vor.u32 %v468_v55, %v464_v47  ;;  %v507_v3 = vshll.u32 %v2441_v59, 16  ;;  %v490_v6 = vshll.u32 %v2669_v49, 16  ;;  %v2449_v41 = vld [vmem:[%s2620_s26 + $0x80] ss:$0 sps:$4 sm:$0x11]  }
  0x20   : > { %v504_v1 = vrot.slane %v502_v61, 1  ;;  %v694_v8 = vsel %vm679_vm0, %v692_v52, %v693_v53  ;;  %v488_v9 = vshrl.u32 %v2669_v49, 16  ;;  %v495_v14 = vshll.u32 %v2443_v5, 16  ;;  %v2451_v48 = vld [vmem:[%s2620_s26 + $0x74] ss:$0 sps:$4 sm:$0x11]  }
  0x21   : > { %v474_v7 = vsel %vm426_vm1, %v469_v63, %v473_v58  ;;  %v509_v12 = vrot.slane %v507_v3, 1  ;;  %v492_v13 = vrot.slane %v490_v6, 1  ;;  %v691_v18 = vsel %vm679_vm0, %v689_v56, %v690_v57  ;;  %v2725_v58 = vld [vmem:[%s2620_s26 + $0x90] sm:$0xff]  }
  0x22   : > { %736 = vrot.lane.b32.xlu0 %v685_v42, %s2560_s27  ;;  %v505_v11 = vor.u32 %v504_v1, %v500_v60  ;;  %v698_v19 = vrot.slane %v2657_v37, 1  ;;  %v497_v21 = vrot.slane %v495_v14, 1  ;;  %v699_v22 = vrot.slane %v2441_v59, 1  ;;  %v2744_v14 = vld [vmem:[%s2620_s26 + $0x8c] ss:$0 sps:$4 sm:$0x11]  }
  0x23   : > { %651 = vrot.lane.b32.xlu1 %v486_v62, %s2561_s28  ;;  %v493_v20 = vor.u32 %v492_v13, %v488_v9  ;;  %v526_v23 = vshll.u32 %v2687_v10, 16  ;;  %v524_v27 = vshrl.u32 %v2687_v10, 16  ;;  %v531_v28 = vshll.u32 %v2445_v17, 16 }
  0x24   : > { %v510_v26 = vsel %vm426_vm1, %v505_v11, %v509_v12  ;;  %v514_v30 = vshll.u32 %v2690_v16, 16  ;;  %v695_v31 = vrot.slane %v2669_v49, 1  ;;  %v696_v34 = vrot.slane %v2443_v5, 1  ;;  %v2733_v5 = vld [vmem:[%s2620_s26 + $0x84] sm:$0xff]  }
  0x25   : > { %v528_v32 = vrot.slane %v526_v23, 1  ;;  %v512_v35 = vshrl.u32 %v2690_v16, 16  ;;  %v519_v36 = vshll.u32 %v2447_v29, 16  ;;  %v498_v39 = vsel %vm426_vm1, %v493_v20, %v497_v21  ;;  %v2740_v12 = vld [vmem:[%s2620_s26 + $0xa8] sm:$0xff]  }
  0x26   : > { %649 = vrot.lane.b32.xlu0 %v474_v7, %s2561_s28  ;;  %v516_v40 = vrot.slane %v514_v30, 1  ;;  %v700_v42 = vsel %vm679_vm0, %v698_v19, %v699_v22  ;;  %v533_v44 = vrot.slane %v531_v28, 1  ;;  %v550_v45 = vshll.u32 %v2699_v25, 16 }
  0x27   : > { %742 = vrot.lane.b32.xlu1 %v694_v8, %s2560_s27  ;;  %v529_v43 = vor.u32 %v528_v32, %v524_v27  ;;  %v521_v46 = vrot.slane %v519_v36, 1  ;;  %v704_v47 = vrot.slane %v2687_v10, 1  ;;  %v697_v50 = vsel %vm679_vm0, %v695_v31, %v696_v34  ;;  %v2453_v8 = vld [vmem:[%s2620_s26 + $0x98] ss:$0 sps:$4 sm:$0x11]   ;;  %v2762_v36 = vld [vmem:[%s2620_s26 + $0x9c] sm:$0xff]  }
  0x28   : > { %v517_v51 = vor.u32 %v516_v40, %v512_v35  ;;  %v555_v52 = vshll.u32 %v2449_v41, 16  ;;  %v538_v53 = vshll.u32 %v2709_v38, 16  ;;  %v705_v55 = vrot.slane %v2445_v17, 1  ;;  %v2752_v27 = vld [vmem:[%s2620_s26 + $0xb0] ss:$0 sps:$4 sm:$0x11]  }
  0x29   : > { %v534_v54 = vsel %vm426_vm1, %v529_v43, %v533_v44  ;;  %v548_v56 = vshrl.u32 %v2699_v25, 16  ;;  %v552_v57 = vrot.slane %v550_v45, 1  ;;  %v701_v59 = vrot.slane %v2690_v16, 1 }
  0x2a   : > { %740 = vrot.lane.b32.xlu0 %v691_v18, %s2560_s27  ;;  %v702_v60 = vrot.slane %v2447_v29, 1  ;;  %v536_v61 = vshrl.u32 %v2709_v38, 16  ;;  %v522_v62 = vsel %vm426_vm1, %v517_v51, %v521_v46  ;;  %v557_v63 = vrot.slane %v555_v52, 1  ;;  %v2775_v52 = vld [vmem:[%s2620_s26 + $0xa4] ss:$0 sps:$4 sm:$0x11]  }
  0x2b   : > { %655 = vrot.lane.b32.xlu1 %v510_v26, %s2561_s28  ;;  %v540_v1 = vrot.slane %v538_v53, 1  ;;  %v543_v3 = vshll.u32 %v2451_v48, 16  ;;  %v706_v6 = vsel %vm679_vm0, %v704_v47, %v705_v55  ;;  %v553_v7 = vor.u32 %v552_v57, %v548_v56  ;;  %v2770_v47 = vld [vmem:[%s2620_s26 + $0xcc] sm:$0xff]   ;;  %v2781_v56 = vld [vmem:[%s2620_s26 + $0xc0] sm:$0xff]  }
  0x2c   : > { %v574_v9 = vshll.u32 %v2725_v58, 16  ;;  %v710_v11 = vrot.slane %v2699_v25, 1  ;;  %v711_v13 = vrot.slane %v2449_v41, 1  ;;  %v703_v17 = vsel %vm679_vm0, %v701_v59, %v702_v60 }
  0x2d   : > { %v541_v18 = vor.u32 %v540_v1, %v536_v61  ;;  %v545_v19 = vrot.slane %v543_v3, 1  ;;  %v562_v20 = vshll.u32 %v2733_v5, 16  ;;  %v558_v21 = vsel %vm426_vm1, %v553_v7, %v557_v63  ;;  %v2786_v61 = vld [vmem:[%s2620_s26 + $0xb4] sm:$0xff]   ;;  %v2791_v63 = vld [vmem:[%s2620_s26 + $0xc8] ss:$0 sps:$4 sm:$0x11]  }
  0x2e   : > { %653 = vrot.lane.b32.xlu0 %v498_v39, %s2561_s28  ;;  %v572_v22 = vshrl.u32 %v2725_v58, 16  ;;  %v576_v23 = vrot.slane %v574_v9, 1  ;;  %v579_v26 = vshll.u32 %v2453_v8, 16  ;;  %v707_v28 = vrot.slane %v2709_v38, 1 }
  0x2f   : > { %746 = vrot.lane.b32.xlu1 %v700_v42, %s2560_s27  ;;  %v708_v29 = vrot.slane %v2451_v48, 1  ;;  %v567_v30 = vshll.u32 %v2744_v14, 16  ;;  %v546_v31 = vsel %vm426_vm1, %v541_v18, %v545_v19  ;;  %v560_v32 = vshrl.u32 %v2733_v5, 16  ;;  %v2465_v1 = vld [vmem:[%s2620_s26 + $0xd4] ss:$0 sps:$4 sm:$0x11]  }
  0x30   : > { %v564_v34 = vrot.slane %v562_v20, 1  ;;  %v598_v35 = vshll.u32 %v2740_v12, 16  ;;  %v712_v39 = vsel %vm679_vm0, %v710_v11, %v711_v13  ;;  %v577_v40 = vor.u32 %v576_v23, %v572_v22  ;;  %v2812_v22 = vld [vmem:[%s3337_s1 + $0x18] sm:$0xff]  }
  0x31   : > { %v581_v41 = vrot.slane %v579_v26, 1  ;;  %v603_v42 = vshll.u32 %v2752_v27, 16  ;;  %v709_v43 = vsel %vm679_vm0, %v707_v28, %v708_v29  ;;  %v569_v44 = vrot.slane %v567_v30, 1 }
  0x32   : > { %744 = vrot.lane.b32.xlu0 %v697_v50, %s2560_s27  ;;  %v716_v45 = vrot.slane %v2725_v58, 1  ;;  %v717_v46 = vrot.slane %v2453_v8, 1  ;;  %v565_v48 = vor.u32 %v564_v34, %v560_v32  ;;  %v596_v50 = vshrl.u32 %v2740_v12, 16 }
  0x33   : > { %659 = vrot.lane.b32.xlu1 %v534_v54, %s2561_s28  ;;  %v600_v51 = vrot.slane %v598_v35, 1  ;;  %v586_v53 = vshll.u32 %v2762_v36, 16  ;;  %v582_v54 = vsel %vm426_vm1, %v577_v40, %v581_v41  ;;  %v713_v55 = vrot.slane %v2733_v5, 1  ;;  %v2463_v41 = vld [vmem:[%s2620_s26 + $0xbc] ss:$0 sps:$4 sm:$0x11]  }
  0x34   : > { %v714_v57 = vrot.slane %v2744_v14, 1  ;;  %v605_v59 = vrot.slane %v603_v42, 1  ;;  %v584_v60 = vshrl.u32 %v2762_v36, 16  ;;  %v632_v3 = vshrl.u32 %v2770_v47, 16  ;;  %v2468_v14 = vld [vmem:[%s3337_s1 + $0x14] ss:$0 sps:$4 sm:$0xff]  }
  0x35   : > { %v731_v7 = vrot.slane %v2770_v47, 1  ;;  %v570_v8 = vsel %vm426_vm1, %v565_v48, %v569_v44  ;;  %v601_v9 = vor.u32 %v600_v51, %v596_v50  ;;  %v588_v11 = vrot.slane %v586_v53, 1  ;;  %2399 = vmatprep.subr.msk.bf16.mxu1 %vm893_vm2, %v2468_v14 }
  0x36   : > { %657 = vrot.lane.b32.xlu0 %v522_v62, %s2561_s28  ;;  %v718_v62 = vsel %vm679_vm0, %v716_v45, %v717_v46  ;;  %v591_v13 = vshll.u32 %v2775_v52, 16  ;;  %v622_v18 = vshll.u32 %v2781_v56, 16  ;;  %v639_v20 = vshll.u32 %v2465_v1, 16 }
  0x37   : > { %750 = vrot.lane.b32.xlu1 %v706_v6, %s2560_s27  ;;  %v634_v6 = vshll.u32 %v2770_v47, 16  ;;  %v715_v23 = vsel %vm679_vm0, %v713_v55, %v714_v57  ;;  %v722_v26 = vrot.slane %v2740_v12, 1  ;;  %v895_v28 = vsel %vm893_vm2, %v2468_v14, 0 }
  0x38   : > { %v723_v30 = vrot.slane %v2752_v27, 1  ;;  %v641_v32 = vrot.slane %v639_v20, 1  ;;  %2226 = vmatpush3.bf16.msra.mxu1 %v895_v28  ;;  %v589_v35 = vor.u32 %v588_v11, %v584_v60  ;;  %v620_v40 = vshrl.u32 %v2781_v56, 16 }
  0x39   : > { %v636_v19 = vrot.slane %v634_v6, 1  ;;  %v610_v42 = vshll.u32 %v2786_v61, 16  ;;  %v624_v44 = vrot.slane %v622_v18, 1  ;;  %v627_v27 = vshll.u32 %v2791_v63, 16  ;;  %2331 = vmatprep.subr.bf16.mxu1 %v2610_v0 }
  0x3a   : > { %748 = vrot.lane.b32.xlu0 %v703_v17, %s2560_s27  ;;  %v2806_v17 = vld [vmem:[%s3337_s1 + $0x8] ss:$0 sps:$4 sm:$0xff]   ;;  %v719_v46 = vrot.slane %v2762_v36, 1  ;;  %v720_v48 = vrot.slane %v2775_v52, 1  ;;  %v608_v51 = vshrl.u32 %v2786_v61, 16  ;;  %v724_v55 = vsel %vm679_vm0, %v722_v26, %v723_v30 }
  0x3b   : > { %663 = vrot.lane.b32.xlu1 %v558_v21, %s2561_s28  ;;  %v732_v21 = vrot.slane %v2465_v1, 1  ;;  %2400 = vmatprep.subr.msk.bf16.mxu0 %vm893_vm2, %v2806_v17  ;;  %v2822_v29 = vsel %vm893_vm2, %v2806_v17, 0  ;;  %v612_v53 = vrot.slane %v610_v42, 1  ;;  %v625_v57 = vor.u32 %v624_v44, %v620_v40 }
  0x3c   : > { %2262 = vmatpush3.bf16.msra.mxu0 %v2822_v29  ;;  %v721_v60 = vsel %vm679_vm0, %v719_v46, %v720_v48  ;;  %v729_v6 = vrot.slane %v2791_v63, 1 }
  0x3d   : > { %v733_v34 = vsel %vm679_vm0, %v731_v7, %v732_v21  ;;  %2295 = vmatprep.subr.bf16.mxu0 %v2812_v22 }
  0x3e   : > { %661 = vrot.lane.b32.xlu0 %v546_v31, %s2561_s28  ;;  %v637_v31 = vor.u32 %v636_v19, %v632_v3  ;;  %v728_v3 = vrot.slane %v2781_v56, 1 }
  0x3f   : > { %754 = vrot.lane.b32.xlu1 %v712_v39, %s2560_s27  ;;  %v593_v39 = vrot.slane %v591_v13, 1 }
  0x40   : > { %v642_v45 = vsel %vm426_vm1, %v637_v31, %v641_v32  ;;  %v730_v11 = vsel %vm679_vm0, %v728_v3, %v729_v6 }
  0x41   : > { %v594_v50 = vsel %vm426_vm1, %v589_v35, %v593_v39 }
  0x42   : > { %752 = vrot.lane.b32.xlu0 %v709_v43, %s2560_s27  ;;  %v606_v43 = vsel %vm426_vm1, %v601_v9, %v605_v59  ;;  %v629_v59 = vrot.slane %v627_v27, 1  ;;  %v726_v9 = vrot.slane %v2463_v41, 1 }
  0x43   : > { %667 = vrot.lane.b32.xlu1 %v582_v54, %s2561_s28  ;;  %v615_v54 = vshll.u32 %v2463_v41, 16 }
  0x44   : > { %v630_v1 = vsel %vm426_vm1, %v625_v57, %v629_v59 }
  0x45   : > { %v617_v52 = vrot.slane %v615_v54, 1 }
  0x46   : > { %665 = vrot.lane.b32.xlu0 %v570_v8, %s2561_s28  ;;  %v725_v8 = vrot.slane %v2786_v61, 1 }
  0x47   : > { %758 = vrot.lane.b32.xlu1 %v718_v62, %s2560_s27  ;;  %v613_v62 = vor.u32 %v612_v53, %v608_v51 }
  0x48   : > { %v727_v13 = vsel %vm679_vm0, %v725_v8, %v726_v9 }
  0x49   : > { %v618_v7 = vsel %vm426_vm1, %v613_v62, %v617_v52 }
  0x4a   : > { %756 = vrot.lane.b32.xlu0 %v715_v23, %s2560_s27 }
  0x4b   : > { %671 = vrot.lane.b32.xlu1 %v606_v43, %s2561_s28 }
  0x4e   : > { %669 = vrot.lane.b32.xlu0 %v594_v50, %s2561_s28 }
  0x4f   : > { %762 = vrot.lane.b32.xlu1 %v724_v55, %s2560_s27 }
  0x52   : > { %760 = vrot.lane.b32.xlu0 %v721_v60, %s2560_s27 }
  0x53   : > { %675 = vrot.lane.b32.xlu1 %v630_v1, %s2561_s28 }
  0x56   : > { %673 = vrot.lane.b32.xlu0 %v618_v7, %s2561_s28 }
  0x57   : > { %766 = vrot.lane.b32.xlu1 %v730_v11, %s2560_s27 }
  0x5a   : > { %764 = vrot.lane.b32.xlu0 %v727_v13, %s2560_s27 }
  0x5b   : > { %768 = vrot.lane.b32.xlu1 %v733_v34, %s2560_s27 }
  0x5e   : > { %677 = vrot.lane.b32.xlu0 %v642_v45, %s2561_s28 }
  0x88   : > { %v735_v63 = vpop.permute.xlu1 %734 }
  0x8c   : > { %v644_v14 = vpop.permute.xlu0 %643 }
  0x8d   : > { %v772_v18 = vsel %vm770_vm3, %v2624_v2, %v644_v14  ;;  %v648_v19 = vpop.permute.xlu1 %647  ;;  %v2471_v2 = vld [vmem:[%s3337_s1 + $0x20] ss:$0 sps:$4 sm:$0xff]  }
  0x8e   : > { %v809_v20 = vsel %vm807_vm4, %v772_v18, %v735_v63  ;;  %v776_v26 = vsel %vm770_vm3, %v2628_v4, %v648_v19  ;;  %v1249_v35 = vsel %vm893_vm2, %v2471_v2, 0 }
  0x8f   : > { %2263 = vmatprep.mubr.msk.bf16.mxu0 %vm860_vm5, %v809_v20 }
  0x90   : > { %v646_v21 = vpop.permute.xlu0 %645 }
  0x91   : > { %v739_v23 = vpop.permute.xlu1 %738  ;;  %v774_v28 = vsel %vm770_vm3, %v2638_v15, %v646_v21 }
  0x92   : > { %v813_v34 = vsel %vm807_vm4, %v776_v26, %v739_v23 }
  0x94   : > { %v737_v30 = vpop.permute.xlu0 %736 }
  0x95   : > { %v652_v31 = vpop.permute.xlu1 %651  ;;  %v811_v32 = vsel %vm807_vm4, %v774_v28, %v737_v30 }
  0x96   : > { %2227 = vmatprep.mubr.msk.bf16.mxu1 %vm860_vm5, %v811_v32  ;;  %2264 = vmatmul.mubr.msk.bf16.vlgmr.msra.gmra.mrb[0].mxu0 %vm860_vm5, %v811_v32  ;;  %v780_v39 = vsel %vm770_vm3, %v2646_v24, %v652_v31 }
  0x97   : > { %2228 = vmatmul.mubr.msk.bf16.vlgmr.msra.gmra.mrb[0].mxu1 %vm860_vm5, %v813_v34  ;;  %2267 = vmatprep.mubr.msk.bf16.mxu0 %vm860_vm5, %v813_v34 }
  0x98   : > { %2333 = vmatpush3.bf16.msra.mxu1 %v2610_v0  ;;  %2296 = vmatpush3.bf16.msra.mxu0 %v2812_v22  ;;  %v650_v4 = vpop.permute.xlu0 %649 }
  0x99   : > { %v743_v15 = vpop.permute.xlu1 %742  ;;  %2402 = vmatprep.subr.msk.bf16.mxu0 %vm893_vm2, %v2471_v2  ;;  %2401 = vmatprep.subr.msk.bf16.mxu1 %vm893_vm2, %v2806_v17  ;;  %v778_v40 = vsel %vm770_vm3, %v2651_v33, %v650_v4 }
  0x9a   : > { %v817_v42 = vsel %vm807_vm4, %v780_v39, %v743_v15 }
  0x9c   : > { %v741_v41 = vpop.permute.xlu0 %740  ;;  %2298 = vmatpush3.bf16.msra.mxu0 %v1249_v35  ;;  %2334 = vmatpush3.bf16.msra.mxu1 %v2822_v29 }
  0x9d   : > { %v815_v0 = vsel %vm807_vm4, %v778_v40, %v741_v41  ;;  %v656_v22 = vpop.permute.xlu1 %655 }
  0x9e   : > { %2231 = vmatprep.mubr.msk.bf16.mxu1 %vm860_vm5, %v815_v0  ;;  %2268 = vmatmul.mubr.msk.bf16.gmra.mrb[4].mxu0 %vm860_vm5, %v815_v0  ;;  %v784_v33 = vsel %vm770_vm3, %v2657_v37, %v656_v22 }
  0x9f   : > { %2232 = vmatmul.mubr.msk.bf16.gmra.mrb[4].mxu1 %vm860_vm5, %v817_v42  ;;  %2271 = vmatprep.mubr.msk.bf16.mxu0 %vm860_vm5, %v817_v42 }
  0xa0   : > { %v654_v24 = vpop.permute.xlu0 %653 }
  0xa1   : > { %v747_v17 = vpop.permute.xlu1 %746  ;;  %v782_v29 = vsel %vm770_vm3, %v2669_v49, %v654_v24 }
  0xa2   : > { %v821_v45 = vsel %vm807_vm4, %v784_v33, %v747_v17 }
  0xa4   : > { %v745_v43 = vpop.permute.xlu0 %744 }
  0xa5   : > { %v819_v44 = vsel %vm807_vm4, %v782_v29, %v745_v43  ;;  %v660_v27 = vpop.permute.xlu1 %659  ;;  %v2990_v43 = vld [vmem:[%s3338_s2] ss:$0 sm:$0xff] }
  0xa6   : > { %2235 = vmatprep.mubr.msk.bf16.mxu1 %vm860_vm5, %v819_v44  ;;  %2272 = vmatmul.mubr.msk.bf16.gmra.mrb[8].mxu0 %vm860_vm5, %v819_v44  ;;  %v788_v37 = vsel %vm770_vm3, %v2687_v10, %v660_v27 }
  0xa7   : > { %2236 = vmatmul.mubr.msk.bf16.gmra.mrb[8].mxu1 %vm860_vm5, %v821_v45  ;;  %2275 = vmatprep.mubr.msk.bf16.mxu0 %vm860_vm5, %v821_v45 }
  0xa8   : > { %v658_v46 = vpop.permute.xlu0 %657 }
  0xa9   : > { %v751_v48 = vpop.permute.xlu1 %750  ;;  %v786_v49 = vsel %vm770_vm3, %v2690_v16, %v658_v46 }
  0xaa   : > { %v825_v54 = vsel %vm807_vm4, %v788_v37, %v751_v48 }
  0xac   : > { %v749_v50 = vpop.permute.xlu0 %748 }
  0xad   : > { %v823_v51 = vsel %vm807_vm4, %v786_v49, %v749_v50  ;;  %v664_v53 = vpop.permute.xlu1 %663 }
  0xae   : > { %2239 = vmatprep.mubr.msk.bf16.mxu1 %vm860_vm5, %v823_v51  ;;  %2276 = vmatmul.mubr.msk.bf16.gmra.mrb[12].mxu0 %vm860_vm5, %v823_v51  ;;  %v792_v10 = vsel %vm770_vm3, %v2699_v25, %v664_v53 }
  0xaf   : > { %2240 = vmatmul.mubr.msk.bf16.gmra.mrb[12].mxu1 %vm860_vm5, %v825_v54  ;;  %2299 = vmatprep.mubr.msk.bf16.mxu0 %vm860_vm5, %v813_v34 }
  0xb0   : > { %v662_v55 = vpop.permute.xlu0 %661 }
  0xb1   : > { %v755_v57 = vpop.permute.xlu1 %754  ;;  %v790_v16 = vsel %vm770_vm3, %v2709_v38, %v662_v55 }
  0xb2   : > { %v829_v52 = vsel %vm807_vm4, %v792_v10, %v755_v57 }
  0xb4   : > { %v753_v59 = vpop.permute.xlu0 %752 }
  0xb5   : > { %v827_v60 = vsel %vm807_vm4, %v790_v16, %v753_v59  ;;  %v668_v62 = vpop.permute.xlu1 %667 }
  0xb6   : > { %2243 = vmatprep.mubr.msk.bf16.mxu1 %vm860_vm5, %v827_v60  ;;  %2300 = vmatmul.mubr.msk.bf16.vlgmr.msra.gmra.mrb[0].mxu0 %vm860_vm5, %v815_v0  ;;  %v796_v25 = vsel %vm770_vm3, %v2725_v58, %v668_v62 }
  0xb7   : > { %2244 = vmatmul.mubr.msk.bf16.gmra.mrb[16].mxu1 %vm860_vm5, %v829_v52  ;;  %2303 = vmatprep.mubr.msk.bf16.mxu0 %vm860_vm5, %v817_v42 }
  0xb8   : > { %v666_v1 = vpop.permute.xlu0 %665 }
  0xb9   : > { %v759_v3 = vpop.permute.xlu1 %758  ;;  %v794_v38 = vsel %vm770_vm3, %v2733_v5, %v666_v1 }
  0xba   : > { %v833_v9 = vsel %vm807_vm4, %v796_v25, %v759_v3 }
  0xbc   : > { %v757_v6 = vpop.permute.xlu0 %756 }
  0xbd   : > { %v831_v7 = vsel %vm807_vm4, %v794_v38, %v757_v6  ;;  %v672_v8 = vpop.permute.xlu1 %671 }
  0xbe   : > { %2247 = vmatprep.mubr.msk.bf16.mxu1 %vm860_vm5, %v831_v7  ;;  %2304 = vmatmul.mubr.msk.bf16.gmra.mrb[4].mxu0 %vm860_vm5, %v819_v44  ;;  %v800_v58 = vsel %vm770_vm3, %v2740_v12, %v672_v8 }
  0xbf   : > { %2248 = vmatmul.mubr.msk.bf16.gmra.mrb[20].mxu1 %vm860_vm5, %v833_v9  ;;  %2307 = vmatprep.mubr.msk.bf16.mxu0 %vm860_vm5, %v821_v45  ;;  %v2995_v45 = vld [vmem:[%s3339_s3] ss:$0 sm:$0xff] }
  0xc0   : > { %v670_v11 = vpop.permute.xlu0 %669 }
  0xc1   : > { %v763_v13 = vpop.permute.xlu1 %762  ;;  %v798_v5 = vsel %vm770_vm3, %v2762_v36, %v670_v11 }
  0xc2   : > { %v837_v19 = vsel %vm807_vm4, %v800_v58, %v763_v13 }
  0xc4   : > { %v761_v63 = vpop.permute.xlu0 %760 }
  0xc5   : > { %v835_v14 = vsel %vm807_vm4, %v798_v5, %v761_v63  ;;  %v676_v18 = vpop.permute.xlu1 %675 }
  0xc6   : > { %2251 = vmatprep.mubr.msk.bf16.mxu1 %vm860_vm5, %v835_v14  ;;  %2308 = vmatmul.mubr.msk.bf16.gmra.mrb[8].mxu0 %vm860_vm5, %v823_v51  ;;  %v804_v12 = vsel %vm770_vm3, %v2781_v56, %v676_v18 }
  0xc7   : > { %2252 = vmatmul.mubr.msk.bf16.gmra.mrb[24].mxu1 %vm860_vm5, %v837_v19  ;;  %2311 = vmatprep.mubr.msk.bf16.mxu0 %vm860_vm5, %v825_v54 }
  0xc8   : > { %v674_v20 = vpop.permute.xlu0 %673 }
  0xc9   : > { %v767_v21 = vpop.permute.xlu1 %766  ;;  %v802_v36 = vsel %vm770_vm3, %v2786_v61, %v674_v20 }
  0xca   : > { %v841_v28 = vsel %vm807_vm4, %v804_v12, %v767_v21 }
  0xcc   : > { %v765_v23 = vpop.permute.xlu0 %764 }
  0xcd   : > { %v839_v26 = vsel %vm807_vm4, %v802_v36, %v765_v23  ;;  %v769_v30 = vpop.permute.xlu1 %768 }
  0xce   : > { %2255 = vmatprep.mubr.msk.bf16.mxu1 %vm860_vm5, %v839_v26  ;;  %2312 = vmatmul.mubr.msk.bf16.gmra.mrb[12].mxu0 %vm860_vm5, %v827_v60 }
  0xcf   : > { %2256 = vmatmul.mubr.msk.bf16.gmra.mrb[28].mxu1 %vm860_vm5, %v841_v28  ;;  %2315 = vmatprep.mubr.msk.bf16.mxu0 %vm860_vm5, %v829_v52 }
  0xd0   : > { %2279 = vmatprep.mubr.msk.bf16.mxu1 %vm860_vm5, %v825_v54  ;;  %v678_v56 = vpop.permute.xlu0 %677 }
  0xd1   : > { %v806_v61 = vsel %vm770_vm3, %v2770_v47, %v678_v56 }
  0xd2   : > { %v843_v31 = vsel %vm807_vm4, %v806_v61, %v769_v30 }
  0xd6   : > { %2316 = vmatmul.mubr.msk.bf16.gmra.mrb[16].mxu0 %vm860_vm5, %v831_v7 }
  0xd7   : > { %2280 = vmatmul.mubr.msk.bf16.vlgmr.msra.gmra.mrb[16].mxu1 %vm860_vm5, %v827_v60  ;;  %2319 = vmatprep.mubr.msk.bf16.mxu0 %vm860_vm5, %v833_v9 }
  0xd8   : > { %2283 = vmatprep.mubr.msk.bf16.mxu1 %vm860_vm5, %v829_v52 }
  0xde   : > { %2320 = vmatmul.mubr.msk.bf16.gmra.mrb[20].mxu0 %vm860_vm5, %v835_v14 }
  0xdf   : > { %2284 = vmatmul.mubr.msk.bf16.gmra.mrb[20].mxu1 %vm860_vm5, %v831_v7  ;;  %2323 = vmatprep.mubr.msk.bf16.mxu0 %vm860_vm5, %v837_v19 }
  0xe0   : > { %2287 = vmatprep.mubr.msk.bf16.mxu1 %vm860_vm5, %v833_v9 }
  0xe6   : > { %2324 = vmatmul.mubr.msk.bf16.gmra.mrb[24].mxu0 %vm860_vm5, %v839_v26 }
  0xe7   : > { %2288 = vmatmul.mubr.msk.bf16.gmra.mrb[24].mxu1 %vm860_vm5, %v835_v14  ;;  %2327 = vmatprep.mubr.msk.bf16.mxu0 %vm860_vm5, %v841_v28 }
  0xe8   : > { %2291 = vmatprep.mubr.msk.bf16.mxu1 %vm860_vm5, %v837_v19 }
  0xee   : > { %2328 = vmatmul.mubr.msk.bf16.gmra.mrb[28].mxu0 %vm860_vm5, %v843_v31 }
  0xef   : > { %2292 = vmatmul.mubr.msk.bf16.gmra.mrb[28].mxu1 %vm860_vm5, %v839_v26 }
 0x16a   : > { %v2229_v32 = vpop.f32.mrb[0].mxu1 }
 0x16b   : > { %v931_v2 = vpop.f32.mrb[1].mxu1 }
 0x16c   : > { %v2230_v34 = vpop.f32.mrb[2].mxu1 }
 0x16d   : > { %v934_v4 = vpop.f32.mrb[3].mxu1 }
 0x172   : > { %v2233_v15 = vpop.f32.mrb[4].mxu1 }
 0x173   : > { %v947_v35 = vpop.f32.mrb[5].mxu1 }
 0x174   : > { %v2234_v39 = vpop.f32.mrb[6].mxu1 }
 0x175   : > { %v950_v40 = vpop.f32.mrb[7].mxu1 }
 0x17a   : > { %v2237_v41 = vpop.f32.mrb[8].mxu1 }
 0x17b   : > { %v2973_v0 = vpop.f32.mrb[9].mxu1 }
 0x17c   : > { %v2975_v22 = vpop.f32.mrb[10].mxu1 }
 0x17d   : > { %v2977_v47 = vpop.f32.mrb[11].mxu1 }
 0x182   : > { %v2979_v42 = vpop.f32.mrb[12].mxu1 }
 0x183   : > { %v2981_v24 = vpop.f32.mrb[13].mxu1 }
 0x184   : > { %v2983_v17 = vpop.f32.mrb[14].mxu1 }
 0x185   : > { %v2985_v33 = vpop.f32.mrb[15].mxu1 }
 0x189   : > { %v2301_v29 = vpop.f32.mrb[0].mxu0 }
 0x18a   : > { %v2335_v44 = vadd.f32 %v2301_v29, %v2229_v32  ;;  %v1285_v27 = vpop.f32.mrb[1].mxu0 }
 0x18b   : > { %v2336_v46 = vadd.f32 %v1285_v27, %v931_v2  ;;  %v2302_v48 = vpop.f32.mrb[2].mxu0 }
 0x18c   : > { %v1453_v37 = vmul.f32 %v2335_v44, %v2990_v43  ;;  %v2337_v49 = vadd.f32 %v2302_v48, %v2230_v34  ;;  %v1288_v50 = vpop.f32.mrb[3].mxu0 }
 0x18d   : > { %v1451_v51 = vmul.f32 %v2336_v46, %v2990_v43  ;;  %v2338_v53 = vadd.f32 %v1288_v50, %v934_v4 }
 0x18e   : > { %v3000_v54 = vadd.f32 %v2995_v45, %v1453_v37  ;;  %v1454_v55 = vmul.f32 %v2337_v49, %v2990_v43 }
 0x18f   : > { %v3004_v57 = vadd.f32 %v2995_v45, %v1451_v51  ;;  %v1452_v10 = vmul.f32 %v2338_v53, %v2990_v43 }
 0x190   : > { %v1556_v16 = vmin.f32 %v3000_v54, 0.0  ;;  %v3009_v59 = vadd.f32 %v2995_v45, %v1454_v55  ;;  %vm1524_vm7 = vcmp.gt.f32.partialorder %v3000_v54, 0.0 }
 0x191   : > { %v1554_v60 = vmin.f32 %v3004_v57, 0.0  ;;  %v3013_v62 = vadd.f32 %v2995_v45, %v1452_v10  ;;  %v2305_v52 = vpop.f32.mrb[4].mxu0  ;;  %vm1522_vm8 = vcmp.gt.f32.partialorder %v3004_v57, 0.0 }
 0x192   : > { %v1590_v1 = vmul.f32 1.442695, %v1556_v16  ;;  %v1557_v3 = vmin.f32 %v3009_v59, 0.0  ;;  %v2339_v25 = vadd.f32 %v2305_v52, %v2233_v15  ;;  %v1301_v38 = vpop.f32.mrb[5].mxu0  ;;  %vm1525_vm9 = vcmp.gt.f32.partialorder %v3009_v59, 0.0 }
 0x193   : > { %v1586_v6 = vmul.f32 1.442695, %v1554_v60  ;;  %v1555_v7 = vmin.f32 %v3013_v62, 0.0  ;;  %v2340_v8 = vadd.f32 %v1301_v38, %v947_v35  ;;  %v2306_v9 = vpop.f32.mrb[6].mxu0  ;;  %vm1523_vm10 = vcmp.gt.f32.partialorder %v3013_v62, 0.0 }
 0x194   : > { %2472 = vpow2.f32 %v1590_v1  ;;  %v1592_v11 = vmul.f32 1.442695, %v1557_v3  ;;  %v1457_v13 = vmul.f32 %v2339_v25, %v2990_v43  ;;  %v2341_v58 = vadd.f32 %v2306_v9, %v2234_v39  ;;  %v1304_v5 = vpop.f32.mrb[7].mxu0 }
 0x195   : > { %2474 = vpow2.f32 %v1586_v6  ;;  %v1588_v63 = vmul.f32 1.442695, %v1555_v7  ;;  %v1455_v14 = vmul.f32 %v2340_v8, %v2990_v43  ;;  %v2342_v18 = vadd.f32 %v1304_v5, %v950_v40 }
 0x196   : > { %2476 = vpow2.f32 %v1592_v11  ;;  %v3020_v19 = vadd.f32 %v2995_v45, %v1457_v13  ;;  %v1458_v20 = vmul.f32 %v2341_v58, %v2990_v43 }
 0x197   : > { %2478 = vpow2.f32 %v1588_v63  ;;  %v3024_v12 = vadd.f32 %v2995_v45, %v1455_v14  ;;  %v1456_v21 = vmul.f32 %v2342_v18, %v2990_v43 }
 0x198   : > { %v1560_v36 = vmin.f32 %v3020_v19, 0.0  ;;  %v3029_v23 = vadd.f32 %v2995_v45, %v1458_v20  ;;  %vm1528_vm11 = vcmp.gt.f32.partialorder %v3020_v19, 0.0 }
 0x199   : > { %v1558_v26 = vmin.f32 %v3024_v12, 0.0  ;;  %v3033_v28 = vadd.f32 %v2995_v45, %v1456_v21  ;;  %v2309_v56 = vpop.f32.mrb[8].mxu0  ;;  %vm1526_vm12 = vcmp.gt.f32.partialorder %v3024_v12, 0.0 }
 0x19a   : > { %v1598_v61 = vmul.f32 1.442695, %v1560_v36  ;;  %v1561_v30 = vmin.f32 %v3029_v23, 0.0  ;;  %v2343_v31 = vadd.f32 %v2309_v56, %v2237_v41  ;;  %v1317_v32 = vpop.f32.mrb[9].mxu0  ;;  %vm1529_vm13 = vcmp.gt.f32.partialorder %v3029_v23, 0.0 }
 0x19b   : > { %v1594_v2 = vmul.f32 1.442695, %v1558_v26  ;;  %v1559_v34 = vmin.f32 %v3033_v28, 0.0  ;;  %v2344_v4 = vadd.f32 %v1317_v32, %v2973_v0  ;;  %v2310_v15 = vpop.f32.mrb[10].mxu0  ;;  %vm1527_vm14 = vcmp.gt.f32.partialorder %v3033_v28, 0.0 }
 0x19c   : > { %2480 = vpow2.f32 %v1598_v61  ;;  %v1600_v35 = vmul.f32 1.442695, %v1561_v30  ;;  %v1461_v39 = vmul.f32 %v2343_v31, %v2990_v43  ;;  %v2345_v40 = vadd.f32 %v2310_v15, %v2975_v22  ;;  %v1320_v29 = vpop.f32.mrb[11].mxu0 }
 0x19d   : > { %2482 = vpow2.f32 %v1594_v2  ;;  %v1596_v44 = vmul.f32 1.442695, %v1559_v34  ;;  %v1459_v41 = vmul.f32 %v2344_v4, %v2990_v43  ;;  %v2346_v27 = vadd.f32 %v1320_v29, %v2977_v47 }
 0x19e   : > { %v2473_v46 = vpop.eup %2472  ;;  %2484 = vpow2.f32 %v1600_v35  ;;  %v3047_v0 = vadd.f32 %v2995_v45, %v1461_v39  ;;  %v1462_v48 = vmul.f32 %v2345_v40, %v2990_v43 }
 0x19f   : > { %v2475_v37 = vpop.eup %2474  ;;  %v2072_v49 = vadd.f32 -1.0, %v2473_v46  ;;  %2486 = vpow2.f32 %v1596_v44  ;;  %v3052_v22 = vadd.f32 %v2995_v45, %v1459_v41  ;;  %v1460_v52 = vmul.f32 %v2346_v27, %v2990_v43 }
 0x1a0   : > { %v2477_v50 = vpop.eup %2476  ;;  %v2070_v47 = vadd.f32 -1.0, %v2475_v37  ;;  %v1564_v51 = vmin.f32 %v3047_v0, 0.0  ;;  %v3057_v53 = vadd.f32 %v2995_v45, %v1462_v48  ;;  %vm1532_vm15 = vcmp.gt.f32.partialorder %v3047_v0, 0.0 }
 0x1a1   : > { %v2479_v55 = vpop.eup %2478  ;;  %v1684_v10 = vsel %vm1524_vm7, %v3000_v54, %v2072_v49  ;;  %v2073_v16 = vadd.f32 -1.0, %v2477_v50  ;;  %v1562_v60 = vmin.f32 %v3052_v22, 0.0  ;;  %v2313_v1 = vpop.f32.mrb[12].mxu0  ;;  %v3085_v63 = vadd.f32 %v2995_v45, %v1460_v52 }
 0x1a2   : > { %v2139_v3 = vpack.c.bf16 %v1684_v10, %v1684_v10  ;;  %v1682_v25 = vsel %vm1522_vm8, %v3004_v57, %v2070_v47  ;;  %v2071_v38 = vadd.f32 -1.0, %v2479_v55  ;;  %v1606_v6 = vmul.f32 1.442695, %v1564_v51  ;;  %v1333_v7 = vpop.f32.mrb[13].mxu0 }
 0x1a3   : > { %v2137_v8 = vpack.c.bf16 %v1682_v25, %v1682_v25  ;;  %v1685_v54 = vsel %vm1525_vm9, %v3009_v59, %v2073_v16  ;;  %v1602_v9 = vmul.f32 1.442695, %v1562_v60  ;;  %v2314_v11 = vpop.f32.mrb[14].mxu0  ;;  %v1565_v58 = vmin.f32 %v3057_v53, 0.0 }
 0x1a4   : > { %1845 = vst.msk [vmem:[%s3062_s21 + $0x8] sm:$0xf] %vm1842_vm6, %v2139_v3  ;;  %v2140_v13 = vpack.c.bf16 %v1685_v54, %v1685_v54  ;;  %v1683_v57 = vsel %vm1523_vm10, %v3013_v62, %v2071_v38  ;;  %2488 = vpow2.f32 %v1606_v6  ;;  %v1336_v5 = vpop.f32.mrb[15].mxu0  ;;  %v2347_v14 = vadd.f32 %v2313_v1, %v2979_v42 }
 0x1a5   : > { %1843 = vst.msk [vmem:[%s3062_s21] sm:$0xf] %vm1842_vm6, %v2137_v8  ;;  %v2138_v59 = vpack.c.bf16 %v1683_v57, %v1683_v57  ;;  %2490 = vpow2.f32 %v1602_v9  ;;  %v1608_v20 = vmul.f32 1.442695, %v1565_v58  ;;  %v2348_v62 = vadd.f32 %v1333_v7, %v2981_v24 }
 0x1a6   : > { %v2481_v18 = vpop.eup %2480  ;;  %1846 = vst.msk [vmem:[%s3062_s21 + $0xc] sm:$0xf] %vm1842_vm6, %v2140_v13  ;;  %v2349_v21 = vadd.f32 %v2314_v11, %v2983_v17  ;;  %v2350_v36 = vadd.f32 %v1336_v5, %v2985_v33  ;;  %v1563_v61 = vmin.f32 %v3085_v63, 0.0  ;;  %v1465_v42 = vmul.f32 %v2347_v14, %v2990_v43 }
 0x1a7   : > { %v2483_v26 = vpop.eup %2482  ;;  %1844 = vst.msk [vmem:[%s3062_s21 + $0x4] sm:$0xf] %vm1842_vm6, %v2138_v59  ;;  %v2076_v56 = vadd.f32 -1.0, %v2481_v18  ;;  %2492 = vpow2.f32 %v1608_v20  ;;  %v1463_v32 = vmul.f32 %v2348_v62, %v2990_v43  ;;  %vm1530_vm0 = vcmp.gt.f32.partialorder %v3052_v22, 0.0 }
 0x1a8   : > { %v2485_v30 = vpop.eup %2484  ;;  %v2074_v31 = vadd.f32 -1.0, %v2483_v26  ;;  %v1466_v24 = vmul.f32 %v2349_v21, %v2990_v43  ;;  %v1604_v34 = vmul.f32 1.442695, %v1563_v61  ;;  %v3104_v4 = vadd.f32 %v2995_v45, %v1465_v42 }
 0x1a9   : > { %v2487_v17 = vpop.eup %2486  ;;  %v1688_v33 = vsel %vm1528_vm11, %v3020_v19, %v2076_v56  ;;  %v2077_v2 = vadd.f32 -1.0, %v2485_v30  ;;  %v2317_v15 = vpop.f32.mrb[16].mxu0  ;;  %v3110_v29 = vadd.f32 %v2995_v45, %v1463_v32  ;;  %v1464_v10 = vmul.f32 %v2350_v36, %v2990_v43 }
 0x1aa   : > { %v2143_v35 = vpack.c.bf16 %v1688_v33, %v1688_v33  ;;  %v1686_v39 = vsel %vm1526_vm12, %v3024_v12, %v2074_v31  ;;  %v2075_v40 = vadd.f32 -1.0, %v2487_v17  ;;  %v2281_v44 = vpop.f32.mrb[16].mxu1  ;;  %v1349_v41 = vpop.f32.mrb[17].mxu0  ;;  %2494 = vpow2.f32 %v1604_v34 }
 0x1ab   : > { %v2141_v19 = vpack.c.bf16 %v1686_v39, %v1686_v39  ;;  %v1689_v27 = vsel %vm1529_vm13, %v3029_v23, %v2077_v2  ;;  %v1170_v46 = vpop.f32.mrb[17].mxu1  ;;  %v2318_v48 = vpop.f32.mrb[18].mxu0  ;;  %v1568_v49 = vmin.f32 %v3104_v4, 0.0  ;;  %v1566_v51 = vmin.f32 %v3110_v29, 0.0 }
 0x1ac   : > { %1849 = vst.msk [vmem:[%s3062_s21 + $0x18] sm:$0xf] %vm1842_vm6, %v2143_v35  ;;  %v2144_v12 = vpack.c.bf16 %v1689_v27, %v1689_v27  ;;  %v1687_v37 = vsel %vm1527_vm14, %v3033_v28, %v2075_v40  ;;  %v2282_v50 = vpop.f32.mrb[18].mxu1  ;;  %v1352_v47 = vpop.f32.mrb[19].mxu0  ;;  %v3125_v55 = vadd.f32 %v2995_v45, %v1466_v24  ;;  %v2351_v52 = vadd.f32 %v2317_v15, %v2281_v44 }
 0x1ad   : > { %1847 = vst.msk [vmem:[%s3062_s21 + $0x10] sm:$0xf] %vm1842_vm6, %v2141_v19  ;;  %v2142_v23 = vpack.c.bf16 %v1687_v37, %v1687_v37  ;;  %v1173_v16 = vpop.f32.mrb[19].mxu1  ;;  %v1614_v28 = vmul.f32 1.442695, %v1568_v49  ;;  %v2352_v1 = vadd.f32 %v1349_v41, %v1170_v46  ;;  %v2353_v3 = vadd.f32 %v2318_v48, %v2282_v50 }
 0x1ae   : > { %v2489_v60 = vpop.eup %2488  ;;  %1850 = vst.msk [vmem:[%s3062_s21 + $0x1c] sm:$0xf] %vm1842_vm6, %v2144_v12  ;;  %v1610_v6 = vmul.f32 1.442695, %v1566_v51  ;;  %v1569_v7 = vmin.f32 %v3125_v55, 0.0  ;;  %v3135_v54 = vadd.f32 %v2995_v45, %v1464_v10  ;;  %v1469_v9 = vmul.f32 %v2351_v52, %v2990_v43 }
 0x1af   : > { %v2491_v25 = vpop.eup %2490  ;;  %1848 = vst.msk [vmem:[%s3062_s21 + $0x14] sm:$0xf] %vm1842_vm6, %v2142_v23  ;;  %v2080_v38 = vadd.f32 -1.0, %v2489_v60  ;;  %2496 = vpow2.f32 %v1614_v28  ;;  %v1467_v57 = vmul.f32 %v2352_v1, %v2990_v43  ;;  %vm1533_vm1 = vcmp.gt.f32.partialorder %v3057_v53, 0.0 }
 0x1b0   : > { %v2078_v8 = vadd.f32 -1.0, %v2491_v25  ;;  %2498 = vpow2.f32 %v1610_v6  ;;  %v1616_v13 = vmul.f32 1.442695, %v1569_v7  ;;  %v1567_v18 = vmin.f32 %v3135_v54, 0.0 }
 0x1b1   : > { %v1692_v11 = vsel %vm1532_vm15, %v3047_v0, %v2080_v38  ;;  %v2321_v58 = vpop.f32.mrb[20].mxu0  ;;  %v2493_v5 = vpop.eup %2492  ;;  %v3146_v0 = vadd.f32 %v2995_v45, %v1469_v9  ;;  %v1470_v42 = vmul.f32 %v2353_v3, %v2990_v43  ;;  %v2354_v30 = vadd.f32 %v1352_v47, %v1173_v16 }
 0x1b2   : > { %v2147_v59 = vpack.c.bf16 %v1692_v11, %v1692_v11  ;;  %v1690_v14 = vsel %vm1530_vm0, %v3052_v22, %v2078_v8  ;;  %v2285_v20 = vpop.f32.mrb[20].mxu1  ;;  %v1365_v62 = vpop.f32.mrb[21].mxu0  ;;  %v2081_v36 = vadd.f32 -1.0, %v2493_v5  ;;  %2500 = vpow2.f32 %v1616_v13 }
 0x1b3   : > { %v2145_v21 = vpack.c.bf16 %v1690_v14, %v1690_v14  ;;  %v1186_v26 = vpop.f32.mrb[21].mxu1  ;;  %v2322_v56 = vpop.f32.mrb[22].mxu0  ;;  %v1612_v61 = vmul.f32 1.442695, %v1567_v18  ;;  %v3151_v22 = vadd.f32 %v2995_v45, %v1467_v57  ;;  %v1572_v33 = vmin.f32 %v3146_v0, 0.0 }
 0x1b4   : > { %1853 = vst.msk [vmem:[%s3062_s21 + $0x28] sm:$0xf] %vm1842_vm6, %v2147_v59  ;;  %v2286_v31 = vpop.f32.mrb[22].mxu1  ;;  %v1368_v32 = vpop.f32.mrb[23].mxu0  ;;  %v1693_v17 = vsel %vm1533_vm1, %v3057_v53, %v2081_v36  ;;  %v2355_v2 = vadd.f32 %v2321_v58, %v2285_v20  ;;  %vm1531_vm2 = vcmp.gt.f32.partialorder %v3085_v63, 0.0  ;;  %v3163_v44 = vadd.f32 %v2995_v45, %v1470_v42 }
 0x1b5   : > { %v2495_v24 = vpop.eup %2494  ;;  %1851 = vst.msk [vmem:[%s3062_s21 + $0x20] sm:$0xf] %vm1842_vm6, %v2145_v21  ;;  %v1189_v34 = vpop.f32.mrb[23].mxu1  ;;  %v2148_v15 = vpack.c.bf16 %v1693_v17, %v1693_v17  ;;  %2502 = vpow2.f32 %v1612_v61  ;;  %v1622_v39 = vmul.f32 1.442695, %v1572_v33  ;;  %v1570_v40 = vmin.f32 %v3151_v22, 0.0 }
 0x1b6   : > { %v2079_v35 = vadd.f32 -1.0, %v2495_v24  ;;  %v1468_v41 = vmul.f32 %v2354_v30, %v2990_v43  ;;  %v1473_v19 = vmul.f32 %v2355_v2, %v2990_v43  ;;  %v2356_v27 = vadd.f32 %v1365_v62, %v1186_v26 }
 0x1b7   : > { %1854 = vst.msk [vmem:[%s3062_s21 + $0x2c] sm:$0xf] %vm1842_vm6, %v2148_v15  ;;  %v2357_v46 = vadd.f32 %v2322_v56, %v2286_v31  ;;  %vm1536_vm3 = vcmp.gt.f32.partialorder %v3104_v4, 0.0  ;;  %2504 = vpow2.f32 %v1622_v39  ;;  %v1618_v12 = vmul.f32 1.442695, %v1570_v40 }
 0x1b8   : > { %v1691_v53 = vsel %vm1531_vm2, %v3085_v63, %v2079_v35  ;;  %v1573_v50 = vmin.f32 %v3163_v44, 0.0  ;;  %v3173_v47 = vadd.f32 %v2995_v45, %v1468_v41  ;;  %v3176_v23 = vadd.f32 %v2995_v45, %v1473_v19 }
 0x1b9   : > { %v2146_v48 = vpack.c.bf16 %v1691_v53, %v1691_v53  ;;  %v2325_v37 = vpop.f32.mrb[24].mxu0  ;;  %v2497_v49 = vpop.eup %2496  ;;  %v1471_v63 = vmul.f32 %v2356_v27, %v2990_v43  ;;  %vm1534_vm4 = vcmp.gt.f32.partialorder %v3110_v29, 0.0  ;;  %2506 = vpow2.f32 %v1618_v12 }
 0x1ba   : > { %v2289_v51 = vpop.f32.mrb[24].mxu1  ;;  %v1381_v10 = vpop.f32.mrb[25].mxu0  ;;  %v2084_v60 = vadd.f32 -1.0, %v2497_v49  ;;  %v2358_v28 = vadd.f32 %v1368_v32, %v1189_v34  ;;  %v1624_v25 = vmul.f32 1.442695, %v1573_v50  ;;  %v1571_v38 = vmin.f32 %v3173_v47, 0.0 }
 0x1bb   : > { %v2499_v16 = vpop.eup %2498  ;;  %1852 = vst.msk [vmem:[%s3062_s21 + $0x24] sm:$0xf] %vm1842_vm6, %v2146_v48  ;;  %v1202_v52 = vpop.f32.mrb[25].mxu1  ;;  %v1474_v6 = vmul.f32 %v2357_v46, %v2990_v43  ;;  %vm1537_vm5 = vcmp.gt.f32.partialorder %v3125_v55, 0.0  ;;  %v1576_v11 = vmin.f32 %v3176_v23, 0.0  ;;  %v3192_v13 = vadd.f32 %v2995_v45, %v1471_v63 }
 0x1bc   : > { %v3182_v1 = vpop.f32.mrb[26].mxu0  ;;  %v2082_v3 = vadd.f32 -1.0, %v2499_v16  ;;  %v2290_v7 = vpop.f32.mrb[26].mxu1  ;;  %v1696_v9 = vsel %vm1536_vm3, %v3104_v4, %v2084_v60  ;;  %2508 = vpow2.f32 %v1624_v25  ;;  %vm1535_vm7 = vcmp.gt.f32.partialorder %v3135_v54, 0.0 }
 0x1bd   : > { %v2501_v8 = vpop.eup %2500  ;;  %v1384_v57 = vpop.f32.mrb[27].mxu0  ;;  %v2151_v5 = vpack.c.bf16 %v1696_v9, %v1696_v9  ;;  %v1620_v4 = vmul.f32 1.442695, %v1571_v38  ;;  %v1630_v20 = vmul.f32 1.442695, %v1576_v11  ;;  %v1574_v36 = vmin.f32 %v3192_v13, 0.0 }
 0x1be   : > { %v1205_v58 = vpop.f32.mrb[27].mxu1  ;;  %v1694_v59 = vsel %vm1534_vm4, %v3110_v29, %v2082_v3  ;;  %v2085_v14 = vadd.f32 -1.0, %v2501_v8  ;;  %v3203_v26 = vadd.f32 %v2995_v45, %v1474_v6  ;;  %v1472_v29 = vmul.f32 %v2358_v28, %v2990_v43 }
 0x1bf   : > { %v2149_v18 = vpack.c.bf16 %v1694_v59, %v1694_v59  ;;  %v2503_v62 = vpop.eup %2502  ;;  %1857 = vst.msk [vmem:[%s3062_s21 + $0x38] sm:$0xf] %vm1842_vm6, %v2151_v5  ;;  %2510 = vpow2.f32 %v1620_v4  ;;  %v2359_v42 = vadd.f32 %v2325_v37, %v2289_v51  ;;  %vm1540_vm8 = vcmp.gt.f32.partialorder %v3146_v0, 0.0 }
 0x1c0   : > { %v1697_v21 = vsel %vm1537_vm5, %v3125_v55, %v2085_v14  ;;  %v2083_v61 = vadd.f32 -1.0, %v2503_v62  ;;  %2512 = vpow2.f32 %v1630_v20  ;;  %v1626_v31 = vmul.f32 1.442695, %v1574_v36 }
 0x1c1   : > { %1855 = vst.msk [vmem:[%s3062_s21 + $0x30] sm:$0xf] %vm1842_vm6, %v2149_v18  ;;  %v2152_v56 = vpack.c.bf16 %v1697_v21, %v1697_v21  ;;  %v2329_v30 = vpop.f32.mrb[28].mxu0  ;;  %v1577_v55 = vmin.f32 %v3203_v26, 0.0  ;;  %v2505_v17 = vpop.eup %2504  ;;  %v3216_v2 = vadd.f32 %v2995_v45, %v1472_v29  ;;  %v1477_v34 = vmul.f32 %v2359_v42, %v2990_v43 }
 0x1c2   : > { %v2293_v32 = vpop.f32.mrb[28].mxu1  ;;  %v1397_v24 = vpop.f32.mrb[29].mxu0  ;;  %v1695_v33 = vsel %vm1535_vm7, %v3135_v54, %v2083_v61  ;;  %v2360_v15 = vadd.f32 %v1381_v10, %v1202_v52  ;;  %v2088_v41 = vadd.f32 -1.0, %v2505_v17  ;;  %2514 = vpow2.f32 %v1626_v31 }
 0x1c3   : > { %1858 = vst.msk [vmem:[%s3062_s21 + $0x3c] sm:$0xf] %vm1842_vm6, %v2152_v56  ;;  %v1218_v35 = vpop.f32.mrb[29].mxu1  ;;  %v2330_v39 = vpop.f32.mrb[30].mxu0  ;;  %v2150_v40 = vpack.c.bf16 %v1695_v33, %v1695_v33  ;;  %v1632_v53 = vmul.f32 1.442695, %v1577_v55  ;;  %v3224_v48 = vadd.f32 %v2995_v45, %v1477_v34  ;;  %v2361_v63 = vadd.f32 %v3182_v1, %v2290_v7 }
 0x1c4   : > { %v2294_v19 = vpop.f32.mrb[30].mxu1  ;;  %v3219_v27 = vpop.f32.mrb[31].mxu0  ;;  %vm1538_vm9 = vcmp.gt.f32.partialorder %v3151_v22, 0.0  ;;  %v1575_v54 = vmin.f32 %v3216_v2, 0.0  ;;  %v1475_v12 = vmul.f32 %v2360_v15, %v2990_v43  ;;  %v1700_v49 = vsel %vm1540_vm8, %v3146_v0, %v2088_v41 }
 0x1c5   : > { %v2507_v46 = vpop.eup %2506  ;;  %v3227_v37 = vpop.f32.mrb[31].mxu1  ;;  %1856 = vst.msk [vmem:[%s3062_s21 + $0x34] sm:$0xf] %vm1842_vm6, %v2150_v40  ;;  %2516 = vpow2.f32 %v1632_v53  ;;  %v2155_v51 = vpack.c.bf16 %v1700_v49, %v1700_v49  ;;  %vm1541_vm10 = vcmp.gt.f32.partialorder %v3163_v44, 0.0  ;;  %v1580_v16 = vmin.f32 %v3224_v48, 0.0 }
 0x1c6   : > { %v2086_v50 = vadd.f32 -1.0, %v2507_v46  ;;  %v1628_v10 = vmul.f32 1.442695, %v1575_v54  ;;  %v2509_v60 = vpop.eup %2508  ;;  %v3239_v52 = vadd.f32 %v2995_v45, %v1475_v12  ;;  %v1478_v3 = vmul.f32 %v2361_v63, %v2990_v43 }
 0x1c7   : > { %v2362_v0 = vadd.f32 %v1384_v57, %v1205_v58  ;;  %1861 = vst.msk [vmem:[%s3062_s21 + $0x48] sm:$0xf] %vm1842_vm6, %v2155_v51  ;;  %v2089_v1 = vadd.f32 -1.0, %v2509_v60  ;;  %v1638_v38 = vmul.f32 1.442695, %v1580_v16  ;;  %vm1539_vm11 = vcmp.gt.f32.partialorder %v3173_v47, 0.0 }
 0x1c8   : > { %v1698_v28 = vsel %vm1538_vm9, %v3151_v22, %v2086_v50  ;;  %2518 = vpow2.f32 %v1628_v10  ;;  %v1578_v6 = vmin.f32 %v3239_v52, 0.0  ;;  %v3247_v7 = vadd.f32 %v2995_v45, %v1478_v3 }
 0x1c9   : > { %v2153_v25 = vpack.c.bf16 %v1698_v28, %v1698_v28  ;;  %v1476_v22 = vmul.f32 %v2362_v0, %v2990_v43  ;;  %v2511_v8 = vpop.eup %2510  ;;  %v1701_v9 = vsel %vm1541_vm10, %v3163_v44, %v2089_v1  ;;  %2520 = vpow2.f32 %v1638_v38 }
 0x1ca   : > { %v2363_v11 = vadd.f32 %v2329_v30, %v2293_v32  ;;  %v2364_v57 = vadd.f32 %v1397_v24, %v1218_v35  ;;  %v2513_v58 = vpop.eup %2512  ;;  %v2156_v5 = vpack.c.bf16 %v1701_v9, %v1701_v9  ;;  %v2087_v59 = vadd.f32 -1.0, %v2511_v8 }
 0x1cb   : > { %1859 = vst.msk [vmem:[%s3062_s21 + $0x40] sm:$0xf] %vm1842_vm6, %v2153_v25  ;;  %vm1544_vm12 = vcmp.gt.f32.partialorder %v3176_v23, 0.0  ;;  %v1634_v14 = vmul.f32 1.442695, %v1578_v6  ;;  %v2092_v18 = vadd.f32 -1.0, %v2513_v58  ;;  %v3258_v20 = vadd.f32 %v2995_v45, %v1476_v22 }
 0x1cc   : > { %v1581_v4 = vmin.f32 %v3247_v7, 0.0  ;;  %v1481_v62 = vmul.f32 %v2363_v11, %v2990_v43  ;;  %v2515_v21 = vpop.eup %2514  ;;  %1862 = vst.msk [vmem:[%s3062_s21 + $0x4c] sm:$0xf] %vm1842_vm6, %v2156_v5  ;;  %v1699_v44 = vsel %vm1539_vm11, %v3173_v47, %v2087_v59  ;;  %v1479_v36 = vmul.f32 %v2364_v57, %v2990_v43 }
 0x1cd   : > { %2522 = vpow2.f32 %v1634_v14  ;;  %v2365_v29 = vadd.f32 %v2330_v39, %v2294_v19  ;;  %v2154_v56 = vpack.c.bf16 %v1699_v44, %v1699_v44  ;;  %v1704_v61 = vsel %vm1544_vm12, %v3176_v23, %v2092_v18 }
 0x1ce   : > { %v2090_v42 = vadd.f32 -1.0, %v2515_v21  ;;  %v1640_v30 = vmul.f32 1.442695, %v1581_v4  ;;  %v2159_v55 = vpack.c.bf16 %v1704_v61, %v1704_v61  ;;  %vm1542_vm13 = vcmp.gt.f32.partialorder %v3192_v13, 0.0 }
 0x1cf   : > { %v2517_v31 = vpop.eup %2516  ;;  %v1579_v32 = vmin.f32 %v3258_v20, 0.0  ;;  %v3271_v24 = vadd.f32 %v2995_v45, %v1481_v62  ;;  %1860 = vst.msk [vmem:[%s3062_s21 + $0x44] sm:$0xf] %vm1842_vm6, %v2154_v56  ;;  %v3277_v23 = vadd.f32 %v2995_v45, %v1479_v36  ;;  %vm1545_vm14 = vcmp.gt.f32.partialorder %v3203_v26, 0.0 }
 0x1d0   : > { %v1702_v47 = vsel %vm1542_vm13, %v3192_v13, %v2090_v42  ;;  %v2093_v17 = vadd.f32 -1.0, %v2517_v31  ;;  %2524 = vpow2.f32 %v1640_v30  ;;  %1865 = vst.msk [vmem:[%s3062_s21 + $0x58] sm:$0xf] %vm1842_vm6, %v2159_v55  ;;  %v1482_v13 = vmul.f32 %v2365_v29, %v2990_v43 }
 0x1d1   : > { %v2157_v33 = vpack.c.bf16 %v1702_v47, %v1702_v47  ;;  %v1636_v34 = vmul.f32 1.442695, %v1579_v32  ;;  %v1584_v15 = vmin.f32 %v3271_v24, 0.0  ;;  %v1582_v40 = vmin.f32 %v3277_v23, 0.0 }
 0x1d2   : > { %v2519_v35 = vpop.eup %2518  ;;  %v1705_v39 = vsel %vm1545_vm14, %v3203_v26, %v2093_v17  ;;  %vm1543_vm15 = vcmp.gt.f32.partialorder %v3216_v2, 0.0  ;;  %v1521_v12 = vadd.f32 %v2995_v45, %v1482_v13  ;;  %v2366_v26 = vadd.f32 %v3219_v27, %v3227_v37 }
 0x1d3   : > { %1863 = vst.msk [vmem:[%s3062_s21 + $0x50] sm:$0xf] %vm1842_vm6, %v2157_v33  ;;  %v2160_v41 = vpack.c.bf16 %v1705_v39, %v1705_v39  ;;  %v2091_v53 = vadd.f32 -1.0, %v2519_v35  ;;  %2526 = vpow2.f32 %v1636_v34  ;;  %v1646_v19 = vmul.f32 1.442695, %v1584_v15  ;;  %v2521_v46 = vpop.eup %2520 }
 0x1d4   : > { %v1642_v54 = vmul.f32 1.442695, %v1582_v40  ;;  %v2096_v50 = vadd.f32 -1.0, %v2521_v46  ;;  %vm1548_vm0 = vcmp.gt.f32.partialorder %v3224_v48, 0.0  ;;  %v1585_v51 = vmin.f32 %v1521_v12, 0.0 }
 0x1d5   : > { %1866 = vst.msk [vmem:[%s3062_s21 + $0x5c] sm:$0xf] %vm1842_vm6, %v2160_v41  ;;  %v1703_v49 = vsel %vm1543_vm15, %v3216_v2, %v2091_v53  ;;  %2528 = vpow2.f32 %v1646_v19  ;;  %v1480_v60 = vmul.f32 %v2366_v26, %v2990_v43  ;;  %vm1546_vm1 = vcmp.gt.f32.partialorder %v3239_v52, 0.0 }
 0x1d6   : > { %v2158_v63 = vpack.c.bf16 %v1703_v49, %v1703_v49  ;;  %2530 = vpow2.f32 %v1642_v54  ;;  %v1708_v16 = vsel %vm1548_vm0, %v3224_v48, %v2096_v50  ;;  %v1648_v28 = vmul.f32 1.442695, %v1585_v51 }
 0x1d7   : > { %v2523_v10 = vpop.eup %2522  ;;  %v2163_v27 = vpack.c.bf16 %v1708_v16, %v1708_v16  ;;  %v1519_v2 = vadd.f32 %v2995_v45, %v1480_v60  ;;  %vm1549_vm2 = vcmp.gt.f32.partialorder %v3247_v7, 0.0  ;;  %vm1547_vm3 = vcmp.gt.f32.partialorder %v3258_v20, 0.0 }
 0x1d8   : > { %1864 = vst.msk [vmem:[%s3062_s21 + $0x54] sm:$0xf] %vm1842_vm6, %v2158_v63  ;;  %v2094_v37 = vadd.f32 -1.0, %v2523_v10  ;;  %2532 = vpow2.f32 %v1648_v28  ;;  %vm1552_vm4 = vcmp.gt.f32.partialorder %v3271_v24, 0.0  ;;  %vm1550_vm5 = vcmp.gt.f32.partialorder %v3277_v23, 0.0 }
 0x1d9   : > { %1869 = vst.msk [vmem:[%s3062_s21 + $0x68] sm:$0xf] %vm1842_vm6, %v2163_v27  ;;  %v1583_v43 = vmin.f32 %v1519_v2, 0.0  ;;  %vm1553_vm7 = vcmp.gt.f32.partialorder %v1521_v12, 0.0  ;;  %vm1551_vm8 = vcmp.gt.f32.partialorder %v1519_v2, 0.0 }
 0x1da   : > { %v2525_v3 = vpop.eup %2524  ;;  %v1706_v0 = vsel %vm1546_vm1, %v3239_v52, %v2094_v37 }
 0x1db   : > { %v2161_v48 = vpack.c.bf16 %v1706_v0, %v1706_v0  ;;  %v2097_v25 = vadd.f32 -1.0, %v2525_v3  ;;  %v1644_v6 = vmul.f32 1.442695, %v1583_v43 }
 0x1dd   : > { %v2527_v1 = vpop.eup %2526  ;;  %1867 = vst.msk [vmem:[%s3062_s21 + $0x60] sm:$0xf] %vm1842_vm6, %v2161_v48  ;;  %v1709_v38 = vsel %vm1549_vm2, %v3247_v7, %v2097_v25  ;;  %2534 = vpow2.f32 %v1644_v6 }
 0x1de   : > { %v2164_v45 = vpack.c.bf16 %v1709_v38, %v1709_v38  ;;  %v2095_v22 = vadd.f32 -1.0, %v2527_v1 }
 0x1df   : > { %v2529_v8 = vpop.eup %2528 }
 0x1e0   : > { %v2531_v52 = vpop.eup %2530  ;;  %1870 = vst.msk [vmem:[%s3062_s21 + $0x6c] sm:$0xf] %vm1842_vm6, %v2164_v45  ;;  %v1707_v9 = vsel %vm1547_vm3, %v3258_v20, %v2095_v22  ;;  %v2100_v11 = vadd.f32 -1.0, %v2529_v8 }
 0x1e1   : > { %v2162_v57 = vpack.c.bf16 %v1707_v9, %v1707_v9  ;;  %v2098_v7 = vadd.f32 -1.0, %v2531_v52 }
 0x1e2   : > { %v1712_v58 = vsel %vm1552_vm4, %v3271_v24, %v2100_v11  ;;  %v2533_v14 = vpop.eup %2532 }
 0x1e3   : > { %1868 = vst.msk [vmem:[%s3062_s21 + $0x64] sm:$0xf] %vm1842_vm6, %v2162_v57  ;;  %v2167_v5 = vpack.c.bf16 %v1712_v58, %v1712_v58  ;;  %v1710_v59 = vsel %vm1550_vm5, %v3277_v23, %v2098_v7  ;;  %v2101_v4 = vadd.f32 -1.0, %v2533_v14 }
 0x1e4   : > { %v2165_v18 = vpack.c.bf16 %v1710_v59, %v1710_v59 }
 0x1e5   : > { %1873 = vst.msk [vmem:[%s3062_s21 + $0x78] sm:$0xf] %vm1842_vm6, %v2167_v5  ;;  %v1713_v20 = vsel %vm1553_vm7, %v1521_v12, %v2101_v4 }
 0x1e6   : > { %1871 = vst.msk [vmem:[%s3062_s21 + $0x70] sm:$0xf] %vm1842_vm6, %v2165_v18  ;;  %v2168_v62 = vpack.c.bf16 %v1713_v20, %v1713_v20 }
 0x1e7   : > { %v2535_v21 = vpop.eup %2534 }
 0x1e8   : > { %1874 = vst.msk [vmem:[%s3062_s21 + $0x7c] sm:$0xf] %vm1842_vm6, %v2168_v62  ;;  %v2099_v44 = vadd.f32 -1.0, %v2535_v21 }
 0x1ea   : > { %v1711_v36 = vsel %vm1551_vm8, %v1519_v2, %v2099_v44 }
 0x1eb   : > { %v2166_v29 = vpack.c.bf16 %v1711_v36, %v1711_v36 }
 0x1ed   : > { %1872 = vst.msk [vmem:[%s3062_s21 + $0x74] sm:$0xf] %vm1842_vm6, %v2166_v29 }
 0x1ee PF: > { %s14_s17 = sadd.s32 1, %s2558_s17   ;;  %s3341_s15 = smov %s2554_s16 }
 0x1ef   : > { %p11_p5 = scmp.ge.s32.totalorder %s14_s17, 4   ;;  %s3342_s16 = smov %s3344_s18 }
 0x1f1   :  { %13 = sbr.rel (!%p11_p5) target bundleno = 2 (0x2), region = 69 }

// kernel: upsampling_layer_forward.5
= control target key start
LH: loop header
LB: loop body
LE: loop exit
PB: predicated region body
PF: predicated region fallthrough
CT: control target
= control target key end

     0   :  { %s2420_s15 = smov 0   ;;  %s2422_s16 = smov 0   ;;  %s3084_s0 = inlined_call_operand.vmem [shape: bf16[2,18,18,8], index: 0, kind: input, shape index: {}]   ;;  %s3085_s1 = inlined_call_operand.vmem [shape: bf16[3,24,8], index: 1, kind: input, shape index: {}]   ;;  %s3086_s2 = inlined_call_operand.vmem [shape: f32[1,8], index: 2, kind: input, shape index: {}]   ;;  %s3087_s3 = inlined_call_operand.vmem [shape: f32[1,8], index: 3, kind: input, shape index: {}]   ;;  %s3088_s4 = inlined_call_operand.vmem [shape: f32[2,8,256], index: 4, kind: output, shape index: {}]  }
   0x1   :  { %s2424_s17 = smov 0  }
   0x2 LB: > { %s26_s18 = sadd.s32 1, %s2387_s16  ;;  %p1865_p0 = scmp.ge.s32.totalorder %s2391_s17, 1  ;;  %s2391_s17 = sphi %s2424_s17, %s14_s17   ;;  %s2387_s16 = sphi %s2422_s16, %s3090_s16   ;;  %s2383_s15 = sphi %s2420_s15, %s3089_s15  }
   0x3   : > { %p28_p1 = scmp.ge.s32.totalorder %s26_s18, 2  ;;  %p176_p2 = scmp.lt.s32.totalorder %s2391_s17, 3 }
   0x5   : > { %s3092_s18 = smov (%p28_p1, %s26_s18), 0  ;;  %p177_p3 = pnand %p1865_p0, %p176_p2 }
   0x6   : > { %p206_p4 = scmp.lt.s32.totalorder (!%p177_p3), %s2383_s15, 1  ;;  %v2443_v0 = vld [vmem:[%s3085_s1] sm:$0xff] (!%p177_p3)   ;;  %v2299_v1 = vld [vmem:[%s3085_s1 + $0xc] sm:$0xff] (!%p177_p3)   ;;  %vm677_vm0 = vcmask (!%p177_p3), 1046528   ;;  %vm424_vm1 = vsmask.f32 (!%p177_p3), 7424 }
   0x7   : > { %180 = sbr.rel (%p177_p3) target bundleno = 582 (0x246), region = 36  ;;  %2092 = vmatprep.subr.bf16.mxu0 (!%p177_p3), %v2443_v0  ;;  %2056 = vmatprep.subr.bf16.mxu1 (!%p177_p3), %v2299_v1  ;;  %s2393_s27 = smov (!%p177_p3), 16   ;;  %vm891_vm2 = vcmask (!%p177_p3), 1043456   ;;  %vm768_vm3 = vcmask (!%p177_p3), 64512   ;;  %vm805_vm4 = vcmask (!%p177_p3), 130048   ;;  %vm858_vm5 = vcmask (!%p177_p3), 195584  }
   0x8   : > { %2093 = vmatpush3.bf16.msra.mxu0 (!%p177_p3), %v2443_v0  ;;  %2057 = vmatpush3.bf16.msra.mxu1 (!%p177_p3), %v2299_v1  ;;  %s2394_s28 = smov (!%p177_p3), 8  }
   0xe   : > { %s3094_s15 = smov (!%p206_p4, %s2383_s15), 1 }
   0xf   : > { %s2236_s21 = smul.u32 216, %s3094_s15  ;;  %s2001_s19 = sshll.u32 %s3094_s15, 4 }
  0x10   : > { %s219_s22 = scalar_lea.vmem %s3088_s4, %s2001_s19 }
  0x11   : > { %s2453_s26 = scalar_lea.vmem %s3084_s0, %s2236_s21 }
  0x12   : > { %v2457_v2 = vld [vmem:[%s2453_s26] sm:$0xff]   ;;  %v2264_v3 = vld [vmem:[%s2453_s26 + $0x8] ss:$0 sps:$4 sm:$0x11]   ;;  %v2461_v4 = vld [vmem:[%s2453_s26 + $0x18] sm:$0xff]  }
  0x13   : > { %v678_v5 = vrot.slane %v2457_v2, 1  ;;  %v679_v6 = vrot.slane %v2264_v3, 1  ;;  %v426_v7 = vshrl.u32 %v2457_v2, 16  ;;  %v428_v8 = vshll.u32 %v2457_v2, 16  ;;  %v2471_v15 = vld [vmem:[%s2453_s26 + $0xc] sm:$0xff]   ;;  %v2484_v33 = vld [vmem:[%s2453_s26 + $0x24] sm:$0xff]  }
  0x14   : > { %v433_v9 = vshll.u32 %v2264_v3, 16  ;;  %v2266_v10 = vld [vmem:[%s2453_s26 + $0x20] ss:$0 sps:$4 sm:$0x11]   ;;  %v450_v11 = vshrl.u32 %v2461_v4, 16  ;;  %v452_v12 = vshll.u32 %v2461_v4, 16 }
  0x15   : > { %v680_v13 = vsel %vm677_vm0, %v678_v5, %v679_v6  ;;  %v430_v14 = vrot.slane %v428_v8, 1  ;;  %v457_v18 = vshll.u32 %v2266_v10, 16  ;;  %v2268_v19 = vld [vmem:[%s2453_s26 + $0x14] ss:$0 sps:$4 sm:$0x11]   ;;  %v438_v21 = vshrl.u32 %v2471_v15, 16 }
  0x16   : > { %732 = vrot.lane.b32.xlu1 %v680_v13, %s2393_s27  ;;  %v435_v16 = vrot.slane %v433_v9, 1  ;;  %v454_v17 = vrot.slane %v452_v12, 1  ;;  %v440_v22 = vshll.u32 %v2471_v15, 16  ;;  %v684_v23 = vrot.slane %v2461_v4, 1  ;;  %v2479_v24 = vld [vmem:[%s2453_s26 + $0x30] sm:$0xff]   ;;  %v2490_v37 = vld [vmem:[%s2453_s26 + $0x48] sm:$0xff]  }
  0x17   : > { %v431_v20 = vor.u32 %v430_v14, %v426_v7  ;;  %v459_v26 = vrot.slane %v457_v18, 1  ;;  %v445_v27 = vshll.u32 %v2268_v19, 16  ;;  %v685_v28 = vrot.slane %v2266_v10, 1  ;;  %v2270_v36 = vld [vmem:[%s2453_s26 + $0x38] ss:$0 sps:$4 sm:$0x11]  }
  0x18   : > { %v455_v25 = vor.u32 %v454_v17, %v450_v11  ;;  %v442_v30 = vrot.slane %v440_v22, 1  ;;  %v681_v31 = vrot.slane %v2471_v15, 1  ;;  %v682_v32 = vrot.slane %v2268_v19, 1  ;;  %v2272_v44 = vld [vmem:[%s2453_s26 + $0x2c] ss:$0 sps:$4 sm:$0x11]  }
  0x19   : > { %v436_v29 = vsel %vm424_vm1, %v431_v20, %v435_v16  ;;  %v447_v35 = vrot.slane %v445_v27, 1  ;;  %v474_v39 = vshrl.u32 %v2479_v24, 16  ;;  %v476_v40 = vshll.u32 %v2479_v24, 16  ;;  %v2502_v49 = vld [vmem:[%s2453_s26 + $0x3c] sm:$0xff]   ;;  %v2523_v16 = vld [vmem:[%s2453_s26 + $0x54] sm:$0xff]  }
  0x1a   : > { %641 = vrot.lane.b32.xlu0 %v436_v29, %s2394_s28  ;;  %v460_v34 = vsel %vm424_vm1, %v455_v25, %v459_v26  ;;  %v443_v38 = vor.u32 %v442_v30, %v438_v21  ;;  %v686_v41 = vsel %vm677_vm0, %v684_v23, %v685_v28  ;;  %v683_v42 = vsel %vm677_vm0, %v681_v31, %v682_v32  ;;  %v2274_v59 = vld [vmem:[%s2453_s26 + $0x50] ss:$0 sps:$4 sm:$0x11]   ;;  %v2276_v5 = vld [vmem:[%s2453_s26 + $0x44] ss:$0 sps:$4 sm:$0x11]  }
  0x1b   : > { %645 = vrot.lane.b32.xlu1 %v460_v34, %s2394_s28  ;;  %v481_v43 = vshll.u32 %v2270_v36, 16  ;;  %v478_v46 = vrot.slane %v476_v40, 1  ;;  %v462_v47 = vshrl.u32 %v2484_v33, 16  ;;  %v464_v48 = vshll.u32 %v2484_v33, 16  ;;  %v2520_v10 = vld [vmem:[%s2453_s26 + $0x60] sm:$0xff]   ;;  %v2532_v25 = vld [vmem:[%s2453_s26 + $0x78] sm:$0xff]  }
  0x1c   : > { %v448_v45 = vsel %vm424_vm1, %v443_v38, %v447_v35  ;;  %v469_v51 = vshll.u32 %v2272_v44, 16  ;;  %v690_v52 = vrot.slane %v2479_v24, 1  ;;  %v691_v53 = vrot.slane %v2270_v36, 1  ;;  %v2278_v17 = vld [vmem:[%s2453_s26 + $0x68] ss:$0 sps:$4 sm:$0x11]  }
  0x1d   : > { %v483_v50 = vrot.slane %v481_v43, 1  ;;  %v479_v54 = vor.u32 %v478_v46, %v474_v39  ;;  %v466_v55 = vrot.slane %v464_v48, 1  ;;  %v687_v56 = vrot.slane %v2484_v33, 1  ;;  %v2280_v29 = vld [vmem:[%s2453_s26 + $0x5c] ss:$0 sps:$4 sm:$0x11]  }
  0x1e   : > { %643 = vrot.lane.b32.xlu0 %v448_v45, %s2394_s28  ;;  %v688_v57 = vrot.slane %v2272_v44, 1  ;;  %v471_v58 = vrot.slane %v469_v51, 1  ;;  %v498_v60 = vshrl.u32 %v2490_v37, 16  ;;  %v500_v61 = vshll.u32 %v2490_v37, 16  ;;  %v2542_v38 = vld [vmem:[%s2453_s26 + $0x6c] sm:$0xff]  }
  0x1f   : > { %736 = vrot.lane.b32.xlu1 %v686_v41, %s2393_s27  ;;  %v484_v62 = vsel %vm424_vm1, %v479_v54, %v483_v50  ;;  %v467_v63 = vor.u32 %v466_v55, %v462_v47  ;;  %v505_v3 = vshll.u32 %v2274_v59, 16  ;;  %v488_v6 = vshll.u32 %v2502_v49, 16  ;;  %v2282_v41 = vld [vmem:[%s2453_s26 + $0x80] ss:$0 sps:$4 sm:$0x11]  }
  0x20   : > { %v502_v1 = vrot.slane %v500_v61, 1  ;;  %v692_v8 = vsel %vm677_vm0, %v690_v52, %v691_v53  ;;  %v486_v9 = vshrl.u32 %v2502_v49, 16  ;;  %v493_v14 = vshll.u32 %v2276_v5, 16  ;;  %v2284_v48 = vld [vmem:[%s2453_s26 + $0x74] ss:$0 sps:$4 sm:$0x11]  }
  0x21   : > { %v472_v7 = vsel %vm424_vm1, %v467_v63, %v471_v58  ;;  %v507_v12 = vrot.slane %v505_v3, 1  ;;  %v490_v13 = vrot.slane %v488_v6, 1  ;;  %v689_v18 = vsel %vm677_vm0, %v687_v56, %v688_v57  ;;  %v2558_v58 = vld [vmem:[%s2453_s26 + $0x90] sm:$0xff]  }
  0x22   : > { %734 = vrot.lane.b32.xlu0 %v683_v42, %s2393_s27  ;;  %v503_v11 = vor.u32 %v502_v1, %v498_v60  ;;  %v696_v19 = vrot.slane %v2490_v37, 1  ;;  %v495_v21 = vrot.slane %v493_v14, 1  ;;  %v697_v22 = vrot.slane %v2274_v59, 1  ;;  %v2577_v14 = vld [vmem:[%s2453_s26 + $0x8c] ss:$0 sps:$4 sm:$0x11]  }
  0x23   : > { %649 = vrot.lane.b32.xlu1 %v484_v62, %s2394_s28  ;;  %v491_v20 = vor.u32 %v490_v13, %v486_v9  ;;  %v524_v23 = vshll.u32 %v2520_v10, 16  ;;  %v522_v27 = vshrl.u32 %v2520_v10, 16  ;;  %v529_v28 = vshll.u32 %v2278_v17, 16 }
  0x24   : > { %v508_v26 = vsel %vm424_vm1, %v503_v11, %v507_v12  ;;  %v512_v30 = vshll.u32 %v2523_v16, 16  ;;  %v693_v31 = vrot.slane %v2502_v49, 1  ;;  %v694_v34 = vrot.slane %v2276_v5, 1  ;;  %v2566_v5 = vld [vmem:[%s2453_s26 + $0x84] sm:$0xff]  }
  0x25   : > { %v526_v32 = vrot.slane %v524_v23, 1  ;;  %v510_v35 = vshrl.u32 %v2523_v16, 16  ;;  %v517_v36 = vshll.u32 %v2280_v29, 16  ;;  %v496_v39 = vsel %vm424_vm1, %v491_v20, %v495_v21  ;;  %v2573_v12 = vld [vmem:[%s2453_s26 + $0xa8] sm:$0xff]  }
  0x26   : > { %647 = vrot.lane.b32.xlu0 %v472_v7, %s2394_s28  ;;  %v514_v40 = vrot.slane %v512_v30, 1  ;;  %v698_v42 = vsel %vm677_vm0, %v696_v19, %v697_v22  ;;  %v531_v44 = vrot.slane %v529_v28, 1  ;;  %v548_v45 = vshll.u32 %v2532_v25, 16 }
  0x27   : > { %740 = vrot.lane.b32.xlu1 %v692_v8, %s2393_s27  ;;  %v527_v43 = vor.u32 %v526_v32, %v522_v27  ;;  %v519_v46 = vrot.slane %v517_v36, 1  ;;  %v702_v47 = vrot.slane %v2520_v10, 1  ;;  %v695_v50 = vsel %vm677_vm0, %v693_v31, %v694_v34  ;;  %v2286_v8 = vld [vmem:[%s2453_s26 + $0x98] ss:$0 sps:$4 sm:$0x11]   ;;  %v2595_v36 = vld [vmem:[%s2453_s26 + $0x9c] sm:$0xff]  }
  0x28   : > { %v515_v51 = vor.u32 %v514_v40, %v510_v35  ;;  %v553_v52 = vshll.u32 %v2282_v41, 16  ;;  %v536_v53 = vshll.u32 %v2542_v38, 16  ;;  %v703_v55 = vrot.slane %v2278_v17, 1  ;;  %v2585_v27 = vld [vmem:[%s2453_s26 + $0xb0] ss:$0 sps:$4 sm:$0x11]  }
  0x29   : > { %v532_v54 = vsel %vm424_vm1, %v527_v43, %v531_v44  ;;  %v546_v56 = vshrl.u32 %v2532_v25, 16  ;;  %v550_v57 = vrot.slane %v548_v45, 1  ;;  %v699_v59 = vrot.slane %v2523_v16, 1 }
  0x2a   : > { %738 = vrot.lane.b32.xlu0 %v689_v18, %s2393_s27  ;;  %v700_v60 = vrot.slane %v2280_v29, 1  ;;  %v534_v61 = vshrl.u32 %v2542_v38, 16  ;;  %v520_v62 = vsel %vm424_vm1, %v515_v51, %v519_v46  ;;  %v555_v63 = vrot.slane %v553_v52, 1  ;;  %v2608_v52 = vld [vmem:[%s2453_s26 + $0xa4] ss:$0 sps:$4 sm:$0x11]  }
  0x2b   : > { %653 = vrot.lane.b32.xlu1 %v508_v26, %s2394_s28  ;;  %v538_v1 = vrot.slane %v536_v53, 1  ;;  %v541_v3 = vshll.u32 %v2284_v48, 16  ;;  %v704_v6 = vsel %vm677_vm0, %v702_v47, %v703_v55  ;;  %v551_v7 = vor.u32 %v550_v57, %v546_v56  ;;  %v2603_v47 = vld [vmem:[%s2453_s26 + $0xcc] sm:$0xff]   ;;  %v2614_v56 = vld [vmem:[%s2453_s26 + $0xc0] sm:$0xff]  }
  0x2c   : > { %v572_v9 = vshll.u32 %v2558_v58, 16  ;;  %v708_v11 = vrot.slane %v2532_v25, 1  ;;  %v709_v13 = vrot.slane %v2282_v41, 1  ;;  %v701_v17 = vsel %vm677_vm0, %v699_v59, %v700_v60 }
  0x2d   : > { %v539_v18 = vor.u32 %v538_v1, %v534_v61  ;;  %v543_v19 = vrot.slane %v541_v3, 1  ;;  %v560_v20 = vshll.u32 %v2566_v5, 16  ;;  %v556_v21 = vsel %vm424_vm1, %v551_v7, %v555_v63  ;;  %v2619_v61 = vld [vmem:[%s2453_s26 + $0xb4] sm:$0xff]   ;;  %v2624_v63 = vld [vmem:[%s2453_s26 + $0xc8] ss:$0 sps:$4 sm:$0x11]  }
  0x2e   : > { %651 = vrot.lane.b32.xlu0 %v496_v39, %s2394_s28  ;;  %v570_v22 = vshrl.u32 %v2558_v58, 16  ;;  %v574_v23 = vrot.slane %v572_v9, 1  ;;  %v577_v26 = vshll.u32 %v2286_v8, 16  ;;  %v705_v28 = vrot.slane %v2542_v38, 1 }
  0x2f   : > { %744 = vrot.lane.b32.xlu1 %v698_v42, %s2393_s27  ;;  %v706_v29 = vrot.slane %v2284_v48, 1  ;;  %v565_v30 = vshll.u32 %v2577_v14, 16  ;;  %v544_v31 = vsel %vm424_vm1, %v539_v18, %v543_v19  ;;  %v558_v32 = vshrl.u32 %v2566_v5, 16  ;;  %v2298_v1 = vld [vmem:[%s2453_s26 + $0xd4] ss:$0 sps:$4 sm:$0x11]  }
  0x30   : > { %v562_v34 = vrot.slane %v560_v20, 1  ;;  %v596_v35 = vshll.u32 %v2573_v12, 16  ;;  %v710_v39 = vsel %vm677_vm0, %v708_v11, %v709_v13  ;;  %v575_v40 = vor.u32 %v574_v23, %v570_v22  ;;  %v2645_v22 = vld [vmem:[%s3085_s1 + $0x18] sm:$0xff]  }
  0x31   : > { %v579_v41 = vrot.slane %v577_v26, 1  ;;  %v601_v42 = vshll.u32 %v2585_v27, 16  ;;  %v707_v43 = vsel %vm677_vm0, %v705_v28, %v706_v29  ;;  %v567_v44 = vrot.slane %v565_v30, 1 }
  0x32   : > { %742 = vrot.lane.b32.xlu0 %v695_v50, %s2393_s27  ;;  %v714_v45 = vrot.slane %v2558_v58, 1  ;;  %v715_v46 = vrot.slane %v2286_v8, 1  ;;  %v563_v48 = vor.u32 %v562_v34, %v558_v32  ;;  %v594_v50 = vshrl.u32 %v2573_v12, 16 }
  0x33   : > { %657 = vrot.lane.b32.xlu1 %v532_v54, %s2394_s28  ;;  %v598_v51 = vrot.slane %v596_v35, 1  ;;  %v584_v53 = vshll.u32 %v2595_v36, 16  ;;  %v580_v54 = vsel %vm424_vm1, %v575_v40, %v579_v41  ;;  %v711_v55 = vrot.slane %v2566_v5, 1  ;;  %v2296_v41 = vld [vmem:[%s2453_s26 + $0xbc] ss:$0 sps:$4 sm:$0x11]  }
  0x34   : > { %v712_v57 = vrot.slane %v2577_v14, 1  ;;  %v603_v59 = vrot.slane %v601_v42, 1  ;;  %v582_v60 = vshrl.u32 %v2595_v36, 16  ;;  %v630_v3 = vshrl.u32 %v2603_v47, 16  ;;  %v2301_v14 = vld [vmem:[%s3085_s1 + $0x14] ss:$0 sps:$4 sm:$0xff]  }
  0x35   : > { %v729_v7 = vrot.slane %v2603_v47, 1  ;;  %v568_v8 = vsel %vm424_vm1, %v563_v48, %v567_v44  ;;  %v599_v9 = vor.u32 %v598_v51, %v594_v50  ;;  %v586_v11 = vrot.slane %v584_v53, 1  ;;  %2232 = vmatprep.subr.msk.bf16.mxu1 %vm891_vm2, %v2301_v14 }
  0x36   : > { %655 = vrot.lane.b32.xlu0 %v520_v62, %s2394_s28  ;;  %v716_v62 = vsel %vm677_vm0, %v714_v45, %v715_v46  ;;  %v589_v13 = vshll.u32 %v2608_v52, 16  ;;  %v620_v18 = vshll.u32 %v2614_v56, 16  ;;  %v637_v20 = vshll.u32 %v2298_v1, 16 }
  0x37   : > { %748 = vrot.lane.b32.xlu1 %v704_v6, %s2393_s27  ;;  %v632_v6 = vshll.u32 %v2603_v47, 16  ;;  %v713_v23 = vsel %vm677_vm0, %v711_v55, %v712_v57  ;;  %v720_v26 = vrot.slane %v2573_v12, 1  ;;  %v893_v28 = vsel %vm891_vm2, %v2301_v14, 0 }
  0x38   : > { %v721_v30 = vrot.slane %v2585_v27, 1  ;;  %v639_v32 = vrot.slane %v637_v20, 1  ;;  %2059 = vmatpush3.bf16.msra.mxu1 %v893_v28  ;;  %v587_v35 = vor.u32 %v586_v11, %v582_v60  ;;  %v618_v40 = vshrl.u32 %v2614_v56, 16 }
  0x39   : > { %v634_v19 = vrot.slane %v632_v6, 1  ;;  %v608_v42 = vshll.u32 %v2619_v61, 16  ;;  %v622_v44 = vrot.slane %v620_v18, 1  ;;  %v625_v27 = vshll.u32 %v2624_v63, 16  ;;  %2164 = vmatprep.subr.bf16.mxu1 %v2443_v0 }
  0x3a   : > { %746 = vrot.lane.b32.xlu0 %v701_v17, %s2393_s27  ;;  %v2639_v17 = vld [vmem:[%s3085_s1 + $0x8] ss:$0 sps:$4 sm:$0xff]   ;;  %v717_v46 = vrot.slane %v2595_v36, 1  ;;  %v718_v48 = vrot.slane %v2608_v52, 1  ;;  %v606_v51 = vshrl.u32 %v2619_v61, 16  ;;  %v722_v55 = vsel %vm677_vm0, %v720_v26, %v721_v30 }
  0x3b   : > { %661 = vrot.lane.b32.xlu1 %v556_v21, %s2394_s28  ;;  %v730_v21 = vrot.slane %v2298_v1, 1  ;;  %2233 = vmatprep.subr.msk.bf16.mxu0 %vm891_vm2, %v2639_v17  ;;  %v2655_v29 = vsel %vm891_vm2, %v2639_v17, 0  ;;  %v610_v53 = vrot.slane %v608_v42, 1  ;;  %v623_v57 = vor.u32 %v622_v44, %v618_v40 }
  0x3c   : > { %2095 = vmatpush3.bf16.msra.mxu0 %v2655_v29  ;;  %v719_v60 = vsel %vm677_vm0, %v717_v46, %v718_v48  ;;  %v727_v6 = vrot.slane %v2624_v63, 1 }
  0x3d   : > { %v731_v34 = vsel %vm677_vm0, %v729_v7, %v730_v21  ;;  %2128 = vmatprep.subr.bf16.mxu0 %v2645_v22 }
  0x3e   : > { %659 = vrot.lane.b32.xlu0 %v544_v31, %s2394_s28  ;;  %v635_v31 = vor.u32 %v634_v19, %v630_v3  ;;  %v726_v3 = vrot.slane %v2614_v56, 1 }
  0x3f   : > { %752 = vrot.lane.b32.xlu1 %v710_v39, %s2393_s27  ;;  %v591_v39 = vrot.slane %v589_v13, 1 }
  0x40   : > { %v640_v45 = vsel %vm424_vm1, %v635_v31, %v639_v32  ;;  %v728_v11 = vsel %vm677_vm0, %v726_v3, %v727_v6 }
  0x41   : > { %v592_v50 = vsel %vm424_vm1, %v587_v35, %v591_v39 }
  0x42   : > { %750 = vrot.lane.b32.xlu0 %v707_v43, %s2393_s27  ;;  %v604_v43 = vsel %vm424_vm1, %v599_v9, %v603_v59  ;;  %v627_v59 = vrot.slane %v625_v27, 1  ;;  %v724_v9 = vrot.slane %v2296_v41, 1 }
  0x43   : > { %665 = vrot.lane.b32.xlu1 %v580_v54, %s2394_s28  ;;  %v613_v54 = vshll.u32 %v2296_v41, 16 }
  0x44   : > { %v628_v1 = vsel %vm424_vm1, %v623_v57, %v627_v59 }
  0x45   : > { %v615_v52 = vrot.slane %v613_v54, 1 }
  0x46   : > { %663 = vrot.lane.b32.xlu0 %v568_v8, %s2394_s28  ;;  %v723_v8 = vrot.slane %v2619_v61, 1 }
  0x47   : > { %756 = vrot.lane.b32.xlu1 %v716_v62, %s2393_s27  ;;  %v611_v62 = vor.u32 %v610_v53, %v606_v51 }
  0x48   : > { %v725_v13 = vsel %vm677_vm0, %v723_v8, %v724_v9 }
  0x49   : > { %v616_v7 = vsel %vm424_vm1, %v611_v62, %v615_v52 }
  0x4a   : > { %754 = vrot.lane.b32.xlu0 %v713_v23, %s2393_s27 }
  0x4b   : > { %669 = vrot.lane.b32.xlu1 %v604_v43, %s2394_s28 }
  0x4e   : > { %667 = vrot.lane.b32.xlu0 %v592_v50, %s2394_s28 }
  0x4f   : > { %760 = vrot.lane.b32.xlu1 %v722_v55, %s2393_s27 }
  0x52   : > { %758 = vrot.lane.b32.xlu0 %v719_v60, %s2393_s27 }
  0x53   : > { %673 = vrot.lane.b32.xlu1 %v628_v1, %s2394_s28 }
  0x56   : > { %671 = vrot.lane.b32.xlu0 %v616_v7, %s2394_s28 }
  0x57   : > { %764 = vrot.lane.b32.xlu1 %v728_v11, %s2393_s27 }
  0x5a   : > { %762 = vrot.lane.b32.xlu0 %v725_v13, %s2393_s27 }
  0x5b   : > { %766 = vrot.lane.b32.xlu1 %v731_v34, %s2393_s27 }
  0x5e   : > { %675 = vrot.lane.b32.xlu0 %v640_v45, %s2394_s28 }
  0x88   : > { %v733_v63 = vpop.permute.xlu1 %732 }
  0x8c   : > { %v642_v14 = vpop.permute.xlu0 %641 }
  0x8d   : > { %v770_v18 = vsel %vm768_vm3, %v2457_v2, %v642_v14  ;;  %v646_v19 = vpop.permute.xlu1 %645  ;;  %v2304_v2 = vld [vmem:[%s3085_s1 + $0x20] ss:$0 sps:$4 sm:$0xff]  }
  0x8e   : > { %v807_v20 = vsel %vm805_vm4, %v770_v18, %v733_v63  ;;  %v774_v26 = vsel %vm768_vm3, %v2461_v4, %v646_v19  ;;  %v1247_v35 = vsel %vm891_vm2, %v2304_v2, 0 }
  0x8f   : > { %2096 = vmatprep.mubr.msk.bf16.mxu0 %vm858_vm5, %v807_v20 }
  0x90   : > { %v644_v21 = vpop.permute.xlu0 %643 }
  0x91   : > { %v737_v23 = vpop.permute.xlu1 %736  ;;  %v772_v28 = vsel %vm768_vm3, %v2471_v15, %v644_v21 }
  0x92   : > { %v811_v34 = vsel %vm805_vm4, %v774_v26, %v737_v23 }
  0x94   : > { %v735_v30 = vpop.permute.xlu0 %734 }
  0x95   : > { %v650_v31 = vpop.permute.xlu1 %649  ;;  %v809_v32 = vsel %vm805_vm4, %v772_v28, %v735_v30 }
  0x96   : > { %2060 = vmatprep.mubr.msk.bf16.mxu1 %vm858_vm5, %v809_v32  ;;  %2097 = vmatmul.mubr.msk.bf16.vlgmr.msra.gmra.mrb[0].mxu0 %vm858_vm5, %v809_v32  ;;  %v778_v39 = vsel %vm768_vm3, %v2479_v24, %v650_v31 }
  0x97   : > { %2061 = vmatmul.mubr.msk.bf16.vlgmr.msra.gmra.mrb[0].mxu1 %vm858_vm5, %v811_v34  ;;  %2100 = vmatprep.mubr.msk.bf16.mxu0 %vm858_vm5, %v811_v34 }
  0x98   : > { %2166 = vmatpush3.bf16.msra.mxu1 %v2443_v0  ;;  %2129 = vmatpush3.bf16.msra.mxu0 %v2645_v22  ;;  %v648_v4 = vpop.permute.xlu0 %647 }
  0x99   : > { %v741_v15 = vpop.permute.xlu1 %740  ;;  %2235 = vmatprep.subr.msk.bf16.mxu0 %vm891_vm2, %v2304_v2  ;;  %2234 = vmatprep.subr.msk.bf16.mxu1 %vm891_vm2, %v2639_v17  ;;  %v776_v40 = vsel %vm768_vm3, %v2484_v33, %v648_v4 }
  0x9a   : > { %v815_v42 = vsel %vm805_vm4, %v778_v39, %v741_v15 }
  0x9c   : > { %v739_v41 = vpop.permute.xlu0 %738  ;;  %2131 = vmatpush3.bf16.msra.mxu0 %v1247_v35  ;;  %2167 = vmatpush3.bf16.msra.mxu1 %v2655_v29 }
  0x9d   : > { %v813_v0 = vsel %vm805_vm4, %v776_v40, %v739_v41  ;;  %v654_v22 = vpop.permute.xlu1 %653 }
  0x9e   : > { %2064 = vmatprep.mubr.msk.bf16.mxu1 %vm858_vm5, %v813_v0  ;;  %2101 = vmatmul.mubr.msk.bf16.gmra.mrb[4].mxu0 %vm858_vm5, %v813_v0  ;;  %v782_v33 = vsel %vm768_vm3, %v2490_v37, %v654_v22 }
  0x9f   : > { %2065 = vmatmul.mubr.msk.bf16.gmra.mrb[4].mxu1 %vm858_vm5, %v815_v42  ;;  %2104 = vmatprep.mubr.msk.bf16.mxu0 %vm858_vm5, %v815_v42 }
  0xa0   : > { %v652_v24 = vpop.permute.xlu0 %651 }
  0xa1   : > { %v745_v17 = vpop.permute.xlu1 %744  ;;  %v780_v29 = vsel %vm768_vm3, %v2502_v49, %v652_v24 }
  0xa2   : > { %v819_v45 = vsel %vm805_vm4, %v782_v33, %v745_v17 }
  0xa4   : > { %v743_v43 = vpop.permute.xlu0 %742 }
  0xa5   : > { %v817_v44 = vsel %vm805_vm4, %v780_v29, %v743_v43  ;;  %v658_v27 = vpop.permute.xlu1 %657  ;;  %v2817_v43 = vld [vmem:[%s3086_s2] ss:$0 sm:$0xff] }
  0xa6   : > { %2068 = vmatprep.mubr.msk.bf16.mxu1 %vm858_vm5, %v817_v44  ;;  %2105 = vmatmul.mubr.msk.bf16.gmra.mrb[8].mxu0 %vm858_vm5, %v817_v44  ;;  %v786_v37 = vsel %vm768_vm3, %v2520_v10, %v658_v27 }
  0xa7   : > { %2069 = vmatmul.mubr.msk.bf16.gmra.mrb[8].mxu1 %vm858_vm5, %v819_v45  ;;  %2108 = vmatprep.mubr.msk.bf16.mxu0 %vm858_vm5, %v819_v45 }
  0xa8   : > { %v656_v46 = vpop.permute.xlu0 %655 }
  0xa9   : > { %v749_v48 = vpop.permute.xlu1 %748  ;;  %v784_v49 = vsel %vm768_vm3, %v2523_v16, %v656_v46 }
  0xaa   : > { %v823_v54 = vsel %vm805_vm4, %v786_v37, %v749_v48 }
  0xac   : > { %v747_v50 = vpop.permute.xlu0 %746 }
  0xad   : > { %v821_v51 = vsel %vm805_vm4, %v784_v49, %v747_v50  ;;  %v662_v53 = vpop.permute.xlu1 %661 }
  0xae   : > { %2072 = vmatprep.mubr.msk.bf16.mxu1 %vm858_vm5, %v821_v51  ;;  %2109 = vmatmul.mubr.msk.bf16.gmra.mrb[12].mxu0 %vm858_vm5, %v821_v51  ;;  %v790_v10 = vsel %vm768_vm3, %v2532_v25, %v662_v53 }
  0xaf   : > { %2073 = vmatmul.mubr.msk.bf16.gmra.mrb[12].mxu1 %vm858_vm5, %v823_v54  ;;  %2132 = vmatprep.mubr.msk.bf16.mxu0 %vm858_vm5, %v811_v34 }
  0xb0   : > { %v660_v55 = vpop.permute.xlu0 %659 }
  0xb1   : > { %v753_v57 = vpop.permute.xlu1 %752  ;;  %v788_v16 = vsel %vm768_vm3, %v2542_v38, %v660_v55 }
  0xb2   : > { %v827_v52 = vsel %vm805_vm4, %v790_v10, %v753_v57 }
  0xb4   : > { %v751_v59 = vpop.permute.xlu0 %750 }
  0xb5   : > { %v825_v60 = vsel %vm805_vm4, %v788_v16, %v751_v59  ;;  %v666_v62 = vpop.permute.xlu1 %665 }
  0xb6   : > { %2076 = vmatprep.mubr.msk.bf16.mxu1 %vm858_vm5, %v825_v60  ;;  %2133 = vmatmul.mubr.msk.bf16.vlgmr.msra.gmra.mrb[0].mxu0 %vm858_vm5, %v813_v0  ;;  %v794_v25 = vsel %vm768_vm3, %v2558_v58, %v666_v62 }
  0xb7   : > { %2077 = vmatmul.mubr.msk.bf16.gmra.mrb[16].mxu1 %vm858_vm5, %v827_v52  ;;  %2136 = vmatprep.mubr.msk.bf16.mxu0 %vm858_vm5, %v815_v42 }
  0xb8   : > { %v664_v1 = vpop.permute.xlu0 %663 }
  0xb9   : > { %v757_v3 = vpop.permute.xlu1 %756  ;;  %v792_v38 = vsel %vm768_vm3, %v2566_v5, %v664_v1 }
  0xba   : > { %v831_v9 = vsel %vm805_vm4, %v794_v25, %v757_v3 }
  0xbc   : > { %v755_v6 = vpop.permute.xlu0 %754 }
  0xbd   : > { %v829_v7 = vsel %vm805_vm4, %v792_v38, %v755_v6  ;;  %v670_v8 = vpop.permute.xlu1 %669 }
  0xbe   : > { %2080 = vmatprep.mubr.msk.bf16.mxu1 %vm858_vm5, %v829_v7  ;;  %2137 = vmatmul.mubr.msk.bf16.gmra.mrb[4].mxu0 %vm858_vm5, %v817_v44  ;;  %v798_v58 = vsel %vm768_vm3, %v2573_v12, %v670_v8 }
  0xbf   : > { %2081 = vmatmul.mubr.msk.bf16.gmra.mrb[20].mxu1 %vm858_vm5, %v831_v9  ;;  %2140 = vmatprep.mubr.msk.bf16.mxu0 %vm858_vm5, %v819_v45  ;;  %v2822_v45 = vld [vmem:[%s3087_s3] ss:$0 sm:$0xff] }
  0xc0   : > { %v668_v11 = vpop.permute.xlu0 %667 }
  0xc1   : > { %v761_v13 = vpop.permute.xlu1 %760  ;;  %v796_v5 = vsel %vm768_vm3, %v2595_v36, %v668_v11 }
  0xc2   : > { %v835_v19 = vsel %vm805_vm4, %v798_v58, %v761_v13 }
  0xc4   : > { %v759_v63 = vpop.permute.xlu0 %758 }
  0xc5   : > { %v833_v14 = vsel %vm805_vm4, %v796_v5, %v759_v63  ;;  %v674_v18 = vpop.permute.xlu1 %673 }
  0xc6   : > { %2084 = vmatprep.mubr.msk.bf16.mxu1 %vm858_vm5, %v833_v14  ;;  %2141 = vmatmul.mubr.msk.bf16.gmra.mrb[8].mxu0 %vm858_vm5, %v821_v51  ;;  %v802_v12 = vsel %vm768_vm3, %v2614_v56, %v674_v18 }
  0xc7   : > { %2085 = vmatmul.mubr.msk.bf16.gmra.mrb[24].mxu1 %vm858_vm5, %v835_v19  ;;  %2144 = vmatprep.mubr.msk.bf16.mxu0 %vm858_vm5, %v823_v54 }
  0xc8   : > { %v672_v20 = vpop.permute.xlu0 %671 }
  0xc9   : > { %v765_v21 = vpop.permute.xlu1 %764  ;;  %v800_v36 = vsel %vm768_vm3, %v2619_v61, %v672_v20 }
  0xca   : > { %v839_v28 = vsel %vm805_vm4, %v802_v12, %v765_v21 }
  0xcc   : > { %v763_v23 = vpop.permute.xlu0 %762 }
  0xcd   : > { %v837_v26 = vsel %vm805_vm4, %v800_v36, %v763_v23  ;;  %v767_v30 = vpop.permute.xlu1 %766 }
  0xce   : > { %2088 = vmatprep.mubr.msk.bf16.mxu1 %vm858_vm5, %v837_v26  ;;  %2145 = vmatmul.mubr.msk.bf16.gmra.mrb[12].mxu0 %vm858_vm5, %v825_v60 }
  0xcf   : > { %2089 = vmatmul.mubr.msk.bf16.gmra.mrb[28].mxu1 %vm858_vm5, %v839_v28  ;;  %2148 = vmatprep.mubr.msk.bf16.mxu0 %vm858_vm5, %v827_v52 }
  0xd0   : > { %2112 = vmatprep.mubr.msk.bf16.mxu1 %vm858_vm5, %v823_v54  ;;  %v676_v56 = vpop.permute.xlu0 %675 }
  0xd1   : > { %v804_v61 = vsel %vm768_vm3, %v2603_v47, %v676_v56 }
  0xd2   : > { %v841_v31 = vsel %vm805_vm4, %v804_v61, %v767_v30 }
  0xd6   : > { %2149 = vmatmul.mubr.msk.bf16.gmra.mrb[16].mxu0 %vm858_vm5, %v829_v7 }
  0xd7   : > { %2113 = vmatmul.mubr.msk.bf16.vlgmr.msra.gmra.mrb[16].mxu1 %vm858_vm5, %v825_v60  ;;  %2152 = vmatprep.mubr.msk.bf16.mxu0 %vm858_vm5, %v831_v9 }
  0xd8   : > { %2116 = vmatprep.mubr.msk.bf16.mxu1 %vm858_vm5, %v827_v52 }
  0xde   : > { %2153 = vmatmul.mubr.msk.bf16.gmra.mrb[20].mxu0 %vm858_vm5, %v833_v14 }
  0xdf   : > { %2117 = vmatmul.mubr.msk.bf16.gmra.mrb[20].mxu1 %vm858_vm5, %v829_v7  ;;  %2156 = vmatprep.mubr.msk.bf16.mxu0 %vm858_vm5, %v835_v19 }
  0xe0   : > { %2120 = vmatprep.mubr.msk.bf16.mxu1 %vm858_vm5, %v831_v9 }
  0xe6   : > { %2157 = vmatmul.mubr.msk.bf16.gmra.mrb[24].mxu0 %vm858_vm5, %v837_v26 }
  0xe7   : > { %2121 = vmatmul.mubr.msk.bf16.gmra.mrb[24].mxu1 %vm858_vm5, %v833_v14  ;;  %2160 = vmatprep.mubr.msk.bf16.mxu0 %vm858_vm5, %v839_v28 }
  0xe8   : > { %2124 = vmatprep.mubr.msk.bf16.mxu1 %vm858_vm5, %v835_v19 }
  0xee   : > { %2161 = vmatmul.mubr.msk.bf16.gmra.mrb[28].mxu0 %vm858_vm5, %v841_v31 }
  0xef   : > { %2125 = vmatmul.mubr.msk.bf16.gmra.mrb[28].mxu1 %vm858_vm5, %v837_v26 }
 0x16a   : > { %v2062_v32 = vpop.f32.mrb[0].mxu1 }
 0x16b   : > { %v929_v2 = vpop.f32.mrb[1].mxu1 }
 0x16c   : > { %v2063_v34 = vpop.f32.mrb[2].mxu1 }
 0x16d   : > { %v932_v4 = vpop.f32.mrb[3].mxu1 }
 0x172   : > { %v2066_v15 = vpop.f32.mrb[4].mxu1 }
 0x173   : > { %v945_v35 = vpop.f32.mrb[5].mxu1 }
 0x174   : > { %v2067_v39 = vpop.f32.mrb[6].mxu1 }
 0x175   : > { %v948_v40 = vpop.f32.mrb[7].mxu1 }
 0x17a   : > { %v2070_v41 = vpop.f32.mrb[8].mxu1 }
 0x17b   : > { %v961_v0 = vpop.f32.mrb[9].mxu1 }
 0x17c   : > { %v2071_v22 = vpop.f32.mrb[10].mxu1 }
 0x17d   : > { %v964_v42 = vpop.f32.mrb[11].mxu1 }
 0x182   : > { %v2806_v47 = vpop.f32.mrb[12].mxu1 }
 0x183   : > { %v2808_v24 = vpop.f32.mrb[13].mxu1 }
 0x184   : > { %v2810_v17 = vpop.f32.mrb[14].mxu1 }
 0x185   : > { %v2812_v33 = vpop.f32.mrb[15].mxu1 }
 0x189   : > { %v2134_v29 = vpop.f32.mrb[0].mxu0 }
 0x18a   : > { %v2168_v44 = vadd.f32 %v2134_v29, %v2062_v32  ;;  %v1283_v27 = vpop.f32.mrb[1].mxu0 }
 0x18b   : > { %v2169_v46 = vadd.f32 %v1283_v27, %v929_v2  ;;  %v2135_v48 = vpop.f32.mrb[2].mxu0 }
 0x18c   : > { %v1451_v37 = vmul.f32 %v2168_v44, %v2817_v43  ;;  %v2170_v49 = vadd.f32 %v2135_v48, %v2063_v34  ;;  %v1286_v50 = vpop.f32.mrb[3].mxu0 }
 0x18d   : > { %v1449_v51 = vmul.f32 %v2169_v46, %v2817_v43  ;;  %v2171_v53 = vadd.f32 %v1286_v50, %v932_v4 }
 0x18e   : > { %v2827_v54 = vadd.f32 %v2822_v45, %v1451_v37  ;;  %v1452_v55 = vmul.f32 %v2170_v49, %v2817_v43 }
 0x18f   : > { %v1488_v57 = vadd.f32 %v2822_v45, %v1449_v51  ;;  %v1450_v10 = vmul.f32 %v2171_v53, %v2817_v43 }
 0x190   : > { %v1554_v16 = vmin.f32 %v2827_v54, 0.0  ;;  %v2834_v59 = vadd.f32 %v2822_v45, %v1452_v55  ;;  %vm1522_vm8 = vcmp.gt.f32.partialorder %v2827_v54, 0.0 }
 0x191   : > { %v2837_v60 = vadd.f32 %v2822_v45, %v1450_v10  ;;  %v2138_v62 = vpop.f32.mrb[4].mxu0  ;;  %v1552_v52 = vmin.f32 %v1488_v57, 0.0  ;;  %vm1520_vm6 = vcmp.gt.f32.partialorder %v1488_v57, 0.0 }
 0x192   : > { %v2172_v1 = vadd.f32 %v2138_v62, %v2066_v15  ;;  %v1299_v3 = vpop.f32.mrb[5].mxu0  ;;  %v1555_v8 = vmin.f32 %v2834_v59, 0.0  ;;  %v1588_v58 = vmul.f32 1.442695, %v1554_v16  ;;  %vm1523_vm9 = vcmp.gt.f32.partialorder %v2834_v59, 0.0 }
 0x193   : > { %v1553_v25 = vmin.f32 %v2837_v60, 0.0  ;;  %v2173_v38 = vadd.f32 %v1299_v3, %v945_v35  ;;  %v2139_v6 = vpop.f32.mrb[6].mxu0  ;;  %v1584_v7 = vmul.f32 1.442695, %v1552_v52  ;;  %vm1521_vm7 = vcmp.gt.f32.partialorder %v2837_v60, 0.0 }
 0x194   : > { %v1455_v9 = vmul.f32 %v2172_v1, %v2817_v43  ;;  %v2174_v11 = vadd.f32 %v2139_v6, %v2067_v39  ;;  %v1302_v13 = vpop.f32.mrb[7].mxu0  ;;  %v1590_v20 = vmul.f32 1.442695, %v1555_v8 }
 0x195   : > { %v1453_v5 = vmul.f32 %v2173_v38, %v2817_v43  ;;  %v2175_v63 = vadd.f32 %v1302_v13, %v948_v40  ;;  %2305 = vpow2.f32 %v1584_v7  ;;  %v1586_v14 = vmul.f32 1.442695, %v1553_v25 }
 0x196   : > { %v2848_v12 = vadd.f32 %v2822_v45, %v1455_v9  ;;  %v1456_v36 = vmul.f32 %v2174_v11, %v2817_v43 }
 0x197   : > { %v2844_v18 = vadd.f32 %v2822_v45, %v1453_v5  ;;  %v1454_v19 = vmul.f32 %v2175_v63, %v2817_v43  ;;  %2307 = vpow2.f32 %v1586_v14 }
 0x198   : > { %2309 = vpow2.f32 %v1588_v58  ;;  %v1558_v34 = vmin.f32 %v2848_v12, 0.0  ;;  %v2858_v4 = vadd.f32 %v2822_v45, %v1456_v36  ;;  %vm1526_vm12 = vcmp.gt.f32.partialorder %v2848_v12, 0.0 }
 0x199   : > { %v1556_v21 = vmin.f32 %v2844_v18, 0.0  ;;  %v2853_v23 = vadd.f32 %v2822_v45, %v1454_v19  ;;  %v2142_v26 = vpop.f32.mrb[8].mxu0  ;;  %2311 = vpow2.f32 %v1590_v20  ;;  %vm1524_vm10 = vcmp.gt.f32.partialorder %v2844_v18, 0.0 }
 0x19a   : > { %v2176_v28 = vadd.f32 %v2142_v26, %v2070_v41  ;;  %v1315_v56 = vpop.f32.mrb[9].mxu0  ;;  %vm1527_vm13 = vcmp.gt.f32.partialorder %v2858_v4, 0.0 }
 0x19b   : > { %v2177_v61 = vadd.f32 %v1315_v56, %v961_v0  ;;  %v2143_v30 = vpop.f32.mrb[10].mxu0  ;;  %v1557_v31 = vmin.f32 %v2853_v23, 0.0  ;;  %v1592_v35 = vmul.f32 1.442695, %v1556_v21  ;;  %v1559_v0 = vmin.f32 %v2858_v4, 0.0 }
 0x19c   : > { %v2178_v32 = vadd.f32 %v2143_v30, %v2071_v22  ;;  %v1318_v2 = vpop.f32.mrb[11].mxu0  ;;  %v1596_v22 = vmul.f32 1.442695, %v1558_v34  ;;  %v1459_v10 = vmul.f32 %v2176_v28, %v2817_v43  ;;  %vm1525_vm11 = vcmp.gt.f32.partialorder %v2853_v23, 0.0 }
 0x19d   : > { %v2179_v15 = vadd.f32 %v1318_v2, %v964_v42  ;;  %v1457_v40 = vmul.f32 %v2177_v61, %v2817_v43  ;;  %v1594_v41 = vmul.f32 1.442695, %v1557_v31  ;;  %2313 = vpow2.f32 %v1592_v35 }
 0x19e   : > { %v1460_v16 = vmul.f32 %v2178_v32, %v2817_v43  ;;  %v1598_v25 = vmul.f32 1.442695, %v1559_v0 }
 0x19f   : > { %v2306_v39 = vpop.eup %2305  ;;  %v1458_v48 = vmul.f32 %v2179_v15, %v2817_v43  ;;  %v2865_v51 = vadd.f32 %v2822_v45, %v1457_v40  ;;  %2315 = vpow2.f32 %v1594_v41 }
 0x1a0   : > { %v1967_v29 = vadd.f32 -1.0, %v2306_v39  ;;  %2317 = vpow2.f32 %v1596_v22  ;;  %v2882_v6 = vadd.f32 %v2822_v45, %v1460_v16 }
 0x1a1   : > { %v2308_v44 = vpop.eup %2307  ;;  %v2146_v27 = vpop.f32.mrb[12].mxu0  ;;  %v2874_v1 = vadd.f32 %v2822_v45, %v1458_v48  ;;  %v1560_v38 = vmin.f32 %v2865_v51, 0.0  ;;  %2319 = vpow2.f32 %v1598_v25  ;;  %vm1528_vm14 = vcmp.gt.f32.partialorder %v2865_v51, 0.0 }
 0x1a2   : > { %v2310_v46 = vpop.eup %2309  ;;  %v2180_v37 = vadd.f32 %v2146_v27, %v2806_v47  ;;  %v1331_v49 = vpop.f32.mrb[13].mxu0  ;;  %v1680_v42 = vsel %vm1520_vm6, %v1488_v57, %v1967_v29  ;;  %v1968_v50 = vadd.f32 -1.0, %v2308_v44  ;;  %v1563_v20 = vmin.f32 %v2882_v6, 0.0 }
 0x1a3   : > { %v2181_v53 = vadd.f32 %v1331_v49, %v2808_v24  ;;  %1712 = vxpose.xlu0.b32.start [1/16] (narrow) %v1680_v42, 8  ;;  %v2147_v55 = vpop.f32.mrb[14].mxu0  ;;  %v2312_v57 = vpop.eup %2311  ;;  %v1969_v3 = vadd.f32 -1.0, %v2310_v46  ;;  %v1561_v8 = vmin.f32 %v2874_v1, 0.0  ;;  %v1600_v14 = vmul.f32 1.442695, %v1560_v38 }
 0x1a4   : > { %v2182_v62 = vadd.f32 %v2147_v55, %v2810_v17  ;;  %v1334_v52 = vpop.f32.mrb[15].mxu0  ;;  %v1681_v24 = vsel %vm1521_vm7, %v2837_v60, %v1968_v50  ;;  %v2879_v17 = vadd.f32 %v2822_v45, %v1459_v10  ;;  %v1970_v7 = vadd.f32 -1.0, %v2312_v57 }
 0x1a5   : > { %v2183_v47 = vadd.f32 %v1334_v52, %v2812_v33  ;;  %v1682_v60 = vsel %vm1522_vm8, %v2827_v54, %v1969_v3  ;;  %v1463_v21 = vmul.f32 %v2180_v37, %v2817_v43  ;;  %v1461_v28 = vmul.f32 %v2181_v53, %v2817_v43 }
 0x1a6   : > { %v1562_v19 = vmin.f32 %v2879_v17, 0.0  ;;  %v1683_v31 = vsel %vm1523_vm9, %v2834_v59, %v1970_v7  ;;  %v1602_v35 = vmul.f32 1.442695, %v1561_v8  ;;  %v1464_v40 = vmul.f32 %v2182_v62, %v2817_v43 }
 0x1a7   : > { %1713 = vxpose.xlu0.b32.cont [2/16] (narrow) %v1681_v24, 8  ;;  %v2314_v13 = vpop.eup %2313  ;;  %2321 = vpow2.f32 %v1600_v14  ;;  %v2905_v44 = vadd.f32 %v2822_v45, %v1463_v21  ;;  %v2913_v22 = vadd.f32 %v2822_v45, %v1461_v28  ;;  %v1462_v46 = vmul.f32 %v2183_v47, %v2817_v43 }
 0x1a8   : > { %v1971_v15 = vadd.f32 -1.0, %v2314_v13  ;;  %v1604_v27 = vmul.f32 1.442695, %v1562_v19  ;;  %v2928_v62 = vadd.f32 %v2822_v45, %v1464_v40  ;;  %2323 = vpow2.f32 %v1602_v35 }
 0x1a9   : > { %v2150_v33 = vpop.f32.mrb[16].mxu0  ;;  %v2316_v32 = vpop.eup %2315  ;;  %v1564_v8 = vmin.f32 %v2913_v22, 0.0  ;;  %v2939_v14 = vadd.f32 %v2822_v45, %v1462_v46  ;;  %vm1529_vm15 = vcmp.gt.f32.partialorder %v2874_v1, 0.0  ;;  %vm1530_vm0 = vcmp.gt.f32.partialorder %v2879_v17, 0.0 }
 0x1aa   : > { %v2114_v9 = vpop.f32.mrb[16].mxu1  ;;  %v1347_v11 = vpop.f32.mrb[17].mxu0  ;;  %v1972_v49 = vadd.f32 -1.0, %v2316_v32  ;;  %v1684_v55 = vsel %vm1524_vm10, %v2844_v18, %v1971_v15  ;;  %2325 = vpow2.f32 %v1604_v27  ;;  %vm1531_vm4 = vcmp.gt.f32.partialorder %v2882_v6, 0.0 }
 0x1ab   : > { %v2184_v58 = vadd.f32 %v2150_v33, %v2114_v9  ;;  %1714 = vxpose.xlu0.b32.cont [3/16] (narrow) %v1682_v60, 8  ;;  %v1168_v5 = vpop.f32.mrb[17].mxu1  ;;  %v2151_v63 = vpop.f32.mrb[18].mxu0  ;;  %v1565_v35 = vmin.f32 %v2939_v14, 0.0  ;;  %vm1532_vm6 = vcmp.gt.f32.partialorder %v2913_v22, 0.0  ;;  %vm1533_vm8 = vcmp.gt.f32.partialorder %v2939_v14, 0.0 }
 0x1ac   : > { %v2185_v36 = vadd.f32 %v1347_v11, %v1168_v5  ;;  %v2115_v26 = vpop.f32.mrb[18].mxu1  ;;  %v1350_v54 = vpop.f32.mrb[19].mxu0  ;;  %v1685_v13 = vsel %vm1525_vm11, %v2853_v23, %v1972_v49  ;;  %vm1534_vm10 = vcmp.gt.f32.partialorder %v2905_v44, 0.0 }
 0x1ad   : > { %v1467_v56 = vmul.f32 %v2184_v58, %v2817_v43  ;;  %v2186_v61 = vadd.f32 %v2151_v63, %v2115_v26  ;;  %v1171_v30 = vpop.f32.mrb[19].mxu1  ;;  %v2318_v39 = vpop.eup %2317 }
 0x1ae   : > { %v1465_v2 = vmul.f32 %v2185_v36, %v2817_v43  ;;  %v2187_v34 = vadd.f32 %v1350_v54, %v1171_v30  ;;  %v1973_v10 = vadd.f32 -1.0, %v2318_v39  ;;  %v2320_v3 = vpop.eup %2319  ;;  %v1606_v36 = vmul.f32 1.442695, %v1563_v20 }
 0x1af   : > { %v2901_v29 = vadd.f32 %v2822_v45, %v1467_v56  ;;  %v1468_v41 = vmul.f32 %v2186_v61, %v2817_v43  ;;  %1715 = vxpose.xlu0.b32.cont [4/16] (narrow) %v1683_v31, 8  ;;  %v1974_v19 = vadd.f32 -1.0, %v2320_v3  ;;  %v1566_v56 = vmin.f32 %v2905_v44, 0.0 }
 0x1b0   : > { %v2908_v59 = vadd.f32 %v2822_v45, %v1465_v2  ;;  %v1466_v0 = vmul.f32 %v2187_v34, %v2817_v43  ;;  %v1686_v30 = vsel %vm1526_vm12, %v2848_v12, %v1973_v10  ;;  %v1567_v20 = vmin.f32 %v2928_v62, 0.0 }
 0x1b1   : > { %v2917_v48 = vadd.f32 %v2822_v45, %v1468_v41  ;;  %v2154_v37 = vpop.f32.mrb[20].mxu0  ;;  %v1570_v52 = vmin.f32 %v2901_v29, 0.0  ;;  %v2322_v28 = vpop.eup %2321  ;;  %v1687_v12 = vsel %vm1527_vm13, %v2858_v4, %v1974_v19  ;;  %vm1538_vm3 = vcmp.gt.f32.partialorder %v2901_v29, 0.0 }
 0x1b2   : > { %v2920_v42 = vadd.f32 %v2822_v45, %v1466_v0  ;;  %v2118_v50 = vpop.f32.mrb[20].mxu1  ;;  %v1363_v53 = vpop.f32.mrb[21].mxu0  ;;  %v1568_v16 = vmin.f32 %v2908_v59, 0.0  ;;  %v1608_v0 = vmul.f32 1.442695, %v1564_v8  ;;  %vm1536_vm1 = vcmp.gt.f32.partialorder %v2908_v59, 0.0 }
 0x1b3   : > { %v2188_v47 = vadd.f32 %v2154_v37, %v2118_v50  ;;  %1716 = vxpose.xlu0.b32.cont [5/16] (narrow) %v1684_v55, 8  ;;  %v1184_v57 = vpop.f32.mrb[21].mxu1  ;;  %v2155_v24 = vpop.f32.mrb[22].mxu0  ;;  %v1571_v9 = vmin.f32 %v2917_v48, 0.0  ;;  %v1620_v21 = vmul.f32 1.442695, %v1570_v52 }
 0x1b4   : > { %v1569_v25 = vmin.f32 %v2920_v42, 0.0  ;;  %v2189_v38 = vadd.f32 %v1363_v53, %v1184_v57  ;;  %v2119_v18 = vpop.f32.mrb[22].mxu1  ;;  %v1366_v33 = vpop.f32.mrb[23].mxu0  ;;  %v1616_v7 = vmul.f32 1.442695, %v1568_v16  ;;  %v1975_v50 = vadd.f32 -1.0, %v2322_v28 }
 0x1b5   : > { %v2190_v11 = vadd.f32 %v2155_v24, %v2119_v18  ;;  %v1187_v60 = vpop.f32.mrb[23].mxu1  ;;  %v1471_v26 = vmul.f32 %v2188_v47, %v2817_v43  ;;  %v1622_v31 = vmul.f32 1.442695, %v1571_v9  ;;  %v2324_v53 = vpop.eup %2323  ;;  %v1610_v18 = vmul.f32 1.442695, %v1565_v35 }
 0x1b6   : > { %v1469_v58 = vmul.f32 %v2189_v38, %v2817_v43  ;;  %v2191_v5 = vadd.f32 %v1366_v33, %v1187_v60  ;;  %2327 = vpow2.f32 %v1616_v7  ;;  %v1618_v63 = vmul.f32 1.442695, %v1569_v25  ;;  %v2326_v4 = vpop.eup %2325 }
 0x1b7   : > { %1717 = vxpose.xlu0.b32.cont [6/16] (narrow) %v1685_v13, 8  ;;  %v2964_v27 = vadd.f32 %v2822_v45, %v1471_v26  ;;  %v1472_v55 = vmul.f32 %v2190_v11, %v2817_v43  ;;  %v1976_v9 = vadd.f32 -1.0, %v2324_v53  ;;  %vm1537_vm2 = vcmp.gt.f32.partialorder %v2920_v42, 0.0 }
 0x1b8   : > { %v2945_v54 = vadd.f32 %v2822_v45, %v1469_v58  ;;  %v1470_v23 = vmul.f32 %v2191_v5, %v2817_v43  ;;  %2329 = vpow2.f32 %v1618_v63  ;;  %v1688_v58 = vsel %vm1528_vm14, %v2865_v51, %v1975_v50 }
 0x1b9   : > { %v2158_v61 = vpop.f32.mrb[24].mxu0  ;;  %2331 = vpow2.f32 %v1620_v21  ;;  %v2981_v11 = vadd.f32 %v2822_v45, %v1472_v55  ;;  %v1574_v19 = vmin.f32 %v2964_v27, 0.0  ;;  %vm1539_vm5 = vcmp.gt.f32.partialorder %v2917_v48, 0.0 }
 0x1ba   : > { %v1572_v32 = vmin.f32 %v2945_v54, 0.0  ;;  %v2956_v2 = vadd.f32 %v2822_v45, %v1470_v23  ;;  %v2122_v34 = vpop.f32.mrb[24].mxu1  ;;  %v1379_v15 = vpop.f32.mrb[25].mxu0  ;;  %2333 = vpow2.f32 %v1606_v36  ;;  %vm1540_vm7 = vcmp.gt.f32.partialorder %v2945_v54, 0.0 }
 0x1bb   : > { %v2192_v39 = vadd.f32 %v2158_v61, %v2122_v34  ;;  %1718 = vxpose.xlu0.b32.cont [7/16] (narrow) %v1686_v30, 8  ;;  %v1200_v40 = vpop.f32.mrb[25].mxu1  ;;  %v2159_v41 = vpop.f32.mrb[26].mxu0  ;;  %2335 = vpow2.f32 %v1622_v31  ;;  %v1628_v50 = vmul.f32 1.442695, %v1574_v19  ;;  %vm1542_vm11 = vcmp.gt.f32.partialorder %v2964_v27, 0.0 }
 0x1bc   : > { %v2193_v46 = vadd.f32 %v1379_v15, %v1200_v40  ;;  %v2123_v37 = vpop.f32.mrb[26].mxu1  ;;  %v1382_v49 = vpop.f32.mrb[27].mxu0  ;;  %v1573_v47 = vmin.f32 %v2956_v2, 0.0  ;;  %v1624_v3 = vmul.f32 1.442695, %v1572_v32  ;;  %2337 = vpow2.f32 %v1608_v0 }
 0x1bd   : > { %v1475_v10 = vmul.f32 %v2192_v39, %v2817_v43  ;;  %v2194_v16 = vadd.f32 %v2159_v41, %v2123_v37  ;;  %v1203_v52 = vpop.f32.mrb[27].mxu1  ;;  %v1612_v32 = vmul.f32 1.442695, %v1566_v56  ;;  %v1689_v40 = vsel %vm1529_vm15, %v2874_v1, %v1976_v9 }
 0x1be   : > { %v1473_v57 = vmul.f32 %v2193_v46, %v2817_v43  ;;  %v2195_v24 = vadd.f32 %v1382_v49, %v1203_v52  ;;  %2339 = vpow2.f32 %v1624_v3  ;;  %v1626_v23 = vmul.f32 1.442695, %v1573_v47 }
 0x1bf   : > { %v2971_v25 = vadd.f32 %v2822_v45, %v1475_v10  ;;  %v1476_v38 = vmul.f32 %v2194_v16, %v2817_v43  ;;  %1719 = vxpose.xlu0.b32.cont [8/16] (narrow) %v1687_v12, 8  ;;  %v1977_v41 = vadd.f32 -1.0, %v2326_v4  ;;  %2341 = vpow2.f32 %v1610_v18 }
 0x1c0   : > { %v2328_v33 = vpop.eup %2327  ;;  %v2976_v7 = vadd.f32 %v2822_v45, %v1473_v57  ;;  %v1474_v8 = vmul.f32 %v2195_v24, %v2817_v43  ;;  %v1575_v12 = vmin.f32 %v2981_v11, 0.0  ;;  %2343 = vpow2.f32 %v1626_v23 }
 0x1c1   : > { %v2984_v60 = vadd.f32 %v2822_v45, %v1476_v38  ;;  %v2162_v13 = vpop.f32.mrb[28].mxu0  ;;  %v1983_v5 = vadd.f32 -1.0, %v2328_v33  ;;  %v1690_v47 = vsel %vm1530_vm0, %v2879_v17, %v1977_v41  ;;  %2345 = vpow2.f32 %v1612_v32 }
 0x1c2   : > { %v2330_v63 = vpop.eup %2329  ;;  %v2991_v21 = vadd.f32 %v2822_v45, %v1474_v8  ;;  %v2126_v36 = vpop.f32.mrb[28].mxu1  ;;  %v1576_v38 = vmin.f32 %v2976_v7, 0.0  ;;  %2347 = vpow2.f32 %v1628_v50  ;;  %v1630_v18 = vmul.f32 1.442695, %v1575_v12 }
 0x1c3   : > { %v1395_v26 = vpop.f32.mrb[29].mxu0  ;;  %v2196_v28 = vadd.f32 %v2162_v13, %v2126_v36  ;;  %1720 = vxpose.xlu0.b32.cont [9/16] (narrow) %v1688_v58, 8  ;;  %v1216_v61 = vpop.f32.mrb[29].mxu1  ;;  %v1696_v30 = vsel %vm1536_vm1, %v2908_v59, %v1983_v5  ;;  %v1984_v51 = vadd.f32 -1.0, %v2330_v63  ;;  %v1578_v19 = vmin.f32 %v2971_v25, 0.0 }
 0x1c4   : > { %v2163_v31 = vpop.f32.mrb[30].mxu0  ;;  %v2332_v34 = vpop.eup %2331  ;;  %v2197_v15 = vadd.f32 %v1395_v26, %v1216_v61  ;;  %1744 = vxpose.xlu1.b32.start [1/16] (narrow) %v1696_v30, 8  ;;  %v1577_v13 = vmin.f32 %v2991_v21, 0.0  ;;  %v1632_v58 = vmul.f32 1.442695, %v1576_v38  ;;  %vm1541_vm9 = vcmp.gt.f32.partialorder %v2956_v2, 0.0 }
 0x1c5   : > { %v2127_v35 = vpop.f32.mrb[30].mxu1  ;;  %v1398_v39 = vpop.f32.mrb[31].mxu0  ;;  %v1479_v59 = vmul.f32 %v2196_v28, %v2817_v43  ;;  %v1697_v10 = vsel %vm1537_vm2, %v2920_v42, %v1984_v51  ;;  %v1985_v16 = vadd.f32 -1.0, %v2332_v34  ;;  %v1614_v42 = vmul.f32 1.442695, %v1567_v20 }
 0x1c6   : > { %v2198_v0 = vadd.f32 %v2163_v31, %v2127_v35  ;;  %v1219_v46 = vpop.f32.mrb[31].mxu1  ;;  %v2334_v56 = vpop.eup %2333  ;;  %v1477_v37 = vmul.f32 %v2197_v15, %v2817_v43  ;;  %v1634_v26 = vmul.f32 1.442695, %v1577_v13  ;;  %v1579_v31 = vmin.f32 %v2984_v60, 0.0 }
 0x1c7   : > { %v2199_v49 = vadd.f32 %v1398_v39, %v1219_v46  ;;  %v2336_v53 = vpop.eup %2335  ;;  %v3006_v55 = vadd.f32 %v2822_v45, %v1479_v59  ;;  %1721 = vxpose.xlu0.b32.cont [10/16] (narrow) %v1689_v40, 8  ;;  %v1978_v3 = vadd.f32 -1.0, %v2334_v56  ;;  %v1698_v17 = vsel %vm1538_vm3, %v2901_v29, %v1985_v16 }
 0x1c8   : > { %v1480_v1 = vmul.f32 %v2198_v0, %v2817_v43  ;;  %v3011_v52 = vadd.f32 %v2822_v45, %v1477_v37  ;;  %1745 = vxpose.xlu1.b32.cont [2/16] (narrow) %v1697_v10, 8  ;;  %v2338_v57 = vpop.eup %2337  ;;  %v1986_v33 = vadd.f32 -1.0, %v2336_v53  ;;  %2349 = vpow2.f32 %v1614_v42 }
 0x1c9   : > { %v1478_v4 = vmul.f32 %v2199_v49, %v2817_v43  ;;  %v2340_v8 = vpop.eup %2339  ;;  %v1691_v9 = vsel %vm1531_vm4, %v2882_v6, %v1978_v3  ;;  %2351 = vpow2.f32 %v1630_v18  ;;  %v1638_v40 = vmul.f32 1.442695, %v1579_v31 }
 0x1ca   : > { %v3019_v24 = vadd.f32 %v2822_v45, %v1480_v1  ;;  %v2342_v20 = vpop.eup %2341  ;;  %v1699_v5 = vsel %vm1539_vm5, %v2917_v48, %v1986_v33  ;;  %v1987_v29 = vadd.f32 -1.0, %v2340_v8  ;;  %2353 = vpow2.f32 %v1632_v58 }
 0x1cb   : > { %v3025_v43 = vadd.f32 %v2822_v45, %v1478_v4  ;;  %1722 = vxpose.xlu0.b32.cont [11/16] (narrow) %v1690_v47, 8  ;;  %v1979_v45 = vadd.f32 -1.0, %v2338_v57  ;;  %v2344_v63 = vpop.eup %2343  ;;  %v1980_v6 = vadd.f32 -1.0, %v2342_v20  ;;  %2355 = vpow2.f32 %v1634_v26 }
 0x1cc   : > { %1746 = vxpose.xlu1.b32.cont [3/16] (narrow) %v1698_v17, 8  ;;  %v2346_v23 = vpop.eup %2345  ;;  %v1700_v28 = vsel %vm1540_vm7, %v2945_v54, %v1987_v29  ;;  %v1988_v61 = vadd.f32 -1.0, %v2344_v63  ;;  %v1580_v35 = vmin.f32 %v3011_v52, 0.0  ;;  %vm1535_vm12 = vcmp.gt.f32.partialorder %v2928_v62, 0.0 }
 0x1cd   : > { %v1692_v36 = vsel %vm1532_vm6, %v2913_v22, %v1979_v45  ;;  %v2348_v48 = vpop.eup %2347  ;;  %v1693_v30 = vsel %vm1533_vm8, %v2939_v14, %v1980_v6  ;;  %v1981_v51 = vadd.f32 -1.0, %v2346_v23  ;;  %v1636_v22 = vmul.f32 1.442695, %v1578_v19 }
 0x1ce   : > { %v1701_v34 = vsel %vm1541_vm9, %v2956_v2, %v1988_v61  ;;  %v1989_v15 = vadd.f32 -1.0, %v2348_v48  ;;  %vm1543_vm13 = vcmp.gt.f32.partialorder %v2981_v11, 0.0  ;;  %v1581_v2 = vmin.f32 %v3025_v43, 0.0 }
 0x1cf   : > { %1723 = vxpose.xlu0.b32.cont [12/16] (narrow) %v1691_v9, 8  ;;  %v1694_v14 = vsel %vm1534_vm10, %v2905_v44, %v1981_v51  ;;  %2357 = vpow2.f32 %v1636_v22  ;;  %v1640_v46 = vmul.f32 1.442695, %v1580_v35  ;;  %vm1544_vm14 = vcmp.gt.f32.partialorder %v2976_v7, 0.0 }
 0x1d0   : > { %1747 = vxpose.xlu1.b32.cont [4/16] (narrow) %v1699_v5, 8  ;;  %v1702_v41 = vsel %vm1542_vm11, %v2964_v27, %v1989_v15  ;;  %2359 = vpow2.f32 %v1638_v40  ;;  %v1582_v27 = vmin.f32 %v3006_v55, 0.0  ;;  %v1642_v49 = vmul.f32 1.442695, %v1581_v2 }
 0x1d1   : > { %2361 = vpow2.f32 %v1640_v46  ;;  %vm1545_vm15 = vcmp.gt.f32.partialorder %v2991_v21, 0.0  ;;  %vm1546_vm0 = vcmp.gt.f32.partialorder %v2971_v25, 0.0  ;;  %vm1547_vm1 = vcmp.gt.f32.partialorder %v2984_v60, 0.0 }
 0x1d2   : > { %v2350_v32 = vpop.eup %2349  ;;  %2363 = vpow2.f32 %v1642_v49  ;;  %vm1548_vm2 = vcmp.gt.f32.partialorder %v3011_v52, 0.0  ;;  %vm1549_vm3 = vcmp.gt.f32.partialorder %v3025_v43, 0.0  ;;  %vm1550_vm4 = vcmp.gt.f32.partialorder %v3006_v55, 0.0 }
 0x1d3   : > { %1724 = vxpose.xlu0.b32.cont [13/16] (narrow) %v1692_v36, 8  ;;  %v2352_v54 = vpop.eup %2351  ;;  %v1982_v39 = vadd.f32 -1.0, %v2350_v32  ;;  %vm1551_vm5 = vcmp.gt.f32.partialorder %v3019_v24, 0.0 }
 0x1d4   : > { %1748 = vxpose.xlu1.b32.cont [5/16] (narrow) %v1700_v28, 8  ;;  %v1990_v12 = vadd.f32 -1.0, %v2352_v54  ;;  %v2354_v59 = vpop.eup %2353 }
 0x1d5   : > { %v1695_v0 = vsel %vm1535_vm12, %v2928_v62, %v1982_v39  ;;  %v1991_v56 = vadd.f32 -1.0, %v2354_v59  ;;  %v2356_v37 = vpop.eup %2355  ;;  %v1583_v62 = vmin.f32 %v3019_v24, 0.0 }
 0x1d6   : > { %v1703_v44 = vsel %vm1543_vm13, %v2981_v11, %v1990_v12  ;;  %v1992_v53 = vadd.f32 -1.0, %v2356_v37  ;;  %v1644_v11 = vmul.f32 1.442695, %v1582_v27 }
 0x1d7   : > { %1725 = vxpose.xlu0.b32.cont [14/16] (narrow) %v1693_v30, 8  ;;  %v1704_v50 = vsel %vm1544_vm14, %v2976_v7, %v1991_v56  ;;  %v1646_v47 = vmul.f32 1.442695, %v1583_v62 }
 0x1d8   : > { %1749 = vxpose.xlu1.b32.cont [6/16] (narrow) %v1701_v34, 8  ;;  %v1705_v10 = vsel %vm1545_vm15, %v2991_v21, %v1992_v53  ;;  %2365 = vpow2.f32 %v1644_v11 }
 0x1d9   : > { %v2358_v1 = vpop.eup %2357  ;;  %2367 = vpow2.f32 %v1646_v47 }
 0x1da   : > { %v1993_v16 = vadd.f32 -1.0, %v2358_v1  ;;  %v2360_v4 = vpop.eup %2359 }
 0x1db   : > { %1726 = vxpose.xlu0.b32.cont [15/16] (narrow) %v1694_v14, 8  ;;  %v1994_v57 = vadd.f32 -1.0, %v2360_v4  ;;  %v2362_v3 = vpop.eup %2361 }
 0x1dc   : > { %1750 = vxpose.xlu1.b32.cont [7/16] (narrow) %v1702_v41, 8  ;;  %v1706_v7 = vsel %vm1546_vm0, %v2971_v25, %v1993_v16  ;;  %v1995_v38 = vadd.f32 -1.0, %v2362_v3  ;;  %v2364_v18 = vpop.eup %2363 }
 0x1dd   : > { %v1707_v42 = vsel %vm1547_vm1, %v2984_v60, %v1994_v57  ;;  %v1996_v17 = vadd.f32 -1.0, %v2364_v18 }
 0x1de   : > { %v1708_v21 = vsel %vm1548_vm2, %v3011_v52, %v1995_v38 }
 0x1df   : > { %1727 = vxpose.xlu0.b32.end [16/16] (narrow) %v1695_v0, 8  ;;  %v1709_v25 = vsel %vm1549_vm3, %v3025_v43, %v1996_v17 }
 0x1e0   : > { %1751 = vxpose.xlu1.b32.cont [8/16] (narrow) %v1703_v44, 8 }
 0x1e2   : > { %v2366_v33 = vpop.eup %2365 }
 0x1e3   : > { %v1997_v8 = vadd.f32 -1.0, %v2366_v33  ;;  %v2368_v9 = vpop.eup %2367 }
 0x1e4   : > { %1752 = vxpose.xlu1.b32.cont [9/16] (narrow) %v1704_v50, 8  ;;  %v1998_v20 = vadd.f32 -1.0, %v2368_v9 }
 0x1e5   : > { %v1710_v60 = vsel %vm1550_vm4, %v3006_v55, %v1997_v8 }
 0x1e6   : > { %v1711_v52 = vsel %vm1551_vm5, %v3019_v24, %v1998_v20 }
 0x1e8   : > { %1753 = vxpose.xlu1.b32.cont [10/16] (narrow) %v1705_v10, 8 }
 0x1ec   : > { %1754 = vxpose.xlu1.b32.cont [11/16] (narrow) %v1706_v7, 8 }
 0x1f0   : > { %1755 = vxpose.xlu1.b32.cont [12/16] (narrow) %v1707_v42, 8 }
 0x1f4   : > { %1756 = vxpose.xlu1.b32.cont [13/16] (narrow) %v1708_v21, 8 }
 0x1f8   : > { %1757 = vxpose.xlu1.b32.cont [14/16] (narrow) %v1709_v25, 8 }
 0x1fc   : > { %1758 = vxpose.xlu1.b32.cont [15/16] (narrow) %v1710_v60, 8 }
 0x200   : > { %1759 = vxpose.xlu1.b32.end [16/16] (narrow) %v1711_v52, 8 }
 0x223   : > { %v1728_v43 = vpop.trf.xlu0 }
 0x224   : > { %1776 = vst [vmem:[%s219_s22] sm:$0xff] %v1728_v43 }
 0x244   : > { %v1760_v13 = vpop.trf.xlu1 }
 0x245   : > { %1777 = vst [vmem:[%s219_s22 + $0x8] sm:$0xff] %v1760_v13 }
 0x246 PF: > { %s14_s17 = sadd.s32 1, %s2391_s17   ;;  %s3089_s15 = smov %s2387_s16 }
 0x247   : > { %p11_p5 = scmp.ge.s32.totalorder %s14_s17, 4   ;;  %s3090_s16 = smov %s3092_s18 }
 0x249   :  { %13 = sbr.rel (!%p11_p5) target bundleno = 2 (0x2), region = 69 }

</bundles_post_ra>
